<compile_context>
chip_gen: v7x
topology: tpu7x:2x2x1
jax: 0.10.0
libtpu: 0.0.40
codegen_flags: <defaults>
</compile_context>

<pallas_src>
import functools
import math

import jax
import jax.numpy as jnp
from jax import lax
from jax.experimental import pallas as pl
from jax.experimental.pallas import tpu as pltpu


# ----------------------------------------------------------------------------
# Single fused kernel: all permutation-equivariant layers + head.
# ----------------------------------------------------------------------------
def _gnn2d_fused_kernel(a_ref, *refs, n_layers, M, Nt, K, Ns,
                        equal_user, equal_subcarrier, out_lanes):
    w_refs = refs[:3 * n_layers]                 # per layer: P1.T, 0.1*P3.T, 0.1*P4.T
    out_ref = refs[3 * n_layers]                 # (B, M + 2*Ns, out_lanes) f32 slab

    f32 = jnp.float32
    B = a_ref.shape[0]
    R = B * M * Nt

    a = a_ref[...]                               # (B, M, Nt, C0), f32

    # -------------------- permutation-equivariant layers --------------------
    for li in range(n_layers):
        w1 = w_refs[3 * li][...]                 # (Cin, Cout)  = P1.T
        w3 = w_refs[3 * li + 1][...]             # (Cin, Cout)  = 0.1 * P3.T
        w4 = w_refs[3 * li + 2][...]             # (Cin, Cout)  = 0.1 * P4.T
        cin, cout = w1.shape

        mnt = jnp.mean(a, axis=2)                # (B, M, Cin)   mean over antennas
        mm = jnp.mean(a, axis=1)                 # (B, Nt, Cin)  mean over subcarriers

        # P3/P4 matmuls run on the un-broadcast mean rows (B*M and B*Nt rows);
        # the broadcast only happens in the cheap VPU adds below.
        out = jnp.dot(a.reshape(R, cin), w1,
                      preferred_element_type=f32).reshape(B, M, Nt, cout)
        out = out + jnp.dot(mnt.reshape(B * M, cin), w3,
                            preferred_element_type=f32).reshape(B, M, 1, cout)
        out = out + jnp.dot(mm.reshape(B * Nt, cin), w4,
                            preferred_element_type=f32).reshape(B, 1, Nt, cout)

        if li != n_layers - 1:
            out = jnp.maximum(out, 0.0)          # ReLU
            # Training-mode BatchNorm2d: per-channel batch statistics over
            # (B, M, Nt), biased variance, eps=1e-5, gamma=1, beta=0.
            # TODO(synk): running_mean/running_var state is not tracked.
            mu = jnp.mean(out, axis=(0, 1, 2), keepdims=True)
            d = out - mu
            var = jnp.mean(d * d, axis=(0, 1, 2), keepdims=True)
            out = d * lax.rsqrt(var + 1e-5)
        a = out

    # --------------------------------- head ---------------------------------
    c0 = 2 * Ns
    kns = K * Ns

    # z: mean over subcarriers (M) of the first 2*Ns channels, unit-modulus norm.
    zmean = jnp.mean(a[:, :, :, 0:c0], axis=1)           # (B, Nt, 2*Ns)
    zmeanT = jnp.swapaxes(zmean, 1, 2)                   # (B, 2*Ns, Nt): Nt on lanes
    z1 = zmeanT[:, 0:Ns, :]                              # (B, Ns, Nt)
    z2 = zmeanT[:, Ns:c0, :]
    inv_mo = lax.rsqrt(z1 * z1 + z2 * z2)                # no eps (matches torch)
    z1 = z1 * inv_mo
    z2 = z2 * inv_mo

    # y: mean over antennas (Nt) of the remaining 2*K*Ns channels.
    y1 = jnp.mean(a[:, :, :, c0:c0 + kns], axis=2)            # (B, M, K*Ns)
    y2 = jnp.mean(a[:, :, :, c0 + kns:c0 + 2 * kns], axis=2)  # (B, M, K*Ns)

    # Complex matmul WT = y * z with an Ns-sized contraction, unrolled as a VPU
    # outer product (K, Ns are tiny; an MXU contraction of K=2 would be wasted).
    z1_rows = [z1[:, s:s + 1, :] for s in range(Ns)]          # each (B, 1, Nt)
    z2_rows = [z2[:, s:s + 1, :] for s in range(Ns)]
    amps = []
    for k in range(K):
        wr = None
        wi = None
        for s in range(Ns):
            idx = k * Ns + s
            yr = y1[:, :, idx:idx + 1]                        # (B, M, 1)
            yi = y2[:, :, idx:idx + 1]
            tr = yr * z1_rows[s] - yi * z2_rows[s]            # (B, M, Nt)
            ti = yr * z2_rows[s] + yi * z1_rows[s]
            wr = tr if wr is None else wr + tr
            wi = ti if wi is None else wi + ti
        amps.append(wr * wr + wi * wi)                        # ampli2, (B, M, Nt)

    # Power normalization of y: divides rewritten as rsqrt-multiplies; per-k
    # scales are assembled into one full-width (B, M, K*Ns) array so y1/y2 are
    # scaled with single full multiplies.
    sqrtM = math.sqrt(M)
    if equal_subcarrier and equal_user:
        sc = jnp.concatenate(
            [jnp.broadcast_to(
                lax.rsqrt(K * jnp.sum(amps[k], axis=2, keepdims=True)),
                (B, M, Ns)) for k in range(K)], axis=-1)
    elif equal_subcarrier:
        tot = amps[0]
        for k in range(1, K):
            tot = tot + amps[k]
        sc = jnp.broadcast_to(
            lax.rsqrt(jnp.sum(tot, axis=2, keepdims=True)), (B, M, kns))
    elif equal_user:
        sc = jnp.concatenate(
            [jnp.broadcast_to(
                sqrtM * lax.rsqrt(K * jnp.sum(amps[k], axis=(1, 2), keepdims=True)),
                (B, M, Ns)) for k in range(K)], axis=-1)
    else:
        tot = amps[0]
        for k in range(1, K):
            tot = tot + amps[k]
        sc = jnp.broadcast_to(
            sqrtM * lax.rsqrt(jnp.sum(tot, axis=(1, 2), keepdims=True)), (B, M, kns))

    y1 = y1 * sc
    y2 = y2 * sc

    # --------------------- single lane-dense output slab ---------------------
    # rows [0, M)        : [ y1 | y2 | 0-pad ]   (lanes 0 .. 2*K*Ns-1 used)
    # rows [M, M + 2*Ns) : [ z1 ; z2 | 0-pad ]   (lanes 0 .. Nt-1 used)
    y_pieces = [y1, y2]
    if out_lanes > 2 * kns:
        y_pieces.append(jnp.zeros((B, M, out_lanes - 2 * kns), f32))
    y_block = jnp.concatenate(y_pieces, axis=-1)              # (B, M, out_lanes)

    z_block = jnp.concatenate([z1, z2], axis=1)               # (B, 2*Ns, Nt)
    if out_lanes > Nt:
        z_block = jnp.concatenate(
            [z_block, jnp.zeros((B, 2 * Ns, out_lanes - Nt), f32)], axis=-1)

    out_ref[...] = jnp.concatenate([y_block, z_block], axis=1)


# ----------------------------------------------------------------------------
# Full GNN2D forward: plain-JAX layout glue + ONE fused pallas_call.
# ----------------------------------------------------------------------------
def gnn2d_forward(A_in, params, *, M, K, Nt, Ns, equal_user, equal_subcarrier):
    B = A_in.shape[0]
    f32 = jnp.float32

    # Mirror torch: A.transpose(1,2).transpose(2,3).contiguous().view(B, 2K, M, Nt)
    A = jnp.transpose(A_in, (0, 2, 1, 3))
    A = jnp.transpose(A, (0, 1, 3, 2))
    A = A.reshape(B, 2 * K, M, Nt)               # NCHW
    A = jnp.transpose(A, (0, 2, 3, 1))           # channel-last (B, M, Nt, C0)

    # Per-layer weights: P1.T, 0.1*P3.T, 0.1*P4.T (0.1 folded in the wrapper).
    flat_w = []
    for (P1, P3, P4) in params:
        flat_w += [P1.T.astype(f32),
                   (0.1 * P3.T).astype(f32),
                   (0.1 * P4.T).astype(f32)]

    n_layers = len(params)
    c_in0 = A.shape[-1]
    kns = K * Ns
    out_rows = M + 2 * Ns
    out_lanes = 128 * (-(-max(2 * kns, Nt) // 128))   # lane-dense (multiple of 128)

    kernel = functools.partial(
        _gnn2d_fused_kernel, n_layers=n_layers, M=M, Nt=Nt, K=K, Ns=Ns,
        equal_user=equal_user, equal_subcarrier=equal_subcarrier,
        out_lanes=out_lanes)

    in_specs = ([pl.BlockSpec((B, M, Nt, c_in0), lambda i: (0, 0, 0, 0))]
                + [pl.BlockSpec(tuple(w.shape), lambda i: (0, 0)) for w in flat_w])

    # Advisory cost estimate so XLA can schedule surrounding HBM work.
    flops = 0
    for (P1, P3, P4) in params:
        cout, cin = int(P1.shape[0]), int(P1.shape[1])
        flops += 2 * cin * cout * (B * M * Nt + B * M + B * Nt)
    flops += 8 * B * M * Nt * K * Ns
    bytes_accessed = 4 * (int(A.size) + sum(int(w.size) for w in flat_w)
                          + B * out_rows * out_lanes)
    transcendentals = B * (Nt * Ns + M * K)

    slab = pl.pallas_call(
        kernel,
        out_shape=jax.ShapeDtypeStruct((B, out_rows, out_lanes), f32),
        grid=(1,),
        in_specs=in_specs,
        out_specs=pl.BlockSpec((B, out_rows, out_lanes), lambda i: (0, 0, 0)),
        compiler_params=pltpu.CompilerParams(
            dimension_semantics=("arbitrary",)),
        cost_estimate=pl.CostEstimate(flops=flops,
                                      transcendentals=transcendentals,
                                      bytes_accessed=bytes_accessed),
    )(A, *flat_w)

    # Split the lane-dense slab back into the torch output layout.
    y1 = slab[:, 0:M, 0:kns].reshape(B, M, K, Ns)
    y2 = slab[:, 0:M, kns:2 * kns].reshape(B, M, K, Ns)
    z1 = slab[:, M:M + Ns, 0:Nt]                 # (B, Ns, Nt)
    z2 = slab[:, M + Ns:M + 2 * Ns, 0:Nt]
    y = jnp.stack([y1, y2], axis=2)              # (B, M, 2, K, Ns)
    z = jnp.stack([z1, z2], axis=1).reshape(B, 1, 2, Ns, Nt)
    return y, z


# ----------------------------------------------------------------------------
# Pure-JAX (NCHW, torch-like) reference for the correctness check.
# ----------------------------------------------------------------------------
def reference_forward(A_in, params, *, M, K, Nt, Ns, equal_user, equal_subcarrier):
    B = A_in.shape[0]
    hp = lax.Precision.HIGHEST
    A = jnp.transpose(A_in, (0, 2, 1, 3))
    A = jnp.transpose(A, (0, 1, 3, 2))
    A = A.reshape(B, 2 * K, M, Nt)
    n = len(params)
    for i, (P1, P3, P4) in enumerate(params):
        Cout, Cin = P1.shape
        A1 = jnp.einsum('oc,bcx->box', P1, A.reshape(B, Cin, M * Nt),
                        precision=hp).reshape(B, Cout, M, Nt)
        A3 = jnp.einsum('oc,bcm->bom', P3, jnp.mean(A, axis=-1), precision=hp)[..., None]
        A4 = jnp.einsum('oc,bcn->bon', P4, jnp.mean(A, axis=-2), precision=hp)[:, :, None, :]
        A = A1 + 0.1 * A3 + 0.1 * A4
        if i != n - 1:
            A = jnp.maximum(A, 0.0)
            mu = jnp.mean(A, axis=(0, 2, 3), keepdims=True)
            var = jnp.mean((A - mu) ** 2, axis=(0, 2, 3), keepdims=True)
            A = (A - mu) / jnp.sqrt(var + 1e-5)
    z1 = jnp.mean(A[:, 0:Ns], axis=2)
    z2 = jnp.mean(A[:, Ns:2 * Ns], axis=2)
    y1 = jnp.transpose(jnp.mean(A[:, 2 * Ns:2 * Ns + K * Ns], axis=3),
                       (0, 2, 1)).reshape(B, M, K, Ns)
    y2 = jnp.transpose(jnp.mean(A[:, 2 * Ns + K * Ns:2 * Ns + 2 * K * Ns], axis=3),
                       (0, 2, 1)).reshape(B, M, K, Ns)
    mo = jnp.sqrt(z1 ** 2 + z2 ** 2)
    z1 = z1 / mo
    z2 = z2 / mo
    y = jnp.stack([y1, y2], axis=2)
    z = jnp.stack([z1, z2], axis=1).reshape(B, 1, 2, Ns, Nt)
    Ar, Ai = y[:, :, 0], y[:, :, 1]
    Br, Bi = z[:, 0, 0], z[:, 0, 1]
    WTr = (jnp.einsum('bmks,bsn->bmkn', Ar, Br, precision=hp)
           - jnp.einsum('bmks,bsn->bmkn', Ai, Bi, precision=hp))
    WTi = (jnp.einsum('bmks,bsn->bmkn', Ar, Bi, precision=hp)
           + jnp.einsum('bmks,bsn->bmkn', Ai, Br, precision=hp))
    amp = WTr ** 2 + WTi ** 2
    if equal_subcarrier:
        if equal_user:
            temp = math.sqrt(M * K) * jnp.sqrt(jnp.sum(amp, axis=3)).reshape(B, M, 1, K, 1)
        else:
            temp = math.sqrt(M) * jnp.sqrt(jnp.sum(amp, axis=(2, 3))).reshape(B, M, 1, 1, 1)
    elif equal_user:
        temp = math.sqrt(K) * jnp.sqrt(jnp.sum(amp, axis=(1, 3))).reshape(B, 1, 1, K, 1)
    else:
        temp = jnp.sqrt(jnp.sum(amp, axis=(1, 2, 3))).reshape(B, 1, 1, 1, 1)
    y = math.sqrt(M) * y / temp
    return y, z


if __name__ == "__main__":
    # Small shapes consistent with the module.
    B, K, Ns, M, Nt = 2, 2, 2, 8, 16
    hidden = (16, 32)
    input_dim = 2 * K
    output_dim = 2 * Ns + 2 * K * Ns             # channel budget required by the head
    dims = [input_dim] + list(hidden) + [output_dim]

    key = jax.random.PRNGKey(0)
    params = []
    for i in range(len(dims) - 1):
        din, dout = dims[i], dims[i + 1]
        ini = math.sqrt(3.0 / dout / din)
        key, k1, k3, k4 = jax.random.split(key, 4)
        P1 = jax.random.uniform(k1, (dout, din), jnp.float32, -ini, ini)
        P3 = jax.random.uniform(k3, (dout, din), jnp.float32, -ini, ini)
        P4 = jax.random.uniform(k4, (dout, din), jnp.float32, -ini, ini)
        params.append((P1, P3, P4))

    key, ka = jax.random.split(key)
    A_in = jax.random.normal(ka, (B, 2 * K, M, Nt), jnp.float32)

    equal_user = True
    equal_subcarrier = True

    fwd = jax.jit(functools.partial(
        gnn2d_forward, M=M, K=K, Nt=Nt, Ns=Ns,
        equal_user=equal_user, equal_subcarrier=equal_subcarrier))

    y, z = fwd(A_in, params)
    y = jax.block_until_ready(y)
    z = jax.block_until_ready(z)

    assert y.shape == (B, M, 2, K, Ns)
    assert z.shape == (B, 1, 2, Ns, Nt)

    y_ref, z_ref = reference_forward(A_in, params, M=M, K=K, Nt=Nt, Ns=Ns,
                                     equal_user=equal_user,
                                     equal_subcarrier=equal_subcarrier)
    err_y = float(jnp.max(jnp.abs(y - y_ref)) / (jnp.max(jnp.abs(y_ref)) + 1e-6))
    err_z = float(jnp.max(jnp.abs(z - z_ref)) / (jnp.max(jnp.abs(z_ref)) + 1e-6))
    assert err_y < 2e-2 and err_z < 2e-2, (err_y, err_z)

    print("KERNEL_OK")
</pallas_src>

<mosaic_0001>
module attributes {stable_mosaic.version = 11 : i64} {
  func.func @_gnn2d_fused_kernel(%arg0: i32, %arg1: memref<2x8x16x4xf32, #tpu.memory_space<vmem>>, %arg2: memref<4x16xf32, #tpu.memory_space<vmem>>, %arg3: memref<4x16xf32, #tpu.memory_space<vmem>>, %arg4: memref<4x16xf32, #tpu.memory_space<vmem>>, %arg5: memref<16x32xf32, #tpu.memory_space<vmem>>, %arg6: memref<16x32xf32, #tpu.memory_space<vmem>>, %arg7: memref<16x32xf32, #tpu.memory_space<vmem>>, %arg8: memref<32x12xf32, #tpu.memory_space<vmem>>, %arg9: memref<32x12xf32, #tpu.memory_space<vmem>>, %arg10: memref<32x12xf32, #tpu.memory_space<vmem>>, %arg11: memref<2x12x128xf32, #tpu.memory_space<vmem>>) attributes {dimension_semantics = [#tpu.dimension_semantics<arbitrary>], iteration_bounds = array<i64: 1>, scalar_prefetch = 0 : i64, scratch_operands = 0 : i64, tpu.core_type = #tpu.core_type<tc>, window_params = [{pipeline_mode = #tpu.pipeline_mode<synchronous>, transform_indices = @transform_0, window_bounds = array<i64: 2, 8, 16, 4>}, {pipeline_mode = #tpu.pipeline_mode<synchronous>, transform_indices = @transform_1, window_bounds = array<i64: 4, 16>}, {pipeline_mode = #tpu.pipeline_mode<synchronous>, transform_indices = @transform_2, window_bounds = array<i64: 4, 16>}, {pipeline_mode = #tpu.pipeline_mode<synchronous>, transform_indices = @transform_3, window_bounds = array<i64: 4, 16>}, {pipeline_mode = #tpu.pipeline_mode<synchronous>, transform_indices = @transform_4, window_bounds = array<i64: 16, 32>}, {pipeline_mode = #tpu.pipeline_mode<synchronous>, transform_indices = @transform_5, window_bounds = array<i64: 16, 32>}, {pipeline_mode = #tpu.pipeline_mode<synchronous>, transform_indices = @transform_6, window_bounds = array<i64: 16, 32>}, {pipeline_mode = #tpu.pipeline_mode<synchronous>, transform_indices = @transform_7, window_bounds = array<i64: 32, 12>}, {pipeline_mode = #tpu.pipeline_mode<synchronous>, transform_indices = @transform_8, window_bounds = array<i64: 32, 12>}, {pipeline_mode = #tpu.pipeline_mode<synchronous>, transform_indices = @transform_9, window_bounds = array<i64: 32, 12>}, {pipeline_mode = #tpu.pipeline_mode<synchronous>, transform_indices = @transform_10, window_bounds = array<i64: 2, 12, 128>}]} {
    %c0 = arith.constant 0 : index
    %c0_0 = arith.constant 0 : index
    %c0_1 = arith.constant 0 : index
    %c0_2 = arith.constant 0 : index
    %0 = vector.load %arg1[%c0, %c0_0, %c0_1, %c0_2] : memref<2x8x16x4xf32, #tpu.memory_space<vmem>>, vector<2x8x16x4xf32>
    %c0_3 = arith.constant 0 : index
    %c0_4 = arith.constant 0 : index
    %1 = vector.load %arg2[%c0_3, %c0_4] : memref<4x16xf32, #tpu.memory_space<vmem>>, vector<4x16xf32>
    %c0_5 = arith.constant 0 : index
    %c0_6 = arith.constant 0 : index
    %2 = vector.load %arg3[%c0_5, %c0_6] : memref<4x16xf32, #tpu.memory_space<vmem>>, vector<4x16xf32>
    %c0_7 = arith.constant 0 : index
    %c0_8 = arith.constant 0 : index
    %3 = vector.load %arg4[%c0_7, %c0_8] : memref<4x16xf32, #tpu.memory_space<vmem>>, vector<4x16xf32>
    %cst = arith.constant dense<0.000000e+00> : vector<2x8x4xf32>
    %4 = vector.multi_reduction <add>, %0, %cst [2] : vector<2x8x16x4xf32> to vector<2x8x4xf32>
    %cst_9 = arith.constant 1.600000e+01 : f32
    %5 = vector.broadcast %cst_9 : f32 to vector<2x8x4xf32>
    %6 = arith.divf %4, %5 : vector<2x8x4xf32>
    %cst_10 = arith.constant dense<0.000000e+00> : vector<2x16x4xf32>
    %7 = vector.multi_reduction <add>, %0, %cst_10 [1] : vector<2x8x16x4xf32> to vector<2x16x4xf32>
    %cst_11 = arith.constant 8.000000e+00 : f32
    %8 = vector.broadcast %cst_11 : f32 to vector<2x16x4xf32>
    %9 = arith.divf %7, %8 : vector<2x16x4xf32>
    %10 = vector.shape_cast %0 : vector<2x8x16x4xf32> to vector<256x4xf32>
    %cst_12 = arith.constant dense<0.000000e+00> : vector<256x16xf32>
    %11 = tpu.matmul %10, %1, %cst_12 {dimension_numbers = #tpu.dot_dimension_numbers<[1], [0], [0], [1], [0, 0, 1, 1], [], []>} : vector<256x4xf32>, vector<4x16xf32>, vector<256x16xf32> -> vector<256x16xf32>
    %12 = vector.shape_cast %11 : vector<256x16xf32> to vector<2x8x16x16xf32>
    %13 = vector.shape_cast %6 : vector<2x8x4xf32> to vector<16x4xf32>
    %cst_13 = arith.constant dense<0.000000e+00> : vector<16x16xf32>
    %14 = tpu.matmul %13, %2, %cst_13 {dimension_numbers = #tpu.dot_dimension_numbers<[1], [0], [0], [1], [0, 0, 1, 1], [], []>} : vector<16x4xf32>, vector<4x16xf32>, vector<16x16xf32> -> vector<16x16xf32>
    %15 = vector.shape_cast %14 : vector<16x16xf32> to vector<2x8x1x16xf32>
    %16 = vector.broadcast %15 : vector<2x8x1x16xf32> to vector<2x8x16x16xf32>
    %17 = arith.addf %12, %16 : vector<2x8x16x16xf32>
    %18 = vector.shape_cast %9 : vector<2x16x4xf32> to vector<32x4xf32>
    %cst_14 = arith.constant dense<0.000000e+00> : vector<32x16xf32>
    %19 = tpu.matmul %18, %3, %cst_14 {dimension_numbers = #tpu.dot_dimension_numbers<[1], [0], [0], [1], [0, 0, 1, 1], [], []>} : vector<32x4xf32>, vector<4x16xf32>, vector<32x16xf32> -> vector<32x16xf32>
    %20 = vector.shape_cast %19 : vector<32x16xf32> to vector<2x1x16x16xf32>
    %21 = vector.broadcast %20 : vector<2x1x16x16xf32> to vector<2x8x16x16xf32>
    %22 = arith.addf %17, %21 : vector<2x8x16x16xf32>
    %cst_15 = arith.constant 0.000000e+00 : f32
    %23 = vector.broadcast %cst_15 : f32 to vector<2x8x16x16xf32>
    %24 = arith.maximumf %22, %23 : vector<2x8x16x16xf32>
    %cst_16 = arith.constant dense<0.000000e+00> : vector<16xf32>
    %25 = vector.multi_reduction <add>, %24, %cst_16 [0, 1, 2] : vector<2x8x16x16xf32> to vector<16xf32>
    %26 = vector.shape_cast %25 : vector<16xf32> to vector<1x1x1x16xf32>
    %cst_17 = arith.constant 2.560000e+02 : f32
    %27 = vector.broadcast %cst_17 : f32 to vector<1x1x1x16xf32>
    %28 = arith.divf %26, %27 : vector<1x1x1x16xf32>
    %29 = vector.broadcast %28 : vector<1x1x1x16xf32> to vector<2x8x16x16xf32>
    %30 = arith.subf %24, %29 : vector<2x8x16x16xf32>
    %31 = arith.mulf %30, %30 : vector<2x8x16x16xf32>
    %cst_18 = arith.constant dense<0.000000e+00> : vector<16xf32>
    %32 = vector.multi_reduction <add>, %31, %cst_18 [0, 1, 2] : vector<2x8x16x16xf32> to vector<16xf32>
    %33 = vector.shape_cast %32 : vector<16xf32> to vector<1x1x1x16xf32>
    %cst_19 = arith.constant 2.560000e+02 : f32
    %34 = vector.broadcast %cst_19 : f32 to vector<1x1x1x16xf32>
    %35 = arith.divf %33, %34 : vector<1x1x1x16xf32>
    %cst_20 = arith.constant 9.99999974E-6 : f32
    %36 = vector.broadcast %cst_20 : f32 to vector<1x1x1x16xf32>
    %37 = arith.addf %35, %36 : vector<1x1x1x16xf32>
    %38 = math.rsqrt %37 : vector<1x1x1x16xf32>
    %39 = vector.broadcast %38 : vector<1x1x1x16xf32> to vector<2x8x16x16xf32>
    %40 = arith.mulf %30, %39 : vector<2x8x16x16xf32>
    %c0_21 = arith.constant 0 : index
    %c0_22 = arith.constant 0 : index
    %41 = vector.load %arg5[%c0_21, %c0_22] : memref<16x32xf32, #tpu.memory_space<vmem>>, vector<16x32xf32>
    %c0_23 = arith.constant 0 : index
    %c0_24 = arith.constant 0 : index
    %42 = vector.load %arg6[%c0_23, %c0_24] : memref<16x32xf32, #tpu.memory_space<vmem>>, vector<16x32xf32>
    %c0_25 = arith.constant 0 : index
    %c0_26 = arith.constant 0 : index
    %43 = vector.load %arg7[%c0_25, %c0_26] : memref<16x32xf32, #tpu.memory_space<vmem>>, vector<16x32xf32>
    %cst_27 = arith.constant dense<0.000000e+00> : vector<2x8x16xf32>
    %44 = vector.multi_reduction <add>, %40, %cst_27 [2] : vector<2x8x16x16xf32> to vector<2x8x16xf32>
    %cst_28 = arith.constant 1.600000e+01 : f32
    %45 = vector.broadcast %cst_28 : f32 to vector<2x8x16xf32>
    %46 = arith.divf %44, %45 : vector<2x8x16xf32>
    %cst_29 = arith.constant dense<0.000000e+00> : vector<2x16x16xf32>
    %47 = vector.multi_reduction <add>, %40, %cst_29 [1] : vector<2x8x16x16xf32> to vector<2x16x16xf32>
    %cst_30 = arith.constant 8.000000e+00 : f32
    %48 = vector.broadcast %cst_30 : f32 to vector<2x16x16xf32>
    %49 = arith.divf %47, %48 : vector<2x16x16xf32>
    %50 = vector.shape_cast %40 : vector<2x8x16x16xf32> to vector<256x16xf32>
    %cst_31 = arith.constant dense<0.000000e+00> : vector<256x32xf32>
    %51 = tpu.matmul %50, %41, %cst_31 {dimension_numbers = #tpu.dot_dimension_numbers<[1], [0], [0], [1], [0, 0, 1, 1], [], []>} : vector<256x16xf32>, vector<16x32xf32>, vector<256x32xf32> -> vector<256x32xf32>
    %52 = vector.shape_cast %51 : vector<256x32xf32> to vector<2x8x16x32xf32>
    %53 = vector.shape_cast %46 : vector<2x8x16xf32> to vector<16x16xf32>
    %cst_32 = arith.constant dense<0.000000e+00> : vector<16x32xf32>
    %54 = tpu.matmul %53, %42, %cst_32 {dimension_numbers = #tpu.dot_dimension_numbers<[1], [0], [0], [1], [0, 0, 1, 1], [], []>} : vector<16x16xf32>, vector<16x32xf32>, vector<16x32xf32> -> vector<16x32xf32>
    %55 = vector.shape_cast %54 : vector<16x32xf32> to vector<2x8x1x32xf32>
    %56 = vector.broadcast %55 : vector<2x8x1x32xf32> to vector<2x8x16x32xf32>
    %57 = arith.addf %52, %56 : vector<2x8x16x32xf32>
    %58 = vector.shape_cast %49 : vector<2x16x16xf32> to vector<32x16xf32>
    %cst_33 = arith.constant dense<0.000000e+00> : vector<32x32xf32>
    %59 = tpu.matmul %58, %43, %cst_33 {dimension_numbers = #tpu.dot_dimension_numbers<[1], [0], [0], [1], [0, 0, 1, 1], [], []>} : vector<32x16xf32>, vector<16x32xf32>, vector<32x32xf32> -> vector<32x32xf32>
    %60 = vector.shape_cast %59 : vector<32x32xf32> to vector<2x1x16x32xf32>
    %61 = vector.broadcast %60 : vector<2x1x16x32xf32> to vector<2x8x16x32xf32>
    %62 = arith.addf %57, %61 : vector<2x8x16x32xf32>
    %cst_34 = arith.constant 0.000000e+00 : f32
    %63 = vector.broadcast %cst_34 : f32 to vector<2x8x16x32xf32>
    %64 = arith.maximumf %62, %63 : vector<2x8x16x32xf32>
    %cst_35 = arith.constant dense<0.000000e+00> : vector<32xf32>
    %65 = vector.multi_reduction <add>, %64, %cst_35 [0, 1, 2] : vector<2x8x16x32xf32> to vector<32xf32>
    %66 = vector.shape_cast %65 : vector<32xf32> to vector<1x1x1x32xf32>
    %cst_36 = arith.constant 2.560000e+02 : f32
    %67 = vector.broadcast %cst_36 : f32 to vector<1x1x1x32xf32>
    %68 = arith.divf %66, %67 : vector<1x1x1x32xf32>
    %69 = vector.broadcast %68 : vector<1x1x1x32xf32> to vector<2x8x16x32xf32>
    %70 = arith.subf %64, %69 : vector<2x8x16x32xf32>
    %71 = arith.mulf %70, %70 : vector<2x8x16x32xf32>
    %cst_37 = arith.constant dense<0.000000e+00> : vector<32xf32>
    %72 = vector.multi_reduction <add>, %71, %cst_37 [0, 1, 2] : vector<2x8x16x32xf32> to vector<32xf32>
    %73 = vector.shape_cast %72 : vector<32xf32> to vector<1x1x1x32xf32>
    %cst_38 = arith.constant 2.560000e+02 : f32
    %74 = vector.broadcast %cst_38 : f32 to vector<1x1x1x32xf32>
    %75 = arith.divf %73, %74 : vector<1x1x1x32xf32>
    %cst_39 = arith.constant 9.99999974E-6 : f32
    %76 = vector.broadcast %cst_39 : f32 to vector<1x1x1x32xf32>
    %77 = arith.addf %75, %76 : vector<1x1x1x32xf32>
    %78 = math.rsqrt %77 : vector<1x1x1x32xf32>
    %79 = vector.broadcast %78 : vector<1x1x1x32xf32> to vector<2x8x16x32xf32>
    %80 = arith.mulf %70, %79 : vector<2x8x16x32xf32>
    %c0_40 = arith.constant 0 : index
    %c0_41 = arith.constant 0 : index
    %81 = vector.load %arg8[%c0_40, %c0_41] : memref<32x12xf32, #tpu.memory_space<vmem>>, vector<32x12xf32>
    %c0_42 = arith.constant 0 : index
    %c0_43 = arith.constant 0 : index
    %82 = vector.load %arg9[%c0_42, %c0_43] : memref<32x12xf32, #tpu.memory_space<vmem>>, vector<32x12xf32>
    %c0_44 = arith.constant 0 : index
    %c0_45 = arith.constant 0 : index
    %83 = vector.load %arg10[%c0_44, %c0_45] : memref<32x12xf32, #tpu.memory_space<vmem>>, vector<32x12xf32>
    %cst_46 = arith.constant dense<0.000000e+00> : vector<2x8x32xf32>
    %84 = vector.multi_reduction <add>, %80, %cst_46 [2] : vector<2x8x16x32xf32> to vector<2x8x32xf32>
    %cst_47 = arith.constant 1.600000e+01 : f32
    %85 = vector.broadcast %cst_47 : f32 to vector<2x8x32xf32>
    %86 = arith.divf %84, %85 : vector<2x8x32xf32>
    %cst_48 = arith.constant dense<0.000000e+00> : vector<2x16x32xf32>
    %87 = vector.multi_reduction <add>, %80, %cst_48 [1] : vector<2x8x16x32xf32> to vector<2x16x32xf32>
    %cst_49 = arith.constant 8.000000e+00 : f32
    %88 = vector.broadcast %cst_49 : f32 to vector<2x16x32xf32>
    %89 = arith.divf %87, %88 : vector<2x16x32xf32>
    %90 = vector.shape_cast %80 : vector<2x8x16x32xf32> to vector<256x32xf32>
    %cst_50 = arith.constant dense<0.000000e+00> : vector<256x12xf32>
    %91 = tpu.matmul %90, %81, %cst_50 {dimension_numbers = #tpu.dot_dimension_numbers<[1], [0], [0], [1], [0, 0, 1, 1], [], []>} : vector<256x32xf32>, vector<32x12xf32>, vector<256x12xf32> -> vector<256x12xf32>
    %92 = vector.shape_cast %91 : vector<256x12xf32> to vector<2x8x16x12xf32>
    %93 = vector.shape_cast %86 : vector<2x8x32xf32> to vector<16x32xf32>
    %cst_51 = arith.constant dense<0.000000e+00> : vector<16x12xf32>
    %94 = tpu.matmul %93, %82, %cst_51 {dimension_numbers = #tpu.dot_dimension_numbers<[1], [0], [0], [1], [0, 0, 1, 1], [], []>} : vector<16x32xf32>, vector<32x12xf32>, vector<16x12xf32> -> vector<16x12xf32>
    %95 = vector.shape_cast %94 : vector<16x12xf32> to vector<2x8x1x12xf32>
    %96 = vector.broadcast %95 : vector<2x8x1x12xf32> to vector<2x8x16x12xf32>
    %97 = arith.addf %92, %96 : vector<2x8x16x12xf32>
    %98 = vector.shape_cast %89 : vector<2x16x32xf32> to vector<32x32xf32>
    %cst_52 = arith.constant dense<0.000000e+00> : vector<32x12xf32>
    %99 = tpu.matmul %98, %83, %cst_52 {dimension_numbers = #tpu.dot_dimension_numbers<[1], [0], [0], [1], [0, 0, 1, 1], [], []>} : vector<32x32xf32>, vector<32x12xf32>, vector<32x12xf32> -> vector<32x12xf32>
    %100 = vector.shape_cast %99 : vector<32x12xf32> to vector<2x1x16x12xf32>
    %101 = vector.broadcast %100 : vector<2x1x16x12xf32> to vector<2x8x16x12xf32>
    %102 = arith.addf %97, %101 : vector<2x8x16x12xf32>
    %103 = vector.extract_strided_slice %102 {offsets = [0, 0, 0, 0], sizes = [2, 8, 16, 4], strides = [1, 1, 1, 1]} : vector<2x8x16x12xf32> to vector<2x8x16x4xf32>
    %cst_53 = arith.constant dense<0.000000e+00> : vector<2x16x4xf32>
    %104 = vector.multi_reduction <add>, %103, %cst_53 [1] : vector<2x8x16x4xf32> to vector<2x16x4xf32>
    %cst_54 = arith.constant 8.000000e+00 : f32
    %105 = vector.broadcast %cst_54 : f32 to vector<2x16x4xf32>
    %106 = arith.divf %104, %105 : vector<2x16x4xf32>
    %107 = tpu.transpose %106, [0, 2, 1] : vector<2x16x4xf32> -> vector<2x4x16xf32>
    %108 = vector.extract_strided_slice %107 {offsets = [0, 0, 0], sizes = [2, 2, 16], strides = [1, 1, 1]} : vector<2x4x16xf32> to vector<2x2x16xf32>
    %109 = vector.extract_strided_slice %107 {offsets = [0, 2, 0], sizes = [2, 2, 16], strides = [1, 1, 1]} : vector<2x4x16xf32> to vector<2x2x16xf32>
    %110 = arith.mulf %108, %108 : vector<2x2x16xf32>
    %111 = arith.mulf %109, %109 : vector<2x2x16xf32>
    %112 = arith.addf %110, %111 : vector<2x2x16xf32>
    %113 = math.rsqrt %112 : vector<2x2x16xf32>
    %114 = arith.mulf %108, %113 : vector<2x2x16xf32>
    %115 = arith.mulf %109, %113 : vector<2x2x16xf32>
    %116 = vector.extract_strided_slice %102 {offsets = [0, 0, 0, 4], sizes = [2, 8, 16, 4], strides = [1, 1, 1, 1]} : vector<2x8x16x12xf32> to vector<2x8x16x4xf32>
    %cst_55 = arith.constant dense<0.000000e+00> : vector<2x8x4xf32>
    %117 = vector.multi_reduction <add>, %116, %cst_55 [2] : vector<2x8x16x4xf32> to vector<2x8x4xf32>
    %cst_56 = arith.constant 1.600000e+01 : f32
    %118 = vector.broadcast %cst_56 : f32 to vector<2x8x4xf32>
    %119 = arith.divf %117, %118 : vector<2x8x4xf32>
    %120 = vector.extract_strided_slice %102 {offsets = [0, 0, 0, 8], sizes = [2, 8, 16, 4], strides = [1, 1, 1, 1]} : vector<2x8x16x12xf32> to vector<2x8x16x4xf32>
    %cst_57 = arith.constant dense<0.000000e+00> : vector<2x8x4xf32>
    %121 = vector.multi_reduction <add>, %120, %cst_57 [2] : vector<2x8x16x4xf32> to vector<2x8x4xf32>
    %cst_58 = arith.constant 1.600000e+01 : f32
    %122 = vector.broadcast %cst_58 : f32 to vector<2x8x4xf32>
    %123 = arith.divf %121, %122 : vector<2x8x4xf32>
    %124 = vector.extract_strided_slice %114 {offsets = [0, 0, 0], sizes = [2, 1, 16], strides = [1, 1, 1]} : vector<2x2x16xf32> to vector<2x1x16xf32>
    %125 = vector.extract_strided_slice %114 {offsets = [0, 1, 0], sizes = [2, 1, 16], strides = [1, 1, 1]} : vector<2x2x16xf32> to vector<2x1x16xf32>
    %126 = vector.extract_strided_slice %115 {offsets = [0, 0, 0], sizes = [2, 1, 16], strides = [1, 1, 1]} : vector<2x2x16xf32> to vector<2x1x16xf32>
    %127 = vector.extract_strided_slice %115 {offsets = [0, 1, 0], sizes = [2, 1, 16], strides = [1, 1, 1]} : vector<2x2x16xf32> to vector<2x1x16xf32>
    %128 = vector.extract_strided_slice %119 {offsets = [0, 0, 0], sizes = [2, 8, 1], strides = [1, 1, 1]} : vector<2x8x4xf32> to vector<2x8x1xf32>
    %129 = vector.extract_strided_slice %123 {offsets = [0, 0, 0], sizes = [2, 8, 1], strides = [1, 1, 1]} : vector<2x8x4xf32> to vector<2x8x1xf32>
    %130 = vector.broadcast %128 : vector<2x8x1xf32> to vector<2x8x16xf32>
    %131 = vector.broadcast %124 : vector<2x1x16xf32> to vector<2x8x16xf32>
    %132 = arith.mulf %130, %131 : vector<2x8x16xf32>
    %133 = vector.broadcast %129 : vector<2x8x1xf32> to vector<2x8x16xf32>
    %134 = vector.broadcast %126 : vector<2x1x16xf32> to vector<2x8x16xf32>
    %135 = arith.mulf %133, %134 : vector<2x8x16xf32>
    %136 = arith.subf %132, %135 : vector<2x8x16xf32>
    %137 = vector.broadcast %128 : vector<2x8x1xf32> to vector<2x8x16xf32>
    %138 = vector.broadcast %126 : vector<2x1x16xf32> to vector<2x8x16xf32>
    %139 = arith.mulf %137, %138 : vector<2x8x16xf32>
    %140 = vector.broadcast %129 : vector<2x8x1xf32> to vector<2x8x16xf32>
    %141 = vector.broadcast %124 : vector<2x1x16xf32> to vector<2x8x16xf32>
    %142 = arith.mulf %140, %141 : vector<2x8x16xf32>
    %143 = arith.addf %139, %142 : vector<2x8x16xf32>
    %144 = vector.extract_strided_slice %119 {offsets = [0, 0, 1], sizes = [2, 8, 1], strides = [1, 1, 1]} : vector<2x8x4xf32> to vector<2x8x1xf32>
    %145 = vector.extract_strided_slice %123 {offsets = [0, 0, 1], sizes = [2, 8, 1], strides = [1, 1, 1]} : vector<2x8x4xf32> to vector<2x8x1xf32>
    %146 = vector.broadcast %144 : vector<2x8x1xf32> to vector<2x8x16xf32>
    %147 = vector.broadcast %125 : vector<2x1x16xf32> to vector<2x8x16xf32>
    %148 = arith.mulf %146, %147 : vector<2x8x16xf32>
    %149 = vector.broadcast %145 : vector<2x8x1xf32> to vector<2x8x16xf32>
    %150 = vector.broadcast %127 : vector<2x1x16xf32> to vector<2x8x16xf32>
    %151 = arith.mulf %149, %150 : vector<2x8x16xf32>
    %152 = arith.subf %148, %151 : vector<2x8x16xf32>
    %153 = vector.broadcast %144 : vector<2x8x1xf32> to vector<2x8x16xf32>
    %154 = vector.broadcast %127 : vector<2x1x16xf32> to vector<2x8x16xf32>
    %155 = arith.mulf %153, %154 : vector<2x8x16xf32>
    %156 = vector.broadcast %145 : vector<2x8x1xf32> to vector<2x8x16xf32>
    %157 = vector.broadcast %125 : vector<2x1x16xf32> to vector<2x8x16xf32>
    %158 = arith.mulf %156, %157 : vector<2x8x16xf32>
    %159 = arith.addf %155, %158 : vector<2x8x16xf32>
    %160 = arith.addf %136, %152 : vector<2x8x16xf32>
    %161 = arith.addf %143, %159 : vector<2x8x16xf32>
    %162 = arith.mulf %160, %160 : vector<2x8x16xf32>
    %163 = arith.mulf %161, %161 : vector<2x8x16xf32>
    %164 = arith.addf %162, %163 : vector<2x8x16xf32>
    %165 = vector.extract_strided_slice %119 {offsets = [0, 0, 2], sizes = [2, 8, 1], strides = [1, 1, 1]} : vector<2x8x4xf32> to vector<2x8x1xf32>
    %166 = vector.extract_strided_slice %123 {offsets = [0, 0, 2], sizes = [2, 8, 1], strides = [1, 1, 1]} : vector<2x8x4xf32> to vector<2x8x1xf32>
    %167 = vector.broadcast %165 : vector<2x8x1xf32> to vector<2x8x16xf32>
    %168 = vector.broadcast %124 : vector<2x1x16xf32> to vector<2x8x16xf32>
    %169 = arith.mulf %167, %168 : vector<2x8x16xf32>
    %170 = vector.broadcast %166 : vector<2x8x1xf32> to vector<2x8x16xf32>
    %171 = vector.broadcast %126 : vector<2x1x16xf32> to vector<2x8x16xf32>
    %172 = arith.mulf %170, %171 : vector<2x8x16xf32>
    %173 = arith.subf %169, %172 : vector<2x8x16xf32>
    %174 = vector.broadcast %165 : vector<2x8x1xf32> to vector<2x8x16xf32>
    %175 = vector.broadcast %126 : vector<2x1x16xf32> to vector<2x8x16xf32>
    %176 = arith.mulf %174, %175 : vector<2x8x16xf32>
    %177 = vector.broadcast %166 : vector<2x8x1xf32> to vector<2x8x16xf32>
    %178 = vector.broadcast %124 : vector<2x1x16xf32> to vector<2x8x16xf32>
    %179 = arith.mulf %177, %178 : vector<2x8x16xf32>
    %180 = arith.addf %176, %179 : vector<2x8x16xf32>
    %181 = vector.extract_strided_slice %119 {offsets = [0, 0, 3], sizes = [2, 8, 1], strides = [1, 1, 1]} : vector<2x8x4xf32> to vector<2x8x1xf32>
    %182 = vector.extract_strided_slice %123 {offsets = [0, 0, 3], sizes = [2, 8, 1], strides = [1, 1, 1]} : vector<2x8x4xf32> to vector<2x8x1xf32>
    %183 = vector.broadcast %181 : vector<2x8x1xf32> to vector<2x8x16xf32>
    %184 = vector.broadcast %125 : vector<2x1x16xf32> to vector<2x8x16xf32>
    %185 = arith.mulf %183, %184 : vector<2x8x16xf32>
    %186 = vector.broadcast %182 : vector<2x8x1xf32> to vector<2x8x16xf32>
    %187 = vector.broadcast %127 : vector<2x1x16xf32> to vector<2x8x16xf32>
    %188 = arith.mulf %186, %187 : vector<2x8x16xf32>
    %189 = arith.subf %185, %188 : vector<2x8x16xf32>
    %190 = vector.broadcast %181 : vector<2x8x1xf32> to vector<2x8x16xf32>
    %191 = vector.broadcast %127 : vector<2x1x16xf32> to vector<2x8x16xf32>
    %192 = arith.mulf %190, %191 : vector<2x8x16xf32>
    %193 = vector.broadcast %182 : vector<2x8x1xf32> to vector<2x8x16xf32>
    %194 = vector.broadcast %125 : vector<2x1x16xf32> to vector<2x8x16xf32>
    %195 = arith.mulf %193, %194 : vector<2x8x16xf32>
    %196 = arith.addf %192, %195 : vector<2x8x16xf32>
    %197 = arith.addf %173, %189 : vector<2x8x16xf32>
    %198 = arith.addf %180, %196 : vector<2x8x16xf32>
    %199 = arith.mulf %197, %197 : vector<2x8x16xf32>
    %200 = arith.mulf %198, %198 : vector<2x8x16xf32>
    %201 = arith.addf %199, %200 : vector<2x8x16xf32>
    %cst_59 = arith.constant dense<0.000000e+00> : vector<2x8xf32>
    %202 = vector.multi_reduction <add>, %164, %cst_59 [2] : vector<2x8x16xf32> to vector<2x8xf32>
    %203 = vector.shape_cast %202 : vector<2x8xf32> to vector<2x8x1xf32>
    %cst_60 = arith.constant 2.000000e+00 : f32
    %204 = vector.broadcast %cst_60 : f32 to vector<2x8x1xf32>
    %205 = arith.mulf %204, %203 : vector<2x8x1xf32>
    %206 = math.rsqrt %205 : vector<2x8x1xf32>
    %207 = vector.shape_cast %206 : vector<2x8x1xf32> to vector<2x8x1xf32>
    %208 = vector.broadcast %207 : vector<2x8x1xf32> to vector<2x8x2xf32>
    %cst_61 = arith.constant dense<0.000000e+00> : vector<2x8xf32>
    %209 = vector.multi_reduction <add>, %201, %cst_61 [2] : vector<2x8x16xf32> to vector<2x8xf32>
    %210 = vector.shape_cast %209 : vector<2x8xf32> to vector<2x8x1xf32>
    %cst_62 = arith.constant 2.000000e+00 : f32
    %211 = vector.broadcast %cst_62 : f32 to vector<2x8x1xf32>
    %212 = arith.mulf %211, %210 : vector<2x8x1xf32>
    %213 = math.rsqrt %212 : vector<2x8x1xf32>
    %214 = vector.shape_cast %213 : vector<2x8x1xf32> to vector<2x8x1xf32>
    %215 = vector.broadcast %214 : vector<2x8x1xf32> to vector<2x8x2xf32>
    %216 = tpu.concatenate %208, %215 in 2 : vector<2x8x2xf32>, vector<2x8x2xf32> -> vector<2x8x4xf32>
    %217 = arith.mulf %119, %216 : vector<2x8x4xf32>
    %218 = arith.mulf %123, %216 : vector<2x8x4xf32>
    %cst_63 = arith.constant 0.000000e+00 : f32
    %219 = vector.broadcast %cst_63 : f32 to vector<2x8x120xf32>
    %220 = tpu.concatenate %217, %218, %219 in 2 : vector<2x8x4xf32>, vector<2x8x4xf32>, vector<2x8x120xf32> -> vector<2x8x128xf32>
    %221 = tpu.concatenate %114, %115 in 1 : vector<2x2x16xf32>, vector<2x2x16xf32> -> vector<2x4x16xf32>
    %cst_64 = arith.constant 0.000000e+00 : f32
    %222 = vector.broadcast %cst_64 : f32 to vector<2x4x112xf32>
    %223 = tpu.concatenate %221, %222 in 2 : vector<2x4x16xf32>, vector<2x4x112xf32> -> vector<2x4x128xf32>
    %224 = tpu.concatenate %220, %223 in 1 : vector<2x8x128xf32>, vector<2x4x128xf32> -> vector<2x12x128xf32>
    %c0_65 = arith.constant 0 : index
    %c0_66 = arith.constant 0 : index
    %c0_67 = arith.constant 0 : index
    %225 = vector.load %arg11[%c0_65, %c0_66, %c0_67] : memref<2x12x128xf32, #tpu.memory_space<vmem>>, vector<2x12x128xf32>
    tpu.vector_store %arg11[%c0_65, %c0_66, %c0_67], %224 {strides = array<i32>} : memref<2x12x128xf32, #tpu.memory_space<vmem>>, vector<2x12x128xf32>,
    return
  }
  func.func @transform_0(%arg0: i32) -> (i32, i32, i32, i32) {
    %c0_i32 = arith.constant 0 : i32
    %c0_i32_0 = arith.constant 0 : i32
    %c0_i32_1 = arith.constant 0 : i32
    %c0_i32_2 = arith.constant 0 : i32
    %c0_i32_3 = arith.constant 0 : i32
    return %c0_i32, %c0_i32_0, %c0_i32_1, %c0_i32_2 : i32, i32, i32, i32
  }
  func.func @transform_1(%arg0: i32) -> (i32, i32) {
    %c0_i32 = arith.constant 0 : i32
    %c0_i32_0 = arith.constant 0 : i32
    %c0_i32_1 = arith.constant 0 : i32
    return %c0_i32, %c0_i32_0 : i32, i32
  }
  func.func @transform_2(%arg0: i32) -> (i32, i32) {
    %c0_i32 = arith.constant 0 : i32
    %c0_i32_0 = arith.constant 0 : i32
    %c0_i32_1 = arith.constant 0 : i32
    return %c0_i32, %c0_i32_0 : i32, i32
  }
  func.func @transform_3(%arg0: i32) -> (i32, i32) {
    %c0_i32 = arith.constant 0 : i32
    %c0_i32_0 = arith.constant 0 : i32
    %c0_i32_1 = arith.constant 0 : i32
    return %c0_i32, %c0_i32_0 : i32, i32
  }
  func.func @transform_4(%arg0: i32) -> (i32, i32) {
    %c0_i32 = arith.constant 0 : i32
    %c0_i32_0 = arith.constant 0 : i32
    %c0_i32_1 = arith.constant 0 : i32
    return %c0_i32, %c0_i32_0 : i32, i32
  }
  func.func @transform_5(%arg0: i32) -> (i32, i32) {
    %c0_i32 = arith.constant 0 : i32
    %c0_i32_0 = arith.constant 0 : i32
    %c0_i32_1 = arith.constant 0 : i32
    return %c0_i32, %c0_i32_0 : i32, i32
  }
  func.func @transform_6(%arg0: i32) -> (i32, i32) {
    %c0_i32 = arith.constant 0 : i32
    %c0_i32_0 = arith.constant 0 : i32
    %c0_i32_1 = arith.constant 0 : i32
    return %c0_i32, %c0_i32_0 : i32, i32
  }
  func.func @transform_7(%arg0: i32) -> (i32, i32) {
    %c0_i32 = arith.constant 0 : i32
    %c0_i32_0 = arith.constant 0 : i32
    %c0_i32_1 = arith.constant 0 : i32
    return %c0_i32, %c0_i32_0 : i32, i32
  }
  func.func @transform_8(%arg0: i32) -> (i32, i32) {
    %c0_i32 = arith.constant 0 : i32
    %c0_i32_0 = arith.constant 0 : i32
    %c0_i32_1 = arith.constant 0 : i32
    return %c0_i32, %c0_i32_0 : i32, i32
  }
  func.func @transform_9(%arg0: i32) -> (i32, i32) {
    %c0_i32 = arith.constant 0 : i32
    %c0_i32_0 = arith.constant 0 : i32
    %c0_i32_1 = arith.constant 0 : i32
    return %c0_i32, %c0_i32_0 : i32, i32
  }
  func.func @transform_10(%arg0: i32) -> (i32, i32, i32) {
    %c0_i32 = arith.constant 0 : i32
    %c0_i32_0 = arith.constant 0 : i32
    %c0_i32_1 = arith.constant 0 : i32
    %c0_i32_2 = arith.constant 0 : i32
    return %c0_i32, %c0_i32_0, %c0_i32_1 : i32, i32, i32
  }
}

</mosaic_0001>

<bundles_post_ra>
// kernel: gnn2d_forward.1
= control target key start
LH: loop header
LB: loop body
LE: loop exit
PB: predicated region body
PF: predicated region fallthrough
CT: control target
= control target key end

     0   :  { %vm361_vm0 = vcmask 1043456   ;;  %vm70_vm1 = vcmask 31744   ;;  %vm606_vm2 = vcmask 1041409   ;;  %vm608_vm3 = vcmask 1042434   ;;  %s6158_s21 = smov 4   ;;  %s6159_s22 = smov 8   ;;  %s10440_s1 = inlined_call_operand.vmem [shape: f32[4,16], index: 1, kind: input, shape index: {}]   ;;  %s10441_s0 = inlined_call_operand.vmem [shape: f32[2,8,16,4], index: 0, kind: input, shape index: {}]   ;;  %s10442_s2 = inlined_call_operand.vmem [shape: f32[4,16], index: 2, kind: input, shape index: {}]   ;;  %s10443_s3 = inlined_call_operand.vmem [shape: f32[4,16], index: 3, kind: input, shape index: {}]   ;;  %s10444_s4 = inlined_call_operand.vmem [shape: f32[16,32], index: 4, kind: input, shape index: {}]   ;;  %s10445_s5 = inlined_call_operand.vmem [shape: f32[16,32], index: 5, kind: input, shape index: {}]   ;;  %s10446_s6 = inlined_call_operand.vmem [shape: f32[16,32], index: 6, kind: input, shape index: {}]   ;;  %s10447_s7 = inlined_call_operand.vmem [shape: f32[32,12], index: 7, kind: input, shape index: {}]   ;;  %s10448_s8 = inlined_call_operand.vmem [shape: f32[32,12], index: 8, kind: input, shape index: {}]   ;;  %s10449_s9 = inlined_call_operand.vmem [shape: f32[32,12], index: 9, kind: input, shape index: {}]   ;;  %s10450_s10 = inlined_call_operand.vmem [shape: f32[2,12,128], index: 10, kind: output, shape index: {}]  }
   0x1   :  { %v67_v0 = vld [vmem:[%s10440_s1] sm:$0xf]  ;;  %v36_v2 = vld [vmem:[%s10441_s0 + $0x8] sm:$0xff]  ;;  %v37_v3 = vld [vmem:[%s10441_s0 + $0x10] sm:$0xff]  ;;  %vm610_vm4 = vcmask 1043459   ;;  %vm612_vm5 = vcmask 1044484  }
   0x2   :  { %v35_v1 = vld [vmem:[%s10441_s0] sm:$0xff]  ;;  %5761 = vmatprep.subr.msk.mxu0 %vm361_vm0, %v67_v0  ;;  %6010 = vmatprep.subr.msk.mxu1 %vm361_vm0, %v67_v0  ;;  %v6234_v5 = vsel %vm70_vm1, %v36_v2, 0.0  ;;  %v6244_v7 = vld [vmem:[%s10441_s0 + $0x88] sm:$0xff]  ;;  %v6253_v9 = vld [vmem:[%s10441_s0 + $0x90] sm:$0xff]  ;;  %v6298_v25 = vsel %vm70_vm1, %v37_v3, 0.0  ;;  %vm614_vm6 = vcmask 1045509  }
   0x3   :  { %v6231_v4 = vsel %vm70_vm1, %v35_v1, 0.0  ;;  %v6239_v6 = vld [vmem:[%s10441_s0 + $0x80] sm:$0xff]  ;;  %5762 = vmatpush3.msk.msra.mxu0 %vm361_vm0, %v67_v0  ;;  %6011 = vmatpush3.msk.msra.mxu1 %vm361_vm0, %v67_v0  ;;  %v6258_v10 = vld [vmem:[%s10441_s0 + $0x98] sm:$0xff]  ;;  %v6267_v13 = vsel %vm70_vm1, %v6244_v7, 0.0  ;;  %v56_v14 = vld [vmem:[%s10441_s0 + $0xa8] sm:$0xff]  ;;  %v152_v16 = vsel %vm70_vm1, %v6253_v9, 0.0 }
   0x4   :  { %v73_v8 = vadd.f32 %v6234_v5, %v6231_v4  ;;  %v55_v11 = vld [vmem:[%s10441_s0 + $0xa0] sm:$0xff]  ;;  %v143_v12 = vsel %vm70_vm1, %v6239_v6, 0.0  ;;  %5763 = vmatprep.mubr.msk.f32.mxu0 %vm70_vm1, %v35_v1  ;;  %v6278_v17 = vsel %vm70_vm1, %v6258_v10, 0.0  ;;  %v57_v19 = vld [vmem:[%s10441_s0 + $0xb0] sm:$0xff]  ;;  %v6290_v23 = vsel %vm70_vm1, %v56_v14, 0.0  ;;  %v38_v24 = vld [vmem:[%s10441_s0 + $0x18] sm:$0xff] }
   0x5   :  { %v145_v15 = vadd.f32 %v6267_v13, %v143_v12  ;;  %5793 = vmatprep.mubr.msk.f32.mxu1 %vm70_vm1, %v55_v11  ;;  %v68_v18 = vld [vmem:[%s10442_s2] sm:$0xf]  ;;  %v154_v21 = vadd.f32 %v6278_v17, %v152_v16  ;;  %v161_v22 = vsel %vm70_vm1, %v55_v11, 0.0  ;;  %5764 = vmatmul.mubr.msk.f32.vlgmr.msra.gmra.mrb[0].mxu0 %vm70_vm1, %v36_v2  ;;  %v6306_v30 = vsel %vm70_vm1, %v38_v24, 0.0  ;;  %v58_v31 = vld [vmem:[%s10441_s0 + $0xb8] sm:$0xff]  ;;  %v40_v49 = vld [vmem:[%s10441_s0 + $0x28] sm:$0xff] }
   0x6   :  { %v74_v20 = vrot.slane %v73_v8, 4  ;;  %5794 = vmatmul.mubr.msk.f32.vlgmr.msra.gmra.mrb[0].mxu1 %vm70_vm1, %v56_v14  ;;  %v163_v27 = vadd.f32 %v6290_v23, %v161_v22  ;;  %5811 = vmatprep.subr.msk.mxu1 %vm361_vm0, %v68_v18  ;;  %v6312_v34 = vsel %vm70_vm1, %v57_v19, 0.0  ;;  %v82_v37 = vadd.f32 %v6306_v30, %v6298_v25  ;;  %v39_v38 = vld [vmem:[%s10441_s0 + $0x20] sm:$0xff]  ;;  %v60_v50 = vld [vmem:[%s10441_s0 + $0xc8] sm:$0xff]  ;;  %v41_v56 = vld [vmem:[%s10441_s0 + $0x30] sm:$0xff] }
   0x7   :  { %v146_v26 = vrot.slane %v145_v15, 4  ;;  %5766 = vmatprep.mubr.msk.f32.mxu0 %vm70_vm1, %v37_v3  ;;  %v155_v29 = vrot.slane %v154_v21, 4  ;;  %5812 = vmatpush3.msk.msra.mxu1 %vm361_vm0, %v68_v18  ;;  %v59_v39 = vld [vmem:[%s10441_s0 + $0xc0] sm:$0xff]  ;;  %v6325_v42 = vsel %vm70_vm1, %v58_v31, 0.0  ;;  %v246_v48 = vadd.f32 %v152_v16, %v143_v12  ;;  %v61_v57 = vld [vmem:[%s10441_s0 + $0xd0] sm:$0xff]  ;;  %v42_v3 = vld [vmem:[%s10441_s0 + $0x38] sm:$0xff] }
   0x8   :  { %v75_v28 = vadd.f32 %v74_v20, %v73_v8  ;;  %5796 = vmatprep.mubr.msk.f32.mxu1 %vm70_vm1, %v57_v19  ;;  %v164_v33 = vrot.slane %v163_v27, 4  ;;  %v83_v44 = vrot.slane %v82_v37, 4  ;;  %v172_v45 = vadd.f32 %v6325_v42, %v6312_v34  ;;  %v6340_v51 = vld [vmem:[%s10443_s3] sm:$0xf]  ;;  %v62_v8 = vld [vmem:[%s10441_s0 + $0xd8] sm:$0xff] }
   0x9   :  { %v147_v32 = vadd.f32 %v146_v26, %v145_v15  ;;  %v156_v36 = vadd.f32 %v155_v29, %v154_v21  ;;  %5767 = vmatmul.mubr.msk.f32.gmra.mrb[2].mxu0 %vm70_vm1, %v38_v24  ;;  %v89_v63 = vsel %vm70_vm1, %v39_v38, 0.0  ;;  %5816 = vmatprep.subr.msk.mxu1 %vm361_vm0, %v6340_v51  ;;  %v247_v0 = vadd.f32 %v246_v48, %v161_v22  ;;  %v63_v16 = vld [vmem:[%s10441_s0 + $0xe0] sm:$0xff]  ;;  %v44_v29 = vld [vmem:[%s10441_s0 + $0x48] sm:$0xff]  ;;  %v6423_v48 = vld [vmem:[%s10441_s0 + $0xf8] sm:$0xff] }
   0xa   :  { %v76_v35 = vrot.slane %v75_v28, 2  ;;  %5797 = vmatmul.mubr.msk.f32.gmra.mrb[2].mxu1 %vm70_vm1, %v58_v31  ;;  %v165_v41 = vadd.f32 %v164_v33, %v163_v27  ;;  %5769 = vmatprep.mubr.msk.f32.mxu0 %vm70_vm1, %v39_v38  ;;  %v84_v54 = vadd.f32 %v83_v44, %v82_v37  ;;  %v173_v55 = vrot.slane %v172_v45, 4  ;;  %v64_v31 = vld [vmem:[%s10441_s0 + $0xe8] sm:$0xff] }
   0xb   :  { %v148_v40 = vrot.slane %v147_v32, 2  ;;  %5799 = vmatprep.mubr.msk.f32.mxu1 %vm70_vm1, %v59_v39  ;;  %v157_v43 = vrot.slane %v156_v36, 2  ;;  %v253_v1 = vadd.f32 %v6278_v17, %v6267_v13  ;;  %v6358_v2 = vsel %vm70_vm1, %v40_v49, 0.0  ;;  %v43_v13 = vld [vmem:[%s10441_s0 + $0x40] sm:$0xff] }
   0xc   :  { %v166_v47 = vrot.slane %v165_v41, 2  ;;  %v77_v52 = vadd.f32 %v76_v35, %v75_v28  ;;  %v85_v61 = vrot.slane %v84_v54, 2  ;;  %v174_v62 = vadd.f32 %v173_v55, %v172_v45 }
   0xd   :  { %v149_v46 = vadd.f32 %v148_v40, %v147_v32  ;;  %v158_v53 = vadd.f32 %v157_v43, %v156_v36  ;;  %5770 = vmatmul.mubr.msk.f32.gmra.mrb[4].mxu0 %vm70_vm1, %v40_v49  ;;  %v179_v15 = vsel %vm70_vm1, %v59_v39, 0.0  ;;  %v91_v19 = vadd.f32 %v6358_v2, %v89_v63 }
   0xe   :  { %5800 = vmatmul.mubr.msk.f32.gmra.mrb[4].mxu1 %vm70_vm1, %v60_v50  ;;  %v167_v59 = vadd.f32 %v166_v47, %v165_v41  ;;  %5772 = vmatprep.mubr.msk.f32.mxu0 %vm70_vm1, %v41_v56  ;;  %v78_v11 = vrot.slane %v77_v52, 1  ;;  %v175_v14 = vrot.slane %v174_v62, 2  ;;  %v86_v18 = vadd.f32 %v85_v61, %v84_v54  ;;  %v46_v47 = vld [vmem:[%s10441_s0 + $0x58] sm:$0xff] }
   0xf   :  { %v150_v58 = vrot.slane %v149_v46, 1  ;;  %5802 = vmatprep.mubr.msk.f32.mxu1 %vm70_vm1, %v61_v57  ;;  %v159_v60 = vrot.slane %v158_v53, 1  ;;  %v6379_v22 = vsel %vm70_vm1, %v60_v50, 0.0  ;;  %v232_v24 = vadd.f32 %v6298_v25, %v6231_v4  ;;  %v6398_v4 = vld [vmem:[%s10441_s0 + $0x50] sm:$0xff] }
  0x10   :  { %v168_v12 = vrot.slane %v167_v59, 1  ;;  %v176_v21 = vadd.f32 %v175_v14, %v174_v62  ;;  %v254_v26 = vadd.f32 %v253_v1, %v6290_v23  ;;  %v92_v27 = vrot.slane %v91_v19, 4  ;;  %v6403_v23 = vld [vmem:[%s10441_s0 + $0xf0] sm:$0xff] }
  0x11   :  { %5773 = vmatmul.mubr.msk.f32.gmra.mrb[6].mxu0 %vm70_vm1, %v42_v3  ;;  %v151_v17 = vadd.f32 %v150_v58, %v149_v46  ;;  %v160_v20 = vadd.f32 %v159_v60, %v158_v53  ;;  %v181_v28 = vadd.f32 %v6379_v22, %v179_v15  ;;  %v79_v32 = vadd.f32 %v78_v11, %v77_v52 }
  0x12   :  { %5803 = vmatmul.mubr.msk.f32.gmra.mrb[6].mxu1 %vm70_vm1, %v62_v8  ;;  %5775 = vmatprep.mubr.msk.f32.mxu0 %vm70_vm1, %v43_v13  ;;  %v169_v33 = vadd.f32 %v168_v12, %v167_v59  ;;  %v248_v35 = vadd.f32 %v247_v0, %v6312_v34  ;;  %v98_v36 = vsel %vm70_vm1, %v41_v56, 0.0  ;;  %v87_v37 = vrot.slane %v86_v18, 1  ;;  %v48_v0 = vld [vmem:[%s10441_s0 + $0x68] sm:$0xff]  ;;  %v49_v12 = vld [vmem:[%s10441_s0 + $0x70] sm:$0xff] }
  0x13   :  { %5805 = vmatprep.mubr.msk.f32.mxu1 %vm70_vm1, %v63_v16  ;;  %v224_v25 = vmul.f32 0.0625, %v151_v17  ;;  %v93_v38 = vadd.f32 %v92_v27, %v91_v19  ;;  %v182_v34 = vrot.slane %v181_v28, 4  ;;  %v225_v39 = vmul.f32 0.0625, %v160_v20  ;;  %v50_v27 = vld [vmem:[%s10441_s0 + $0x78] sm:$0xff] }
  0x14   :  { %v177_v40 = vrot.slane %v176_v21, 1  ;;  %v188_v41 = vsel %vm70_vm1, %v61_v57, 0.0  ;;  %v6411_v43 = vsel %vm70_vm1, %v42_v3, 0.0  ;;  %v239_v44 = vadd.f32 %v6306_v30, %v6234_v5  ;;  %v6434_v5 = vld [vmem:[%s10441_s0 + $0x60] sm:$0xff] }
  0x15   :  { %5776 = vmatmul.mubr.msk.f32.gmra.mrb[8].mxu0 %vm70_vm1, %v44_v29  ;;  %v255_v45 = vadd.f32 %v254_v26, %v6325_v42  ;;  %v100_v46 = vadd.f32 %v6411_v43, %v98_v36  ;;  %v233_v49 = vadd.f32 %v232_v24, %v89_v63  ;;  %v249_v50 = vadd.f32 %v248_v35, %v179_v15 }
  0x16   :  { %5806 = vmatmul.mubr.msk.f32.gmra.mrb[8].mxu1 %vm70_vm1, %v64_v31  ;;  %5778 = vmatprep.mubr.msk.f32.mxu0 %vm70_vm1, %v6398_v4  ;;  %v183_v52 = vadd.f32 %v182_v34, %v181_v28  ;;  %v6426_v53 = vsel %vm70_vm1, %v62_v8, 0.0  ;;  %v88_v30 = vadd.f32 %v87_v37, %v86_v18  ;;  %v94_v42 = vrot.slane %v93_v38, 2 }
  0x17   :  { %5808 = vmatprep.mubr.msk.f32.mxu1 %vm70_vm1, %v6403_v23  ;;  %v101_v54 = vrot.slane %v100_v46, 4  ;;  %v190_v55 = vadd.f32 %v6426_v53, %v188_v41  ;;  %v216_v56 = vmul.f32 0.0625, %v79_v32  ;;  %v226_v57 = vmul.f32 0.0625, %v169_v33 }
  0x18   :  { %v620_v58 = vsel %vm606_vm2, %v225_v39, %v224_v25  ;;  %v178_v59 = vadd.f32 %v177_v40, %v176_v21  ;;  %v107_v62 = vsel %vm70_vm1, %v43_v13, 0.0  ;;  %v6442_v63 = vsel %vm70_vm1, %v63_v16, 0.0 }
  0x19   :  { %5779 = vmatmul.mubr.msk.f32.gmra.mrb[10].mxu0 %vm70_vm1, %v46_v47  ;;  %v102_v60 = vadd.f32 %v101_v54, %v100_v46  ;;  %v191_v61 = vrot.slane %v190_v55, 4  ;;  %v240_v1 = vadd.f32 %v239_v44, %v6358_v2  ;;  %v184_v3 = vrot.slane %v183_v52, 2 }
  0x1a   :  { %5809 = vmatmul.mubr.msk.f32.gmra.mrb[10].mxu1 %vm70_vm1, %v6423_v48  ;;  %5781 = vmatprep.mubr.msk.f32.mxu0 %vm70_vm1, %v6434_v5  ;;  %v6449_v8 = vsel %vm70_vm1, %v44_v29, 0.0  ;;  %v6452_v11 = vsel %vm70_vm1, %v64_v31, 0.0  ;;  %v217_v14 = vmul.f32 0.0625, %v88_v30  ;;  %v95_v15 = vadd.f32 %v94_v42, %v93_v38 }
  0x1b   :  { %v103_v13 = vrot.slane %v102_v60, 2  ;;  %v192_v16 = vadd.f32 %v191_v61, %v190_v55  ;;  %v621_v2 = vsel %vm608_vm3, %v226_v57, %v620_v58  ;;  %v6461_v17 = vadd.f32 %v255_v45, %v6379_v22 }
  0x1c   :  { %v109_v18 = vadd.f32 %v6449_v8, %v107_v62  ;;  %v199_v19 = vadd.f32 %v6452_v11, %v6442_v63  ;;  %v227_v20 = vmul.f32 0.0625, %v178_v59  ;;  %v234_v21 = vadd.f32 %v233_v49, %v98_v36 }
  0x1d   :  { %5782 = vmatmul.mubr.msk.f32.gmra.mrb[12].mxu0 %vm70_vm1, %v48_v0  ;;  %v104_v24 = vadd.f32 %v103_v13, %v102_v60  ;;  %v193_v26 = vrot.slane %v192_v16, 2  ;;  %v185_v28 = vadd.f32 %v184_v3, %v183_v52  ;;  %v116_v22 = vsel %vm70_vm1, %v6398_v4, 0.0 }
  0x1e   :  { %5784 = vmatprep.mubr.msk.f32.mxu0 %vm70_vm1, %v49_v12  ;;  %v110_v29 = vrot.slane %v109_v18, 4  ;;  %v200_v31 = vrot.slane %v199_v19, 4  ;;  %v607_v32 = vsel %vm606_vm2, %v217_v14, %v216_v56  ;;  %v96_v33 = vrot.slane %v95_v15, 1 }
  0x1f   :  { %v6473_v35 = vadd.f32 %v249_v50, %v188_v41  ;;  %v6477_v36 = vsel %vm70_vm1, %v6403_v23, 0.0  ;;  %v105_v25 = vrot.slane %v104_v24, 1  ;;  %v117_v34 = vsel %vm70_vm1, %v46_v47, 0.0 }
  0x20   :  { %v111_v37 = vadd.f32 %v110_v29, %v109_v18  ;;  %v201_v38 = vadd.f32 %v200_v31, %v199_v19  ;;  %v6483_v4 = vsel %vm610_vm4, %v227_v20, %v621_v2  ;;  %v241_v39 = vadd.f32 %v240_v1, %v6411_v43 }
  0x21   :  { %5785 = vmatmul.mubr.msk.f32.gmra.mrb[14].mxu0 %vm70_vm1, %v50_v27  ;;  %v194_v40 = vadd.f32 %v193_v26, %v192_v16  ;;  %v118_v41 = vadd.f32 %v117_v34, %v116_v22  ;;  %v186_v44 = vrot.slane %v185_v28, 1  ;;  %v6488_v23 = vsel %vm70_vm1, %v6423_v48, 0.0 }
  0x22   :  { %5787 = vmatprep.mubr.msk.f32.mxu0 %vm70_vm1, %v6239_v6  ;;  %v112_v45 = vrot.slane %v111_v37, 2  ;;  %v202_v46 = vrot.slane %v201_v38, 2  ;;  %v97_v6 = vadd.f32 %v96_v33, %v95_v15  ;;  %v235_v49 = vadd.f32 %v234_v21, %v107_v62 }
  0x23   :  { %v119_v47 = vrot.slane %v118_v41, 4  ;;  %v208_v50 = vadd.f32 %v6488_v23, %v6477_v36  ;;  %v106_v43 = vadd.f32 %v105_v25, %v104_v24  ;;  %v125_v42 = vsel %vm70_vm1, %v6434_v5, 0.0 }
  0x24   :  { %v113_v52 = vadd.f32 %v112_v45, %v111_v37  ;;  %v203_v30 = vadd.f32 %v202_v46, %v201_v38  ;;  %v195_v48 = vrot.slane %v194_v40, 1  ;;  %v187_v56 = vadd.f32 %v186_v44, %v185_v28 }
  0x25   :  { %5788 = vmatmul.mubr.msk.f32.gmra.mrb[16].mxu0 %vm70_vm1, %v6244_v7  ;;  %v120_v54 = vadd.f32 %v119_v47, %v118_v41  ;;  %v209_v55 = vrot.slane %v208_v50, 4  ;;  %v126_v7 = vsel %vm70_vm1, %v48_v0, 0.0  ;;  %v134_v61 = vsel %vm70_vm1, %v49_v12, 0.0 }
  0x26   :  { %5790 = vmatprep.mubr.msk.f32.mxu0 %vm70_vm1, %v6253_v9  ;;  %v114_v57 = vrot.slane %v113_v52, 1  ;;  %v204_v58 = vrot.slane %v203_v30, 1  ;;  %v127_v59 = vadd.f32 %v126_v7, %v125_v42  ;;  %v135_v5 = vsel %vm70_vm1, %v50_v27, 0.0 }
  0x27   :  { %v121_v9 = vrot.slane %v120_v54, 2  ;;  %v210_v60 = vadd.f32 %v209_v55, %v208_v50  ;;  %v218_v62 = vmul.f32 0.0625, %v97_v6  ;;  %v136_v14 = vadd.f32 %v135_v5, %v134_v61 }
  0x28   :  { %v115_v1 = vadd.f32 %v114_v57, %v113_v52  ;;  %v128_v3 = vrot.slane %v127_v59, 4  ;;  %v219_v15 = vmul.f32 0.0625, %v106_v43  ;;  %v196_v0 = vadd.f32 %v195_v48, %v194_v40 }
  0x29   :  { %5791 = vmatmul.mubr.msk.f32.gmra.mrb[18].mxu0 %vm70_vm1, %v6258_v10  ;;  %v122_v13 = vadd.f32 %v121_v9, %v120_v54  ;;  %v211_v16 = vrot.slane %v210_v60, 2  ;;  %v242_v2 = vadd.f32 %v241_v39, %v6449_v8  ;;  %v236_v18 = vadd.f32 %v235_v49, %v116_v22 }
  0x2a   :  { %v129_v19 = vadd.f32 %v128_v3, %v127_v59  ;;  %v137_v20 = vrot.slane %v136_v14, 4  ;;  %v228_v10 = vmul.f32 0.0625, %v187_v56  ;;  %v205_v21 = vadd.f32 %v204_v58, %v203_v30 }
  0x2b   :  { %v123_v24 = vrot.slane %v122_v13, 1  ;;  %v212_v26 = vadd.f32 %v211_v16, %v210_v60  ;;  %v220_v12 = vmul.f32 0.0625, %v115_v1  ;;  %v609_v29 = vsel %vm608_vm3, %v218_v62, %v607_v32 }
  0x2c   :  { %v130_v28 = vrot.slane %v129_v19, 2  ;;  %v138_v27 = vadd.f32 %v137_v20, %v136_v14  ;;  %v229_v31 = vmul.f32 0.0625, %v196_v0  ;;  %v611_v37 = vsel %vm610_vm4, %v219_v15, %v609_v29 }
  0x2d   :  { %v124_v33 = vadd.f32 %v123_v24, %v122_v13  ;;  %v213_v25 = vrot.slane %v212_v26, 1  ;;  %v243_v38 = vadd.f32 %v242_v2, %v117_v34  ;;  %v237_v8 = vadd.f32 %v236_v18, %v125_v42 }
  0x2e   :  { %v131_v40 = vadd.f32 %v130_v28, %v129_v19  ;;  %v139_v22 = vrot.slane %v138_v27, 2  ;;  %v230_v39 = vmul.f32 0.0625, %v205_v21  ;;  %v623_v45 = vsel %vm612_vm5, %v228_v10, %v6483_v4 }
  0x2f   :  { %v221_v41 = vmul.f32 0.0625, %v124_v33  ;;  %v214_v44 = vadd.f32 %v213_v25, %v212_v26  ;;  %v613_v49 = vsel %vm612_vm5, %v220_v12, %v611_v37  ;;  %vm616_vm7 = vcmask 1046534  }
  0x30   :  { %v132_v46 = vrot.slane %v131_v40, 1  ;;  %v140_v6 = vadd.f32 %v139_v22, %v138_v27  ;;  %v624_v32 = vsel %vm614_vm6, %v229_v31, %v623_v45  ;;  %v257_v47 = vadd.f32 %v6461_v17, %v6426_v53 }
  0x31   :  { %v244_v34 = vadd.f32 %v243_v38, %v126_v7  ;;  %v251_v52 = vadd.f32 %v6473_v35, %v6442_v63  ;;  %v231_v30 = vmul.f32 0.0625, %v214_v44  ;;  %v238_v42 = vadd.f32 %v237_v8, %v134_v61 }
  0x32   :  { %v133_v50 = vadd.f32 %v132_v46, %v131_v40  ;;  %v141_v43 = vrot.slane %v140_v6, 1  ;;  %v615_v4 = vsel %vm614_vm6, %v221_v41, %v613_v49  ;;  %vm618_vm8 = vcmask 1047559  }
  0x33   :  { %v625_v55 = vsel %vm616_vm7, %v230_v39, %v624_v32  ;;  %v258_v56 = vadd.f32 %v257_v47, %v6452_v11  ;;  %v245_v57 = vadd.f32 %v244_v34, %v135_v5  ;;  %v252_v17 = vadd.f32 %v251_v52, %v6477_v36 }
  0x34   :  { %v142_v48 = vadd.f32 %v141_v43, %v140_v6  ;;  %v222_v54 = vmul.f32 0.0625, %v133_v50  ;;  %v626_v7 = vsel %vm618_vm8, %v231_v30, %v625_v55  ;;  %v261_v63 = vmul.f32 0.125, %v238_v42 }
  0x35   :  { %v259_v59 = vadd.f32 %v258_v56, %v6488_v23  ;;  %v262_v9 = vmul.f32 0.125, %v245_v57  ;;  %v263_v60 = vmul.f32 0.125, %v252_v17  ;;  %v6149_v22 = vmov 1966171168  }
  0x36   :  { %v223_v58 = vmul.f32 0.0625, %v142_v48  ;;  %v617_v53 = vsel %vm616_vm7, %v222_v54, %v615_v4  ;;  %v713_v39 = vunpack.c.l.s4 %v6149_v22  ;;  %v715_v41 = vlaneseq }
  0x37   :  { %v264_v11 = vmul.f32 0.125, %v259_v59  ;;  %vm1085_vm9 = vcmask 130048   ;;  %vm2326_vm10 = vcmask 261120   ;;  %vm3690_vm11 = vcmask 64544  }
  0x38   :  { %v619_v35 = vsel %vm618_vm8, %v223_v58, %v617_v53  ;;  %v714_v44 = vunpack.c.0.s8 %v713_v39  ;;  %v6592_v45 = vshrl.u32 %v715_v41, 7  ;;  %vm3851_vm12 = vcmask 97344  }
  0x39   :  { %5813 = vmatprep.mubr.msk.f32.mxu1 %vm70_vm1, %v619_v35  ;;  %vm5496_vm13 = vcmask 1041408   ;;  %vm5244_vm14 = vcmask 15360   ;;  %vm5493_vm15 = vcmask 64512  }
  0x3a   :  { %5814 = vmatmul.mubr.msk.f32.vlgmr.msra.gmra.mrb[12].mxu1 %vm70_vm1, %v626_v7  ;;  %10659 = vst [vmem:[#allocation2_spill] sm:$0xff] %v6592_v45  ;;  %v6595_v46 = vsub.s32 %v714_v44, %v6592_v45  ;;  %v6605_v30 = vsub.s32 0, %v6592_v45 }
  0x3b   :  { %5817 = vmatpush3.msk.msra.mxu1 %vm361_vm0, %v6340_v51  ;;  %5818 = vmatprep.mubr.msk.f32.mxu1 %vm70_vm1, %v261_v63 }
  0x3c   :  { %10660 = vst [vmem:[#allocation3_spill] sm:$0xff] %v6595_v46  ;;  %10661 = vst [vmem:[#allocation4_spill] sm:$0xff] %v6605_v30 }
  0x3e   :  { %5819 = vmatmul.mubr.msk.f32.vlgmr.msra.gmra.mrb[14].mxu1 %vm70_vm1, %v262_v9 }
  0x3f   :  { %5821 = vmatprep.mubr.msk.f32.mxu1 %vm70_vm1, %v263_v60 }
  0x42   :  { %5822 = vmatmul.mubr.msk.f32.gmra.mrb[16].mxu1 %vm70_vm1, %v264_v11 }
  0xd8   :  { %v6532_v61 = vpop.f32.mrb[0].mxu0 }
  0xd9   :  { %v6530_v36 = vpop.f32.mrb[0].mxu1  ;;  %v6536_v5 = vpop.f32.mrb[1].mxu0 }
  0xda   :  { %v6534_v23 = vpop.f32.mrb[1].mxu1 }
  0xdc   :  { %v6540_v51 = vpop.f32.mrb[2].mxu0 }
  0xdd   :  { %v6538_v62 = vpop.f32.mrb[2].mxu1  ;;  %v6544_v3 = vpop.f32.mrb[3].mxu0 }
  0xde   :  { %v6542_v1 = vpop.f32.mrb[3].mxu1 }
  0xe0   :  { %v6548_v15 = vpop.f32.mrb[4].mxu0 }
  0xe1   :  { %v6546_v14 = vpop.f32.mrb[4].mxu1  ;;  %v6552_v13 = vpop.f32.mrb[5].mxu0 }
  0xe2   :  { %v6550_v0 = vpop.f32.mrb[5].mxu1 }
  0xe4   :  { %v6556_v2 = vpop.f32.mrb[6].mxu0 }
  0xe5   :  { %v6554_v16 = vpop.f32.mrb[6].mxu1  ;;  %v6560_v19 = vpop.f32.mrb[7].mxu0 }
  0xe6   :  { %v6558_v18 = vpop.f32.mrb[7].mxu1 }
  0xe8   :  { %v6564_v10 = vpop.f32.mrb[8].mxu0 }
  0xe9   :  { %v6562_v20 = vpop.f32.mrb[8].mxu1  ;;  %v6566_v24 = vpop.f32.mrb[9].mxu0 }
  0xea   :  { %v571_v21 = vpop.f32.mrb[9].mxu1 }
  0xec   :  { %v6570_v12 = vpop.f32.mrb[10].mxu0 }
  0xed   :  { %v6568_v26 = vpop.f32.mrb[10].mxu1  ;;  %v6574_v27 = vpop.f32.mrb[11].mxu0 }
  0xee   :  { %v6572_v28 = vpop.f32.mrb[11].mxu1 }
  0xf0   :  { %v6576_v29 = vpop.f32.mrb[12].mxu0 }
  0xf1   :  { %v6578_v31 = vpop.f32.mrb[13].mxu0 }
  0xf4   :  { %v6580_v33 = vpop.f32.mrb[14].mxu0 }
  0xf5   :  { %v6582_v25 = vpop.f32.mrb[15].mxu0 }
  0xf8   :  { %v6584_v37 = vpop.f32.mrb[16].mxu0 }
  0xf9   :  { %v6586_v38 = vpop.f32.mrb[17].mxu0 }
  0xfc   :  { %v6588_v40 = vpop.f32.mrb[18].mxu0 }
  0xfd   :  { %v6590_v8 = vpop.f32.mrb[19].mxu0 }
 0x10d   :  { %v5815_v6 = vpop.f32.mrb[12].mxu1 }
 0x10e   :  { %v760_v49 = vcombine.high %v5815_v6, %v5815_v6  ;;  %v6598_v32 = vrot.slane %v5815_v6, %v6595_v46  ;;  %v700_v47 = vpop.f32.mrb[13].mxu1 }
 0x10f   :  { %v711_v34 = vcombine.high %v700_v47, %v700_v47  ;;  %v718_v50 = vrot.slane %v700_v47, %v6595_v46 }
 0x110   :  { %v774_v43 = vrot.slane %v760_v49, %v6595_v46  ;;  %v783_v52 = vrot.slane %v6598_v32, %v6595_v46 }
 0x111   :  { %v725_v42 = vrot.slane %v711_v34, %v6595_v46  ;;  %v726_v4 = vcombine.high %v718_v50, %v718_v50  ;;  %v734_v48 = vrot.slane %v718_v50, %v6595_v46  ;;  %v6609_v54 = vpop.f32.mrb[14].mxu1 }
 0x112   :  { %v776_v55 = vcombine.high %v774_v43, %v774_v43  ;;  %v790_v56 = vrot.slane %v774_v43, %v6595_v46  ;;  %v805_v57 = vcombine.high %v783_v52, %v783_v52  ;;  %v6612_v58 = vpop.f32.mrb[15].mxu1 }
 0x113   :  { %v727_v53 = vcombine.high %v725_v42, %v725_v42  ;;  %v741_v17 = vrot.slane %v725_v42, %v6595_v46  ;;  %v748_v7 = vrot.slane %v726_v4, %v6595_v46  ;;  %v756_v63 = vcombine.high %v734_v48, %v734_v48 }
 0x114   :  { %v804_v35 = vrot.slane %v776_v55, %v6595_v46  ;;  %v806_v59 = vcombine.high %v790_v56, %v790_v56  ;;  %v852_v9 = vrot.slane %v805_v57, %v6605_v30  ;;  %v860_v60 = vrot.slane %v790_v56, %v6605_v30 }
 0x115   :  { %v758_v11 = vcombine.high %v748_v7, %v748_v7  ;;  %v812_v22 = vrot.slane %v734_v48, %v6605_v30  ;;  %v816_v39 = vrot.slane %v748_v7, %v6605_v30  ;;  %v820_v41 = vrot.slane %v756_v63, %v6605_v30  ;;  %v6622_v44 = vpop.f32.mrb[16].mxu1 }
 0x116   :  { %v808_v6 = vcombine.high %v804_v35, %v804_v35  ;;  %v864_v49 = vrot.slane %v804_v35, %v6605_v30  ;;  %v868_v47 = vrot.slane %v806_v59, %v6605_v30  ;;  %v6627_v34 = vadd.f32 %v852_v9, %v6534_v23  ;;  %v6629_v50 = vpop.f32.mrb[17].mxu1 }
 0x117   :  { %v6632_v43 = vadd.f32 %v6530_v36, %v852_v9  ;;  %v6635_v42 = vadd.f32 %v860_v60, %v6550_v0  ;;  %v914_v4 = vadd.f32 %v6546_v14, %v860_v60  ;;  %v824_v48 = vrot.slane %v758_v11, %v6605_v30 }
 0x118   :  { %v872_v55 = vrot.slane %v808_v6, %v6605_v30  ;;  %v6641_v56 = vadd.f32 %v864_v49, %v6558_v18  ;;  %v916_v23 = vadd.f32 %v6554_v16, %v864_v49  ;;  %v6644_v57 = vadd.f32 %v868_v47, %v571_v21 }
 0x119   :  { %v918_v7 = vadd.f32 %v6562_v20, %v868_v47  ;;  %v828_v36 = vrot.slane %v741_v17, %v6605_v30  ;;  %v889_v0 = vadd.f32 %v812_v22, %v6536_v5  ;;  %v890_v63 = vadd.f32 %v6532_v61, %v812_v22 }
 0x11a   :  { %v919_v14 = vadd.f32 %v872_v55, %v6572_v28  ;;  %v920_v35 = vadd.f32 %v6568_v26, %v872_v55  ;;  %v891_v59 = vadd.f32 %v816_v39, %v6544_v3  ;;  %v892_v18 = vadd.f32 %v6540_v51, %v816_v39 }
 0x11b   :  { %v893_v16 = vadd.f32 %v820_v41, %v6552_v13  ;;  %v894_v21 = vadd.f32 %v6548_v15, %v820_v41  ;;  %v895_v20 = vadd.f32 %v824_v48, %v6560_v19  ;;  %v896_v9 = vadd.f32 %v6556_v2, %v824_v48 }
 0x11c   :  { %v897_v5 = vadd.f32 %v828_v36, %v6566_v24  ;;  %v898_v61 = vadd.f32 %v6564_v10, %v828_v36  ;;  %v755_v28 = vrot.slane %v727_v53, %v6595_v46  ;;  %v757_v60 = vcombine.high %v741_v17, %v741_v17 }
 0x11d   :  { %v6662_v26 = vadd.f32 %v6609_v54, %v890_v63  ;;  %v6665_v51 = vadd.f32 %v6609_v54, %v892_v18  ;;  %v6668_v3 = vadd.f32 %v6609_v54, %v894_v21  ;;  %v6671_v15 = vadd.f32 %v6609_v54, %v896_v9 }
 0x11e   :  { %v832_v13 = vrot.slane %v755_v28, %v6605_v30  ;;  %v836_v2 = vrot.slane %v757_v60, %v6605_v30  ;;  %v759_v19 = vcombine.high %v755_v28, %v755_v28  ;;  %v6676_v10 = vadd.f32 %v6609_v54, %v898_v61 }
 0x11f   :  { %v1054_v24 = vmax.f32 %v6662_v26, 0.0  ;;  %v844_v53 = vrot.slane %v783_v52, %v6605_v30  ;;  %v6704_v48 = vadd.f32 %v6612_v58, %v895_v20  ;;  %v10463_v63 = vmax.f32 %v6665_v51, 0.0 }
 0x120   :  { %v900_v17 = vadd.f32 %v6570_v12, %v832_v13  ;;  %v899_v11 = vadd.f32 %v832_v13, %v6574_v27  ;;  %v902_v22 = vadd.f32 %v6576_v29, %v836_v2  ;;  %v901_v39 = vadd.f32 %v836_v2, %v6578_v31 }
 0x121   :  { %v840_v41 = vrot.slane %v759_v19, %v6605_v30  ;;  %v906_v49 = vadd.f32 %v6584_v37, %v844_v53  ;;  %v6692_v12 = vadd.f32 %v6612_v58, %v889_v0  ;;  %v1087_v27 = vsel %vm1085_vm9, %v1054_v24, 0.0 }
 0x122   :  { %v6686_v6 = vadd.f32 %v6609_v54, %v900_v17  ;;  %v6698_v29 = vadd.f32 %v6612_v58, %v891_v59  ;;  %v6701_v31 = vadd.f32 %v6612_v58, %v893_v16  ;;  %v6713_v37 = vadd.f32 %v6612_v58, %v901_v39 }
 0x123   :  { %v904_v47 = vadd.f32 %v6580_v33, %v840_v41  ;;  %v903_v52 = vadd.f32 %v840_v41, %v6582_v25  ;;  %v6707_v33 = vadd.f32 %v6612_v58, %v897_v5  ;;  %v6710_v25 = vadd.f32 %v6612_v58, %v899_v11 }
 0x124   :  { %v1053_v55 = vmax.f32 %v6692_v12, 0.0  ;;  %v10464_v36 = vmax.f32 %v6698_v29, 0.0  ;;  %v905_v0 = vadd.f32 %v844_v53, %v6586_v38  ;;  %v775_v21 = vcombine.high %v6598_v32, %v6598_v32 }
 0x125   :  { %v10457_v20 = vmax.f32 %v6701_v31, 0.0  ;;  %v6729_v9 = vadd.f32 %v6622_v44, %v914_v4  ;;  %v6732_v38 = vadd.f32 %v6622_v44, %v916_v23  ;;  %v6735_v61 = vadd.f32 %v6622_v44, %v918_v7 }
 0x126   :  { %v1086_v59 = vsel %vm1085_vm9, %v1053_v55, 0.0  ;;  %v1089_v16 = vsel %vm1085_vm9, %v10464_v36, 0.0  ;;  %v6738_v28 = vadd.f32 %v6622_v44, %v920_v35  ;;  %v6742_v60 = vadd.f32 %v6629_v50, %v6635_v42  ;;  %v1327_v36 = vld [vmem:[%s10445_s5] sm:$0xff] }
 0x127   :  { %v1088_v18 = vadd.f32 %v1087_v27, %v1086_v59  ;;  %v10456_v32 = vmax.f32 %v6668_v3, 0.0  ;;  %v1091_v4 = vsel %vm1085_vm9, %v10463_v63, 0.0  ;;  %v6750_v23 = vadd.f32 %v6629_v50, %v6641_v56 }
 0x128   :  { %v6754_v7 = vadd.f32 %v6629_v50, %v6644_v57  ;;  %v6757_v13 = vadd.f32 %v6629_v50, %v919_v14  ;;  %v10455_v42 = vmax.f32 %v6704_v48, 0.0  ;;  %v1093_v2 = vsel %vm1085_vm9, %v10457_v20, 0.0 }
 0x129   :  { %v1090_v5 = vadd.f32 %v1089_v16, %v1088_v18  ;;  %v10454_v19 = vmax.f32 %v6671_v15, 0.0  ;;  %v10452_v56 = vmax.f32 %v6676_v10, 0.0  ;;  %v1095_v57 = vsel %vm1085_vm9, %v10456_v32, 0.0 }
 0x12a   :  { %v797_v17 = vrot.slane %v775_v21, %v6595_v46  ;;  %v6770_v14 = vadd.f32 %v6622_v44, %v906_v49  ;;  %v10453_v11 = vmax.f32 %v6707_v33, 0.0  ;;  %v6775_v41 = vadd.f32 %v6622_v44, %v6632_v43 }
 0x12b   :  { %v1092_v35 = vadd.f32 %v1091_v4, %v1090_v5  ;;  %v6778_v27 = vadd.f32 %v6609_v54, %v902_v22  ;;  %v1097_v59 = vsel %vm1085_vm9, %v10455_v42, 0.0  ;;  %v6785_v49 = vadd.f32 %v6612_v58, %v903_v52 }
 0x12c   :  { %v807_v18 = vcombine.high %v797_v17, %v797_v17  ;;  %v848_v16 = vrot.slane %v797_v17, %v6605_v30  ;;  %v1099_v21 = vsel %vm1085_vm9, %v10454_v19, 0.0  ;;  %v6791_v43 = vadd.f32 %v6609_v54, %v904_v47 }
 0x12d   :  { %v1094_v53 = vadd.f32 %v1093_v2, %v1092_v35  ;;  %v6794_v22 = vadd.f32 %v6629_v50, %v905_v0  ;;  %v6801_v58 = vadd.f32 %v6629_v50, %v6627_v34  ;;  %v10451_v52 = vmax.f32 %v6710_v25, 0.0 }
 0x12e   :  { %v856_v4 = vrot.slane %v807_v18, %v6605_v30  ;;  %v908_v35 = vadd.f32 %v6588_v40, %v848_v16  ;;  %v907_v2 = vadd.f32 %v848_v16, %v6590_v8  ;;  %v1101_v54 = vsel %vm1085_vm9, %v10453_v11, 0.0 }
 0x12f   :  { %v1096_v39 = vadd.f32 %v1095_v57, %v1094_v53  ;;  %v1064_v34 = vmax.f32 %v6686_v6, 0.0  ;;  %v1103_v17 = vsel %vm1085_vm9, %v10452_v56, 0.0  ;;  %v1105_v18 = vsel %vm1085_vm9, %v10451_v52, 0.0 }
 0x130   :  { %v911_v47 = vadd.f32 %v856_v4, %v6542_v1  ;;  %v912_v0 = vadd.f32 %v6538_v62, %v856_v4  ;;  %v6810_v57 = vadd.f32 %v6622_v44, %v908_v35  ;;  %v6813_v40 = vadd.f32 %v6629_v50, %v907_v2 }
 0x131   :  { %v1098_v5 = vadd.f32 %v1097_v59, %v1096_v39  ;;  %v1065_v59 = vmax.f32 %v6713_v37, 0.0  ;;  %v1068_v2 = vmax.f32 %v6791_v43, 0.0  ;;  %v1077_v11 = vmax.f32 %v6742_v60, 0.0 }
 0x132   :  { %v6820_v39 = vadd.f32 %v6629_v50, %v911_v47  ;;  %v6823_v1 = vadd.f32 %v6622_v44, %v912_v0  ;;  %v1067_v50 = vmax.f32 %v6785_v49, 0.0  ;;  %v1069_v47 = vmax.f32 %v6794_v22, 0.0 }
 0x133   :  { %v1100_v53 = vadd.f32 %v1099_v21, %v1098_v5  ;;  %v1066_v21 = vmax.f32 %v6778_v27, 0.0  ;;  %v1107_v5 = vsel %vm1085_vm9, %v1064_v34, 0.0  ;;  %v1109_v44 = vsel %vm1085_vm9, %v1065_v59, 0.0 }
 0x134   :  { %v1113_v0 = vsel %vm1085_vm9, %v1067_v50, 0.0  ;;  %v1075_v52 = vmax.f32 %v6820_v39, 0.0  ;;  %v1076_v56 = vmax.f32 %v6823_v1, 0.0  ;;  %v1078_v19 = vmax.f32 %v6729_v9, 0.0 }
 0x135   :  { %v1102_v8 = vadd.f32 %v1101_v54, %v1100_v53  ;;  %v1111_v53 = vsel %vm1085_vm9, %v1066_v21, 0.0  ;;  %v1133_v1 = vsel %vm1085_vm9, %v1077_v11, 0.0  ;;  %v10459_v20 = vmax.f32 %v6732_v38, 0.0 }
 0x136   :  { %v1131_v42 = vsel %vm1085_vm9, %v1076_v56, 0.0  ;;  %v10664_v26 = vmax.f32 %v6701_v31, 0.0  ;;  %v10666_v31 = vmax.f32 %v6704_v48, 0.0  ;;  %v10668_v48 = vmax.f32 %v6707_v33, 0.0 }
 0x137   :  { %v1104_v62 = vadd.f32 %v1103_v17, %v1102_v8  ;;  %v1070_v17 = vmax.f32 %v6770_v14, 0.0  ;;  %v10670_v33 = vmax.f32 %v6710_v25, 0.0 }
 0x139   :  { %v1106_v16 = vadd.f32 %v1105_v18, %v1104_v62  ;;  %v1115_v62 = vsel %vm1085_vm9, %v1068_v2, 0.0 }
 0x13b   :  { %v1108_v4 = vadd.f32 %v1107_v5, %v1106_v16  ;;  %v1071_v16 = vmax.f32 %v6813_v40, 0.0  ;;  %v1117_v5 = vsel %vm1085_vm9, %v1069_v47, 0.0 }
 0x13d   :  { %v1110_v35 = vadd.f32 %v1109_v44, %v1108_v4  ;;  %v1072_v44 = vmax.f32 %v6810_v57, 0.0 }
 0x13f   :  { %v1112_v54 = vadd.f32 %v1111_v53, %v1110_v35  ;;  %v1119_v35 = vsel %vm1085_vm9, %v1070_v17, 0.0 }
 0x141   :  { %v1114_v8 = vadd.f32 %v1113_v0, %v1112_v54  ;;  %v1073_v54 = vmax.f32 %v6801_v58, 0.0  ;;  %v1121_v0 = vsel %vm1085_vm9, %v1071_v16, 0.0 }
 0x143   :  { %v1116_v18 = vadd.f32 %v1115_v62, %v1114_v8  ;;  %v1074_v62 = vmax.f32 %v6775_v41, 0.0 }
 0x145   :  { %v1118_v4 = vadd.f32 %v1117_v5, %v1116_v18  ;;  %v1123_v18 = vsel %vm1085_vm9, %v1072_v44, 0.0 }
 0x147   :  { %v1120_v53 = vadd.f32 %v1119_v35, %v1118_v4  ;;  %v1125_v4 = vsel %vm1085_vm9, %v1073_v54, 0.0 }
 0x149   :  { %v1122_v8 = vadd.f32 %v1121_v0, %v1120_v53  ;;  %v1127_v53 = vsel %vm1085_vm9, %v1074_v62, 0.0 }
 0x14b   :  { %v1124_v5 = vadd.f32 %v1123_v18, %v1122_v8  ;;  %v1129_v8 = vsel %vm1085_vm9, %v1075_v52, 0.0 }
 0x14d   :  { %v1126_v35 = vadd.f32 %v1125_v4, %v1124_v5  ;;  %v10458_v5 = vmax.f32 %v6750_v23, 0.0 }
 0x14f   :  { %v1128_v0 = vadd.f32 %v1127_v53, %v1126_v35  ;;  %v1135_v35 = vsel %vm1085_vm9, %v1078_v19, 0.0  ;;  %v10462_v53 = vmax.f32 %v6754_v7, 0.0 }
 0x151   :  { %v1130_v18 = vadd.f32 %v1129_v8, %v1128_v0  ;;  %v1137_v0 = vsel %vm1085_vm9, %v10458_v5, 0.0  ;;  %v10460_v8 = vmax.f32 %v6735_v61, 0.0 }
 0x153   :  { %v1132_v32 = vadd.f32 %v1131_v42, %v1130_v18  ;;  %v1139_v42 = vsel %vm1085_vm9, %v10459_v20, 0.0 }
 0x155   :  { %v1134_v4 = vadd.f32 %v1133_v1, %v1132_v32  ;;  %v10461_v32 = vmax.f32 %v6757_v13, 0.0  ;;  %v1141_v1 = vsel %vm1085_vm9, %v10462_v53, 0.0 }
 0x157   :  { %v1136_v60 = vadd.f32 %v1135_v35, %v1134_v4  ;;  %v10465_v35 = vmax.f32 %v6738_v28, 0.0  ;;  %v1145_v5 = vsel %vm1085_vm9, %v10461_v32, 0.0 }
 0x159   :  { %v1138_v9 = vadd.f32 %v1137_v0, %v1136_v60  ;;  %v1143_v60 = vsel %vm1085_vm9, %v10460_v8, 0.0 }
 0x15b   :  { %v1140_v18 = vadd.f32 %v1139_v42, %v1138_v9  ;;  %v1325_v9 = vld [vmem:[%s10444_s4] sm:$0xff]  ;;  %v1326_v42 = vld [vmem:[%s10444_s4 + $0x8] sm:$0xff] }
 0x15d   :  { %v1142_v4 = vadd.f32 %v1141_v1, %v1140_v18  ;;  %v1147_v18 = vsel %vm1085_vm9, %v10465_v35, 0.0  ;;  %v5974_v1 = vpack.c.bf16 %v1326_v42, %v1325_v9  ;;  %v1328_v35 = vld [vmem:[%s10445_s5 + $0x8] sm:$0xff] }
 0x15e   :  { %v5978_v9 = vpack.c.bf16 %v1328_v35, %v1327_v36 }
 0x15f   :  { %v1144_v0 = vadd.f32 %v1143_v60, %v1142_v4  ;;  %5975 = vmatprep.subr.bf16.mxu1 %v5974_v1 }
 0x160   :  { %5977 = vmatpush3.bf16.msra.mxu1 %v5974_v1  ;;  %5979 = vmatprep.subr.bf16.mxu0 %v5978_v9 }
 0x161   :  { %v1146_v20 = vadd.f32 %v1145_v5, %v1144_v0  ;;  %5981 = vmatpush3.bf16.msra.mxu0 %v5978_v9 }
 0x163   :  { %v1148_v8 = vadd.f32 %v1147_v18, %v1146_v20 }
 0x165   :  { %v1149_v4 = vrot.slane %v1148_v8, 4 }
 0x167   :  { %v1150_v60 = vadd.f32 %v1149_v4, %v1148_v8 }
 0x169   :  { %v1151_v32 = vrot.slane %v1150_v60, 2 }
 0x16b   :  { %v1152_v5 = vadd.f32 %v1151_v32, %v1150_v60 }
 0x16d   :  { %v1153_v0 = vrot.slane %v1152_v5, 1 }
 0x16f   :  { %v1154_v53 = vadd.f32 %v1153_v0, %v1152_v5 }
 0x171   :  { %v6911_v63 = vmul.f32 0.00390625, %v1154_v53 }
 0x173   :  { %v6922_v20 = vsub.f32 %v1064_v34, %v6911_v63  ;;  %v6927_v53 = vsub.f32 %v1065_v59, %v6911_v63  ;;  %v6932_v8 = vsub.f32 %v1066_v21, %v6911_v63  ;;  %v6937_v36 = vsub.f32 %v1067_v50, %v6911_v63 }
 0x174   :  { %v6942_v6 = vsub.f32 %v1068_v2, %v6911_v63  ;;  %v6947_v37 = vsub.f32 %v1069_v47, %v6911_v63  ;;  %v6952_v27 = vsub.f32 %v1070_v17, %v6911_v63  ;;  %v6957_v49 = vsub.f32 %v1071_v16, %v6911_v63 }
 0x175   :  { %v6962_v43 = vsub.f32 %v1072_v44, %v6911_v63  ;;  %v6967_v22 = vsub.f32 %v1073_v54, %v6911_v63  ;;  %v6972_v14 = vsub.f32 %v1074_v62, %v6911_v63  ;;  %v6977_v40 = vsub.f32 %v1075_v52, %v6911_v63 }
 0x176   :  { %v6980_v34 = vsub.f32 %v1076_v56, %v6911_v63  ;;  %v6983_v57 = vsub.f32 %v1077_v11, %v6911_v63  ;;  %v6986_v58 = vsub.f32 %v1078_v19, %v6911_v63  ;;  %v6991_v41 = vsub.f32 %v1053_v55, %v6911_v63 }
 0x177   :  { %v6996_v39 = vsub.f32 %v1054_v24, %v6911_v63  ;;  %v10662_v56 = vmax.f32 %v6698_v29, 0.0  ;;  %v10663_v11 = vmax.f32 %v6665_v51, 0.0  ;;  %v7015_v24 = vsub.f32 %v10664_v26, %v6911_v63 }
 0x178   :  { %v1189_v12 = vmul.f32 %v6991_v41, %v6991_v41  ;;  %v10665_v59 = vmax.f32 %v6668_v3, 0.0  ;;  %v7031_v17 = vsub.f32 %v10666_v31, %v6911_v63  ;;  %v10667_v54 = vmax.f32 %v6671_v15, 0.0 }
 0x179   :  { %v7001_v52 = vsub.f32 %v10662_v56, %v6911_v63  ;;  %v7006_v19 = vsub.f32 %v10663_v11, %v6911_v63  ;;  %v1190_v55 = vmul.f32 %v6996_v39, %v6996_v39  ;;  %v1193_v16 = vmul.f32 %v7015_v24, %v7015_v24 }
 0x17a   :  { %v7022_v51 = vsub.f32 %v10665_v59, %v6911_v63  ;;  %v1221_v50 = vsel %vm1085_vm9, %v1189_v12, 0.0  ;;  %v7039_v62 = vsub.f32 %v10667_v54, %v6911_v63  ;;  %v7047_v18 = vsub.f32 %v10668_v48, %v6911_v63 }
 0x17b   :  { %v1191_v29 = vmul.f32 %v7001_v52, %v7001_v52  ;;  %v1192_v21 = vmul.f32 %v7006_v19, %v7006_v19  ;;  %v1222_v2 = vsel %vm1085_vm9, %v1190_v55, 0.0  ;;  %v1195_v1 = vmul.f32 %v7031_v17, %v7031_v17 }
 0x17c   :  { %v1223_v47 = vadd.f32 %v1222_v2, %v1221_v50  ;;  %v1194_v32 = vmul.f32 %v7022_v51, %v7022_v51  ;;  %v1228_v4 = vsel %vm1085_vm9, %v1193_v16, 0.0  ;;  %v10669_v15 = vmax.f32 %v6676_v10, 0.0 }
 0x17d   :  { %v1224_v3 = vsel %vm1085_vm9, %v1191_v29, 0.0  ;;  %v1226_v35 = vsel %vm1085_vm9, %v1192_v21, 0.0  ;;  %v1196_v0 = vmul.f32 %v7039_v62, %v7039_v62  ;;  %v7063_v11 = vsub.f32 %v10670_v33, %v6911_v63  ;;  %v1330_v33 = vld [vmem:[%s10446_s6 + $0x8] sm:$0xff] }
 0x17e   :  { %v1225_v44 = vadd.f32 %v1224_v3, %v1223_v47  ;;  %v7055_v5 = vsub.f32 %v10669_v15, %v6911_v63  ;;  %v1230_v9 = vsel %vm1085_vm9, %v1194_v32, 0.0  ;;  %v1197_v12 = vmul.f32 %v7047_v18, %v7047_v18 }
 0x17f   :  { %v1232_v55 = vsel %vm1085_vm9, %v1195_v1, 0.0  ;;  %v1234_v29 = vsel %vm1085_vm9, %v1196_v0, 0.0  ;;  %v1199_v21 = vmul.f32 %v7063_v11, %v7063_v11  ;;  %v1200_v2 = vmul.f32 %v6922_v20, %v6922_v20 }
 0x180   :  { %v1227_v42 = vadd.f32 %v1226_v35, %v1225_v44  ;;  %v1198_v10 = vmul.f32 %v7055_v5, %v7055_v5  ;;  %v1236_v50 = vsel %vm1085_vm9, %v1197_v12, 0.0  ;;  %v1201_v16 = vmul.f32 %v6927_v53, %v6927_v53 }
 0x181   :  { %v1240_v3 = vsel %vm1085_vm9, %v1199_v21, 0.0  ;;  %v1202_v54 = vmul.f32 %v6932_v8, %v6932_v8  ;;  %v1242_v32 = vsel %vm1085_vm9, %v1200_v2, 0.0  ;;  %v1205_v0 = vmul.f32 %v6947_v37, %v6947_v37 }
 0x182   :  { %v1229_v60 = vadd.f32 %v1228_v4, %v1227_v42  ;;  %v1238_v47 = vsel %vm1085_vm9, %v1198_v10, 0.0  ;;  %v1203_v42 = vmul.f32 %v6937_v36, %v6937_v36  ;;  %v1244_v48 = vsel %vm1085_vm9, %v1201_v16, 0.0 }
 0x183   :  { %v1204_v4 = vmul.f32 %v6942_v6, %v6942_v6  ;;  %v1252_v21 = vsel %vm1085_vm9, %v1205_v0, 0.0 }
 0x184   :  { %v1231_v56 = vadd.f32 %v1230_v9, %v1229_v60  ;;  %v1246_v60 = vsel %vm1085_vm9, %v1202_v54, 0.0  ;;  %v1248_v9 = vsel %vm1085_vm9, %v1203_v42, 0.0 }
 0x185   :  { %v1250_v10 = vsel %vm1085_vm9, %v1204_v4, 0.0 }
 0x186   :  { %v1233_v26 = vadd.f32 %v1232_v55, %v1231_v56  ;;  %v1329_v56 = vld [vmem:[%s10446_s6] sm:$0xff]  ;;  %s6160_s6 = smov 124  }
 0x187   :  { %v7098_v55 = vpack.c.bf16 %v1330_v33, %v1329_v56 }
 0x188   :  { %v1235_v59 = vadd.f32 %v1234_v29, %v1233_v26  ;;  %v1206_v26 = vmul.f32 %v6952_v27, %v6952_v27 }
 0x189   :  { %5983 = vmatprep.subr.bf16.mxu0 %v7098_v55 }
 0x18a   :  { %v1237_v25 = vadd.f32 %v1236_v50, %v1235_v59  ;;  %v1207_v59 = vmul.f32 %v6957_v49, %v6957_v49  ;;  %v1254_v2 = vsel %vm1085_vm9, %v1206_v26, 0.0 }
 0x18c   :  { %v1239_v31 = vadd.f32 %v1238_v47, %v1237_v25  ;;  %v1208_v25 = vmul.f32 %v6962_v43, %v6962_v43  ;;  %v1256_v16 = vsel %vm1085_vm9, %v1207_v59, 0.0 }
 0x18e   :  { %v1241_v44 = vadd.f32 %v1240_v3, %v1239_v31  ;;  %v1209_v31 = vmul.f32 %v6967_v22, %v6967_v22  ;;  %v1258_v54 = vsel %vm1085_vm9, %v1208_v25, 0.0 }
 0x190   :  { %v1243_v35 = vadd.f32 %v1242_v32, %v1241_v44  ;;  %v1210_v44 = vmul.f32 %v6972_v14, %v6972_v14  ;;  %v1260_v42 = vsel %vm1085_vm9, %v1209_v31, 0.0 }
 0x192   :  { %v1245_v1 = vadd.f32 %v1244_v48, %v1243_v35  ;;  %v1211_v35 = vmul.f32 %v6977_v40, %v6977_v40  ;;  %v1262_v4 = vsel %vm1085_vm9, %v1210_v44, 0.0 }
 0x194   :  { %v1247_v15 = vadd.f32 %v1246_v60, %v1245_v1  ;;  %v1212_v1 = vmul.f32 %v6980_v34, %v6980_v34  ;;  %v1264_v56 = vsel %vm1085_vm9, %v1211_v35, 0.0 }
 0x196   :  { %v1249_v12 = vadd.f32 %v1248_v9, %v1247_v15  ;;  %v10671_v15 = vmax.f32 %v6750_v23, 0.0  ;;  %v1213_v9 = vmul.f32 %v6983_v57, %v6983_v57  ;;  %v10673_v23 = vmax.f32 %v6754_v7, 0.0 }
 0x197   :  { %v10675_v7 = vmax.f32 %v6757_v13, 0.0 }
 0x198   :  { %v1251_v29 = vadd.f32 %v1250_v10, %v1249_v12  ;;  %v7125_v0 = vsub.f32 %v10671_v15, %v6911_v63  ;;  %v10672_v12 = vmax.f32 %v6732_v38, 0.0  ;;  %v1214_v10 = vmul.f32 %v6986_v58, %v6986_v58 }
 0x199   :  { %v1268_v25 = vsel %vm1085_vm9, %v1213_v9, 0.0  ;;  %v10674_v38 = vmax.f32 %v6735_v61, 0.0  ;;  %v7157_v44 = vsub.f32 %v10675_v7, %v6911_v63  ;;  %v10676_v61 = vmax.f32 %v6738_v28, 0.0 }
 0x19a   :  { %v1253_v50 = vadd.f32 %v1252_v21, %v1251_v29  ;;  %v7133_v26 = vsub.f32 %v10672_v12, %v6911_v63  ;;  %v1266_v29 = vsel %vm1085_vm9, %v1212_v1, 0.0  ;;  %v7141_v21 = vsub.f32 %v10673_v23, %v6911_v63 }
 0x19b   :  { %v1219_v13 = vmul.f32 %v7157_v44, %v7157_v44 }
 0x19c   :  { %v1255_v47 = vadd.f32 %v1254_v2, %v1253_v50  ;;  %v1215_v50 = vmul.f32 %v7125_v0, %v7125_v0  ;;  %v1216_v31 = vmul.f32 %v7133_v26, %v7133_v26 }
 0x19e   :  { %v1257_v3 = vadd.f32 %v1256_v16, %v1255_v47  ;;  %v7149_v47 = vsub.f32 %v10674_v38, %v6911_v63  ;;  %v1270_v16 = vsel %vm1085_vm9, %v1214_v10, 0.0  ;;  %v1274_v1 = vsel %vm1085_vm9, %v1216_v31, 0.0 }
 0x1a0   :  { %v1259_v32 = vadd.f32 %v1258_v54, %v1257_v3  ;;  %v1217_v54 = vmul.f32 %v7141_v21, %v7141_v21 }
 0x1a2   :  { %v1261_v48 = vadd.f32 %v1260_v42, %v1259_v32  ;;  %v1272_v32 = vsel %vm1085_vm9, %v1215_v50, 0.0  ;;  %v7165_v42 = vsub.f32 %v10676_v61, %v6911_v63  ;;  %v1280_v63 = vsel %vm1085_vm9, %v1219_v13, 0.0 }
 0x1a4   :  { %v1263_v60 = vadd.f32 %v1262_v4, %v1261_v48  ;;  %v1218_v48 = vmul.f32 %v7149_v47, %v7149_v47  ;;  %v1220_v9 = vmul.f32 %v7165_v42, %v7165_v42 }
 0x1a6   :  { %v1265_v33 = vadd.f32 %v1264_v56, %v1263_v60  ;;  %v1276_v60 = vsel %vm1085_vm9, %v1217_v54, 0.0  ;;  %v1278_v56 = vsel %vm1085_vm9, %v1218_v48, 0.0  ;;  %v1282_v12 = vsel %vm1085_vm9, %v1220_v9, 0.0 }
 0x1a8   :  { %v1267_v59 = vadd.f32 %v1266_v29, %v1265_v33 }
 0x1aa   :  { %v1269_v2 = vadd.f32 %v1268_v25, %v1267_v59 }
 0x1ac   :  { %v1271_v3 = vadd.f32 %v1270_v16, %v1269_v2 }
 0x1ae   :  { %v1273_v35 = vadd.f32 %v1272_v32, %v1271_v3 }
 0x1b0   :  { %v1275_v4 = vadd.f32 %v1274_v1, %v1273_v35 }
 0x1b2   :  { %v1277_v15 = vadd.f32 %v1276_v60, %v1275_v4 }
 0x1b4   :  { %v1279_v28 = vadd.f32 %v1278_v56, %v1277_v15 }
 0x1b6   :  { %v1281_v33 = vadd.f32 %v1280_v63, %v1279_v28 }
 0x1b8   :  { %v1283_v10 = vadd.f32 %v1282_v12, %v1281_v33 }
 0x1ba   :  { %v1284_v29 = vrot.slane %v1283_v10, 4 }
 0x1bc   :  { %v1285_v59 = vadd.f32 %v1284_v29, %v1283_v10 }
 0x1be   :  { %v1286_v23 = vrot.slane %v1285_v59, 2 }
 0x1c0   :  { %v1287_v50 = vadd.f32 %v1286_v23, %v1285_v59 }
 0x1c2   :  { %v1288_v25 = vrot.slane %v1287_v50, 1 }
 0x1c4   :  { %v1289_v2 = vadd.f32 %v1288_v25, %v1287_v50 }
 0x1c6   :  { %v1290_v38 = vmul.f32 0.00390625, %v1289_v2 }
 0x1c8   :  { %v1291_v31 = vadd.f32 1e-05, %v1290_v38 }
 0x1ca   :  { %6133 = vrsqrt.f32 %v1291_v31 }
 0x1d4   :  { %v7178_v16 = vpop.eup %6133 }
 0x1d5   :  { %v7182_v3 = vmul.f32 %v7178_v16, %v6947_v37  ;;  %v7186_v7 = vmul.f32 %v7178_v16, %v6952_v27  ;;  %v7190_v54 = vmul.f32 %v7178_v16, %v6957_v49  ;;  %v7194_v32 = vmul.f32 %v7178_v16, %v6962_v43 }
 0x1d6   :  { %v7198_v35 = vmul.f32 %v7178_v16, %v6967_v22  ;;  %v7202_v37 = vmul.f32 %v7178_v16, %v6972_v14  ;;  %v7206_v27 = vmul.f32 %v7178_v16, %v6977_v40  ;;  %v7210_v49 = vmul.f32 %v7178_v16, %v6980_v34 }
 0x1d7   :  { %v1403_v43 = vsel %vm1085_vm9, %v7182_v3, 0.0  ;;  %v1404_v61 = vsel %vm1085_vm9, %v7186_v7, 0.0  ;;  %v1412_v22 = vsel %vm1085_vm9, %v7190_v54, 0.0  ;;  %v1413_v14 = vsel %vm1085_vm9, %v7194_v32, 0.0 }
 0x1d8   :  { %v1405_v48 = vadd.f32 %v1404_v61, %v1403_v43  ;;  %v1414_v1 = vadd.f32 %v1413_v14, %v1412_v22  ;;  %v1421_v40 = vsel %vm1085_vm9, %v7198_v35, 0.0  ;;  %v1422_v34 = vsel %vm1085_vm9, %v7202_v37, 0.0 }
 0x1d9   :  { %v1423_v4 = vadd.f32 %v1422_v34, %v1421_v40  ;;  %v1430_v13 = vsel %vm1085_vm9, %v7206_v27, 0.0  ;;  %v7228_v60 = vsel %vm1085_vm9, %v7210_v49, 0.0  ;;  %v1505_v15 = vadd.f32 %v1412_v22, %v1403_v43 }
 0x1da   :  { %v1406_v9 = vrot.slane %v1405_v48, 4  ;;  %v1415_v56 = vrot.slane %v1414_v1, 4  ;;  %v1432_v28 = vadd.f32 %v7228_v60, %v1430_v13  ;;  %v7233_v23 = vmul.f32 %v7178_v16, %v6983_v57 }
 0x1db   :  { %v1424_v63 = vrot.slane %v1423_v4, 4  ;;  %v1506_v33 = vadd.f32 %v1505_v15, %v1421_v40  ;;  %v7237_v50 = vmul.f32 %v7178_v16, %v6986_v58  ;;  %v7241_v31 = vmul.f32 %v7178_v16, %v7125_v0 }
 0x1dc   :  { %v1407_v12 = vadd.f32 %v1406_v9, %v1405_v48  ;;  %v1416_v10 = vadd.f32 %v1415_v56, %v1414_v1  ;;  %v1433_v29 = vrot.slane %v1432_v28, 4  ;;  %v7247_v48 = vmul.f32 %v7178_v16, %v7133_v26 }
 0x1dd   :  { %v1425_v59 = vadd.f32 %v1424_v63, %v1423_v4  ;;  %v7243_v22 = vadd.f32 %v1506_v33, %v1430_v13  ;;  %v1293_v57 = vmul.f32 %v7178_v16, %v6991_v41  ;;  %v7253_v4 = vmul.f32 %v7178_v16, %v7141_v21 }
 0x1de   :  { %v1408_v25 = vrot.slane %v1407_v12, 2  ;;  %v1417_v2 = vrot.slane %v1416_v10, 2  ;;  %v1434_v38 = vadd.f32 %v1433_v29, %v1432_v28  ;;  %v1294_v0 = vmul.f32 %v7178_v16, %v6996_v39 }
 0x1df   :  { %v1426_v43 = vrot.slane %v1425_v59, 2  ;;  %v1331_v13 = vsel %vm1085_vm9, %v1293_v57, 0.0  ;;  %5828 = vmatprep.mubr.msk.f32.mxu1 %vm1085_vm9, %v1293_v57  ;;  %v1295_v26 = vmul.f32 %v7178_v16, %v7001_v52  ;;  %v1512_v28 = vadd.f32 %v1413_v14, %v1404_v61 }
 0x1e0   :  { %v1409_v1 = vadd.f32 %v1408_v25, %v1407_v12  ;;  %v1418_v58 = vadd.f32 %v1417_v2, %v1416_v10  ;;  %v1435_v40 = vrot.slane %v1434_v38, 2  ;;  %v1332_v33 = vsel %vm1085_vm9, %v1294_v0, 0.0  ;;  %5829 = vmatmul.mubr.msk.f32.vlgmr.msra.gmra.mrb[18].mxu1 %vm1085_vm9, %v1294_v0 }
 0x1e1   :  { %v1427_v15 = vadd.f32 %v1426_v43, %v1425_v59  ;;  %v1340_v21 = vsel %vm1085_vm9, %v1295_v26, 0.0  ;;  %v1296_v39 = vmul.f32 %v7178_v16, %v7006_v19  ;;  %v1333_v59 = vadd.f32 %v1332_v33, %v1331_v13  ;;  %5831 = vmatprep.mubr.msk.f32.mxu1 %vm1085_vm9, %v1295_v26 }
 0x1e2   :  { %v1410_v9 = vrot.slane %v1409_v1, 1  ;;  %v1419_v41 = vrot.slane %v1418_v58, 1  ;;  %v1436_v56 = vadd.f32 %v1435_v40, %v1434_v38  ;;  %v7269_v52 = vmul.f32 %v7178_v16, %v7149_v47 }
 0x1e3   :  { %v1428_v63 = vrot.slane %v1427_v15, 1  ;;  %v7273_v61 = vsel %vm1085_vm9, %v7233_v23, 0.0  ;;  %v1341_v14 = vsel %vm1085_vm9, %v1296_v39, 0.0  ;;  %v1297_v25 = vmul.f32 %v7178_v16, %v7015_v24 }
 0x1e4   :  { %v1411_v12 = vadd.f32 %v1410_v9, %v1409_v1  ;;  %v1420_v10 = vadd.f32 %v1419_v41, %v1418_v58  ;;  %v1437_v29 = vrot.slane %v1436_v56, 1  ;;  %v7280_v2 = vsel %vm1085_vm9, %v7237_v50, 0.0  ;;  %5832 = vmatmul.mubr.msk.f32.gmra.mrb[20].mxu1 %vm1085_vm9, %v1296_v39 }
 0x1e5   :  { %v1429_v19 = vadd.f32 %v1428_v63, %v1427_v15  ;;  %v7282_v38 = vadd.f32 %v1512_v28, %v1422_v34  ;;  %v1334_v43 = vrot.slane %v1333_v59, 4  ;;  %v1491_v1 = vadd.f32 %v1340_v21, %v1331_v13  ;;  %5834 = vmatprep.mubr.msk.f32.mxu1 %vm1085_vm9, %v1297_v25 }
 0x1e6   :  { %v7284_v57 = vadd.f32 %v1437_v29, %v1436_v56  ;;  %v1483_v47 = vmul.f32 0.0625, %v1411_v12  ;;  %v1342_v58 = vadd.f32 %v1341_v14, %v1340_v21  ;;  %v1484_v40 = vmul.f32 0.0625, %v1420_v10 }
 0x1e7   :  { %v1335_v0 = vadd.f32 %v1334_v43, %v1333_v59  ;;  %v1349_v26 = vsel %vm1085_vm9, %v1297_v25, 0.0  ;;  %v1298_v24 = vmul.f32 %v7178_v16, %v7022_v51  ;;  %v1299_v34 = vmul.f32 %v7178_v16, %v7031_v17 }
 0x1e8   :  { %v1343_v15 = vrot.slane %v1342_v58, 4  ;;  %v1300_v9 = vmul.f32 %v7178_v16, %v7039_v62  ;;  %v1301_v13 = vmul.f32 %v7178_v16, %v7047_v18  ;;  %v1498_v56 = vadd.f32 %v1341_v14, %v1332_v33 }
 0x1e9   :  { %v1336_v41 = vrot.slane %v1335_v0, 2  ;;  %v1350_v28 = vsel %vm1085_vm9, %v1298_v24, 0.0  ;;  %v1302_v63 = vmul.f32 %v7178_v16, %v7055_v5  ;;  %v1492_v39 = vadd.f32 %v1491_v1, %v1349_v26  ;;  %5835 = vmatmul.mubr.msk.f32.gmra.mrb[22].mxu1 %vm1085_vm9, %v1298_v24 }
 0x1ea   :  { %v1344_v21 = vadd.f32 %v1343_v15, %v1342_v58  ;;  %v1351_v51 = vadd.f32 %v1350_v28, %v1349_v26  ;;  %v1358_v17 = vsel %vm1085_vm9, %v1299_v34, 0.0  ;;  %5837 = vmatprep.mubr.msk.f32.mxu1 %vm1085_vm9, %v1299_v34  ;;  %v1359_v62 = vsel %vm1085_vm9, %v1300_v9, 0.0 }
 0x1eb   :  { %v1337_v12 = vadd.f32 %v1336_v41, %v1335_v0  ;;  %v1367_v18 = vsel %vm1085_vm9, %v1301_v13, 0.0  ;;  %v1303_v33 = vmul.f32 %v7178_v16, %v7063_v11  ;;  %v7307_v10 = vmul.f32 0.0625, %v1429_v19 }
 0x1ec   :  { %v1345_v5 = vrot.slane %v1344_v21, 2  ;;  %v1352_v29 = vrot.slane %v1351_v51, 4  ;;  %v1360_v59 = vadd.f32 %v1359_v62, %v1358_v17  ;;  %v7310_v14 = vsel %vm606_vm2, %v1484_v40, %v1483_v47 }
 0x1ed   :  { %v1338_v25 = vrot.slane %v1337_v12, 1  ;;  %v1499_v43 = vadd.f32 %v1498_v56, %v1350_v28  ;;  %v7313_v1 = vsel %vm1085_vm9, %v1302_v63, 0.0  ;;  %5838 = vmatmul.mubr.msk.f32.gmra.mrb[24].mxu1 %vm1085_vm9, %v1300_v9  ;;  %v1493_v24 = vadd.f32 %v1492_v39, %v1358_v17 }
 0x1ee   :  { %v1346_v58 = vadd.f32 %v1345_v5, %v1344_v21  ;;  %v1353_v0 = vadd.f32 %v1352_v29, %v1351_v51  ;;  %v1361_v26 = vrot.slane %v1360_v59, 4  ;;  %v1369_v11 = vadd.f32 %v7313_v1, %v1367_v18  ;;  %5840 = vmatprep.mubr.msk.f32.mxu1 %vm1085_vm9, %v1301_v13 }
 0x1ef   :  { %v1339_v19 = vadd.f32 %v1338_v25, %v1337_v12  ;;  %v7319_v15 = vsel %vm1085_vm9, %v1303_v33, 0.0  ;;  %v1304_v47 = vmul.f32 %v7178_v16, %v6922_v20  ;;  %v7323_v28 = vadd.f32 %v1499_v43, %v1359_v62 }
 0x1f0   :  { %v1347_v40 = vrot.slane %v1346_v58, 1  ;;  %v1354_v34 = vrot.slane %v1353_v0, 2  ;;  %v1362_v41 = vadd.f32 %v1361_v26, %v1360_v59  ;;  %v1370_v56 = vrot.slane %v1369_v11, 4 }
 0x1f1   :  { %v7326_v9 = vsel %vm1085_vm9, %v1304_v47, 0.0  ;;  %v1305_v21 = vmul.f32 %v7178_v16, %v6927_v53  ;;  %v1306_v13 = vmul.f32 %v7178_v16, %v6932_v8  ;;  %5841 = vmatmul.mubr.msk.f32.gmra.mrb[26].mxu1 %vm1085_vm9, %v1302_v63  ;;  %v1475_v20 = vmul.f32 0.0625, %v1339_v19 }
 0x1f2   :  { %v1348_v39 = vadd.f32 %v1347_v40, %v1346_v58  ;;  %v1355_v51 = vadd.f32 %v1354_v34, %v1353_v0  ;;  %v1363_v17 = vrot.slane %v1362_v41, 2  ;;  %v1371_v12 = vadd.f32 %v1370_v56, %v1369_v11  ;;  %5843 = vmatprep.mubr.msk.f32.mxu1 %vm1085_vm9, %v1303_v33 }
 0x1f3   :  { %v1378_v62 = vadd.f32 %v7326_v9, %v7319_v15  ;;  %v7337_v5 = vsel %vm1085_vm9, %v1305_v21, 0.0  ;;  %v7340_v53 = vsel %vm1085_vm9, %v1306_v13, 0.0  ;;  %v7342_v43 = vadd.f32 %v1493_v24, %v1367_v18 }
 0x1f4   :  { %v1476_v29 = vmul.f32 0.0625, %v1348_v39  ;;  %v1356_v8 = vrot.slane %v1355_v51, 1  ;;  %v1364_v59 = vadd.f32 %v1363_v17, %v1362_v41  ;;  %v1372_v25 = vrot.slane %v1371_v12, 2 }
 0x1f5   :  { %v1379_v58 = vrot.slane %v1378_v62, 4  ;;  %v1387_v63 = vadd.f32 %v7340_v53, %v7337_v5  ;;  %v1307_v33 = vmul.f32 %v7178_v16, %v6937_v36  ;;  %5844 = vmatmul.mubr.msk.f32.gmra.mrb[28].mxu1 %vm1085_vm9, %v1304_v47  ;;  %v1308_v19 = vmul.f32 %v7178_v16, %v6942_v6 }
 0x1f6   :  { %v1357_v0 = vadd.f32 %v1356_v8, %v1355_v51  ;;  %v1365_v26 = vrot.slane %v1364_v59, 1  ;;  %v1373_v11 = vadd.f32 %v1372_v25, %v1371_v12  ;;  %5846 = vmatprep.mubr.msk.f32.mxu1 %vm1085_vm9, %v1305_v21  ;;  %v1860_v24 = vsel %vm606_vm2, %v1476_v29, %v1475_v20 }
 0x1f7   :  { %v1380_v40 = vadd.f32 %v1379_v58, %v1378_v62  ;;  %v1388_v34 = vrot.slane %v1387_v63, 4  ;;  %v7353_v18 = vsel %vm1085_vm9, %v1307_v33, 0.0  ;;  %v7357_v39 = vsel %vm1085_vm9, %v1308_v19, 0.0 }
 0x1f8   :  { %v1477_v41 = vmul.f32 0.0625, %v1357_v0  ;;  %v1366_v56 = vadd.f32 %v1365_v26, %v1364_v59  ;;  %v1374_v36 = vrot.slane %v1373_v11, 1  ;;  %v1396_v6 = vadd.f32 %v7357_v39, %v7353_v18 }
 0x1f9   :  { %v1381_v51 = vrot.slane %v1380_v40, 2  ;;  %v1389_v47 = vadd.f32 %v1388_v34, %v1387_v63  ;;  %v7363_v17 = vmul.f32 %v7178_v16, %v7157_v44  ;;  %5847 = vmatmul.mubr.msk.f32.gmra.mrb[30].mxu1 %vm1085_vm9, %v1306_v13  ;;  %v7369_v20 = vmul.f32 %v7178_v16, %v7165_v42 }
 0x1fa   :  { %v1375_v21 = vadd.f32 %v1374_v36, %v1373_v11  ;;  %v1478_v12 = vmul.f32 0.0625, %v1366_v56  ;;  %v1861_v62 = vsel %vm608_vm3, %v1477_v41, %v1860_v24  ;;  %v1397_v59 = vrot.slane %v1396_v6, 4  ;;  %5849 = vmatprep.mubr.msk.f32.mxu1 %vm1085_vm9, %v1307_v33 }
 0x1fb   :  { %v1382_v29 = vadd.f32 %v1381_v51, %v1380_v40  ;;  %v1390_v8 = vrot.slane %v1389_v47, 2  ;;  %v1441_v25 = vadd.f32 %v7280_v2, %v7273_v61  ;;  %v7377_v63 = vsel %vm1085_vm9, %v7241_v31, 0.0 }
 0x1fc   :  { %v1479_v44 = vmul.f32 0.0625, %v1375_v21  ;;  %v1862_v58 = vsel %vm610_vm4, %v1478_v12, %v1861_v62  ;;  %v7381_v13 = vsel %vm1085_vm9, %v7247_v48, 0.0  ;;  %v1398_v0 = vadd.f32 %v1397_v59, %v1396_v6 }
 0x1fd   :  { %v1383_v42 = vrot.slane %v1382_v29, 1  ;;  %v1391_v16 = vadd.f32 %v1390_v8, %v1389_v47  ;;  %v1442_v26 = vrot.slane %v1441_v25, 4  ;;  %v1450_v33 = vadd.f32 %v7381_v13, %v7377_v63  ;;  %5850 = vmatmul.mubr.msk.f32.gmra.mrb[32].mxu1 %vm1085_vm9, %v1308_v19 }
 0x1fe   :  { %v1863_v11 = vsel %vm612_vm5, %v1479_v44, %v1862_v58  ;;  %v7388_v40 = vsel %vm1085_vm9, %v7253_v4, 0.0  ;;  %v7392_v34 = vsel %vm1085_vm9, %v7269_v52, 0.0  ;;  %v1399_v56 = vrot.slane %v1398_v0, 2  ;;  %5852 = vmatprep.mubr.msk.f32.mxu1 %vm1085_vm9, %v7182_v3 }
 0x1ff   :  { %v1384_v24 = vadd.f32 %v1383_v42, %v1382_v29  ;;  %v1392_v41 = vrot.slane %v1391_v16, 1  ;;  %v1443_v36 = vadd.f32 %v1442_v26, %v1441_v25  ;;  %v1451_v51 = vrot.slane %v1450_v33, 4 }
 0x200   :  { %v1459_v47 = vadd.f32 %v7392_v34, %v7388_v40  ;;  %v7401_v6 = vsel %vm1085_vm9, %v7363_v17, 0.0  ;;  %v7405_v21 = vsel %vm1085_vm9, %v7369_v20, 0.0  ;;  %v1400_v12 = vadd.f32 %v1399_v56, %v1398_v0 }
 0x201   :  { %v1393_v19 = vadd.f32 %v1392_v41, %v1391_v16  ;;  %v1480_v62 = vmul.f32 0.0625, %v1384_v24  ;;  %v1444_v29 = vrot.slane %v1443_v36, 2  ;;  %v1501_v8 = vadd.f32 %v7323_v28, %v7313_v1  ;;  %5853 = vmatmul.mubr.msk.f32.gmra.mrb[34].mxu1 %vm1085_vm9, %v7186_v7 }
 0x202   :  { %v1452_v3 = vadd.f32 %v1451_v51, %v1450_v33  ;;  %v1460_v59 = vrot.slane %v1459_v47, 4  ;;  %v1468_v25 = vadd.f32 %v7405_v21, %v7401_v6  ;;  %v1495_v44 = vadd.f32 %v7342_v43, %v7319_v15  ;;  %5855 = vmatprep.mubr.msk.f32.mxu1 %vm1085_vm9, %v7190_v54 }
 0x203   :  { %v1401_v58 = vrot.slane %v1400_v12, 1  ;;  %v1864_v42 = vsel %vm614_vm6, %v1480_v62, %v1863_v11  ;;  %v1445_v16 = vadd.f32 %v1444_v29, %v1443_v36  ;;  %v1481_v0 = vmul.f32 0.0625, %v1393_v19 }
 0x204   :  { %v1453_v1 = vrot.slane %v1452_v3, 2  ;;  %v1461_v28 = vadd.f32 %v1460_v59, %v1459_v47  ;;  %v1469_v26 = vrot.slane %v1468_v25, 4  ;;  %v1486_v41 = vmul.f32 0.0625, %v7284_v57 }
 0x205   :  { %v1402_v33 = vadd.f32 %v1401_v58, %v1400_v12  ;;  %v1446_v24 = vrot.slane %v1445_v16, 1  ;;  %v1868_v7 = vsel %vm608_vm3, %v7307_v10, %v7310_v14  ;;  %v1865_v15 = vsel %vm616_vm7, %v1481_v0, %v1864_v42  ;;  %5856 = vmatmul.mubr.msk.f32.gmra.mrb[36].mxu1 %vm1085_vm9, %v7194_v32 }
 0x206   :  { %v1454_v43 = vadd.f32 %v1453_v1, %v1452_v3  ;;  %v1462_v11 = vrot.slane %v1461_v28, 2  ;;  %v1470_v56 = vadd.f32 %v1469_v26, %v1468_v25  ;;  %v1514_v54 = vadd.f32 %v7282_v38, %v7228_v60  ;;  %5858 = vmatprep.mubr.msk.f32.mxu1 %vm1085_vm9, %v7198_v35 }
 0x207   :  { %v1482_v36 = vmul.f32 0.0625, %v1402_v33  ;;  %v1447_v51 = vadd.f32 %v1446_v24, %v1445_v16  ;;  %v1508_v57 = vadd.f32 %v7243_v22, %v7273_v61  ;;  %v1869_v19 = vsel %vm610_vm4, %v1486_v41, %v1868_v7 }
 0x208   :  { %v1455_v10 = vrot.slane %v1454_v43, 1  ;;  %v1463_v14 = vadd.f32 %v1462_v11, %v1461_v28  ;;  %v1471_v47 = vrot.slane %v1470_v56, 2  ;;  %v1502_v12 = vadd.f32 %v1501_v8, %v7326_v9 }
 0x209   :  { %v1866_v32 = vsel %vm618_vm8, %v1482_v36, %v1865_v15  ;;  %v1487_v62 = vmul.f32 0.0625, %v1447_v51  ;;  %v1496_v60 = vadd.f32 %v1495_v44, %v7337_v5  ;;  %v1509_v61 = vadd.f32 %v1508_v57, %v7377_v63  ;;  %5859 = vmatmul.mubr.msk.f32.gmra.mrb[38].mxu1 %vm1085_vm9, %v7202_v37 }
 0x20a   :  { %5880 = vmatprep.mubr.msk.f32.mxu0 %vm1085_vm9, %v1866_v32  ;;  %v1456_v38 = vadd.f32 %v1455_v10, %v1454_v43  ;;  %v1464_v29 = vrot.slane %v1463_v14, 1  ;;  %v1472_v22 = vadd.f32 %v1471_v47, %v1470_v56  ;;  %v1515_v3 = vadd.f32 %v1514_v54, %v7280_v2  ;;  %5861 = vmatprep.mubr.msk.f32.mxu1 %vm1085_vm9, %v7206_v27 }
 0x20b   :  { %v1870_v35 = vsel %vm612_vm5, %v1487_v62, %v1869_v19  ;;  %v1503_v59 = vadd.f32 %v1502_v12, %v7340_v53  ;;  %v1497_v25 = vadd.f32 %v1496_v60, %v7353_v18  ;;  %v1510_v42 = vadd.f32 %v1509_v61, %v7388_v40 }
 0x20c   :  { %v1465_v9 = vadd.f32 %v1464_v29, %v1463_v14  ;;  %v1473_v8 = vrot.slane %v1472_v22, 1  ;;  %v1488_v5 = vmul.f32 0.0625, %v1456_v38  ;;  %v1516_v44 = vadd.f32 %v1515_v3, %v7381_v13 }
 0x20d   :  { %5862 = vmatmul.mubr.msk.f32.gmra.mrb[40].mxu1 %vm1085_vm9, %v7210_v49  ;;  %v1504_v53 = vadd.f32 %v1503_v59, %v7357_v39  ;;  %v1519_v16 = vmul.f32 0.125, %v1497_v25  ;;  %v1511_v0 = vadd.f32 %v1510_v42, %v7401_v6 }
 0x20e   :  { %v1474_v63 = vadd.f32 %v1473_v8, %v1472_v22  ;;  %v1489_v58 = vmul.f32 0.0625, %v1465_v9  ;;  %v1871_v37 = vsel %vm614_vm6, %v1488_v5, %v1870_v35  ;;  %5864 = vmatprep.mubr.msk.f32.mxu1 %vm1085_vm9, %v7233_v23  ;;  %v1517_v18 = vadd.f32 %v1516_v44, %v7392_v34 }
 0x20f   :  { %v1520_v49 = vmul.f32 0.125, %v1504_v53  ;;  %v1521_v39 = vmul.f32 0.125, %v1511_v0 }
 0x210   :  { %v1490_v27 = vmul.f32 0.0625, %v1474_v63  ;;  %v1872_v2 = vsel %vm616_vm7, %v1489_v58, %v1871_v37  ;;  %v1518_v23 = vadd.f32 %v1517_v18, %v7405_v21 }
 0x211   :  { %5865 = vmatmul.mubr.msk.f32.gmra.mrb[42].mxu1 %vm1085_vm9, %v7237_v50 }
 0x212   :  { %v1873_v13 = vsel %vm618_vm8, %v1490_v27, %v1872_v2  ;;  %5867 = vmatprep.mubr.msk.f32.mxu1 %vm1085_vm9, %v7241_v31  ;;  %v1522_v50 = vmul.f32 0.125, %v1518_v23 }
 0x213   :  { %5881 = vmatmul.mubr.msk.f32.vlgmr.msra.gmra.mrb[20].mxu0 %vm1085_vm9, %v1873_v13 }
 0x214   :  { %5985 = vmatpush3.bf16.msra.mxu0 %v7098_v55  ;;  %5887 = vmatprep.mubr.msk.f32.mxu0 %vm1085_vm9, %v1519_v16 }
 0x215   :  { %5868 = vmatmul.mubr.msk.f32.gmra.mrb[44].mxu1 %vm1085_vm9, %v7247_v48 }
 0x216   :  { %5870 = vmatprep.mubr.msk.f32.mxu1 %vm1085_vm9, %v7253_v4 }
 0x217   :  { %5888 = vmatmul.mubr.msk.f32.vlgmr.msra.gmra.mrb[22].mxu0 %vm1085_vm9, %v1520_v49 }
 0x218   :  { %5890 = vmatprep.mubr.msk.f32.mxu0 %vm1085_vm9, %v1521_v39 }
 0x219   :  { %5871 = vmatmul.mubr.msk.f32.gmra.mrb[46].mxu1 %vm1085_vm9, %v7269_v52 }
 0x21a   :  { %5873 = vmatprep.mubr.msk.f32.mxu1 %vm1085_vm9, %v7363_v17 }
 0x21b   :  { %5891 = vmatmul.mubr.msk.f32.gmra.mrb[24].mxu0 %vm1085_vm9, %v1522_v50 }
 0x21d   :  { %5874 = vmatmul.mubr.msk.f32.gmra.mrb[48].mxu1 %vm1085_vm9, %v7369_v20 }
 0x2b3   :  { %v5830_v55 = vpop.f32.mrb[18].mxu1 }
 0x2b4   :  { %v1685_v31 = vpop.f32.mrb[19].mxu1 }
 0x2b7   :  { %v5833_v48 = vpop.f32.mrb[20].mxu1 }
 0x2b8   :  { %v1695_v40 = vpop.f32.mrb[21].mxu1 }
 0x2bc   :  { %v5836_v34 = vpop.f32.mrb[22].mxu1 }
 0x2bd   :  { %v1705_v4 = vpop.f32.mrb[23].mxu1 }
 0x2c0   :  { %v7478_v6 = vpop.f32.mrb[24].mxu1 }
 0x2c1   :  { %v7480_v21 = vpop.f32.mrb[25].mxu1 }
 0x2c4   :  { %v5842_v1 = vpop.f32.mrb[26].mxu1 }
 0x2c5   :  { %v1725_v52 = vpop.f32.mrb[27].mxu1 }
 0x2c8   :  { %v7482_v28 = vpop.f32.mrb[28].mxu1 }
 0x2c9   :  { %v7484_v26 = vpop.f32.mrb[29].mxu1 }
 0x2cc   :  { %v5848_v17 = vpop.f32.mrb[30].mxu1 }
 0x2cd   :  { %v1745_v33 = vpop.f32.mrb[31].mxu1 }
 0x2d0   :  { %v7486_v24 = vpop.f32.mrb[32].mxu1 }
 0x2d1   :  { %v7488_v20 = vpop.f32.mrb[33].mxu1 }
 0x2d4   :  { %v5854_v41 = vpop.f32.mrb[34].mxu1 }
 0x2d5   :  { %v1765_v7 = vpop.f32.mrb[35].mxu1 }
 0x2d8   :  { %v7490_v15 = vpop.f32.mrb[36].mxu1 }
 0x2d9   :  { %v7492_v43 = vpop.f32.mrb[37].mxu1 }
 0x2dc   :  { %v7494_v11 = vpop.f32.mrb[38].mxu1 }
 0x2dd   :  { %v7496_v56 = vpop.f32.mrb[39].mxu1 }
 0x2e0   :  { %v7498_v54 = vpop.f32.mrb[40].mxu1 }
 0x2e1   :  { %v7500_v36 = vpop.f32.mrb[41].mxu1 }
 0x2e4   :  { %v7502_v51 = vpop.f32.mrb[42].mxu1 }
 0x2e5   :  { %v7506_v10 = vpop.f32.mrb[43].mxu1 }
 0x2e6   :  { %v7504_v57 = vpop.f32.mrb[20].mxu0 }
 0x2e7   :  { %v2011_v14 = vrot.slane %v7504_v57, %v6595_v46  ;;  %v1944_v47 = vpop.f32.mrb[21].mxu0 }
 0x2e8   :  { %v1955_v19 = vcombine.high %v1944_v47, %v1944_v47  ;;  %v1962_v12 = vrot.slane %v1944_v47, %v6595_v46  ;;  %v7514_v60 = vpop.f32.mrb[44].mxu1 }
 0x2e9   :  { %v2019_v32 = vcombine.high %v2011_v14, %v2011_v14  ;;  %v7512_v62 = vrot.slane %v2011_v14, %v6595_v46  ;;  %v7520_v35 = vpop.f32.mrb[45].mxu1 }
 0x2ea   :  { %v1969_v38 = vrot.slane %v1955_v19, %v6595_v46  ;;  %v1970_v29 = vcombine.high %v1962_v12, %v1962_v12  ;;  %v1978_v22 = vrot.slane %v1962_v12, %v6595_v46  ;;  %v7518_v61 = vpop.f32.mrb[22].mxu0 }
 0x2eb   :  { %v7522_v3 = vpop.f32.mrb[23].mxu0  ;;  %v2088_v9 = vrot.slane %v7512_v62, %v6605_v30  ;;  %v7534_v37 = vrot.slane %v2019_v32, %v6595_v46 }
 0x2ec   :  { %v1971_v8 = vcombine.high %v1969_v38, %v1969_v38  ;;  %v1985_v5 = vrot.slane %v1969_v38, %v6595_v46  ;;  %v1992_v59 = vrot.slane %v1970_v29, %v6595_v46  ;;  %v2000_v25 = vcombine.high %v1978_v22, %v1978_v22  ;;  %v7536_v42 = vpop.f32.mrb[46].mxu1 }
 0x2ed   :  { %v2056_v44 = vrot.slane %v1978_v22, %v6605_v30  ;;  %v7529_v63 = vadd.f32 %v5854_v41, %v2088_v9  ;;  %v7531_v58 = vadd.f32 %v2088_v9, %v1765_v7  ;;  %v7542_v16 = vpop.f32.mrb[47].mxu1 }
 0x2ee   :  { %v2001_v27 = vcombine.high %v1985_v5, %v1985_v5  ;;  %v2002_v2 = vcombine.high %v1992_v59, %v1992_v59  ;;  %v2060_v53 = vrot.slane %v1992_v59, %v6605_v30  ;;  %v2064_v18 = vrot.slane %v2000_v25, %v6605_v30  ;;  %v7540_v13 = vpop.f32.mrb[24].mxu0 }
 0x2ef   :  { %v2072_v0 = vrot.slane %v1985_v5, %v6605_v30  ;;  %v2133_v49 = vadd.f32 %v2056_v44, %v1685_v31  ;;  %v2134_v23 = vadd.f32 %v5830_v55, %v2056_v44  ;;  %v1999_v39 = vrot.slane %v1971_v8, %v6595_v46  ;;  %v7546_v50 = vpop.f32.mrb[25].mxu0 }
 0x2f0   :  { %v2068_v41 = vrot.slane %v2002_v2, %v6605_v30  ;;  %v2080_v7 = vrot.slane %v2001_v27, %v6605_v30  ;;  %v2135_v14 = vadd.f32 %v2060_v53, %v1695_v40  ;;  %v2136_v47 = vadd.f32 %v5833_v48, %v2060_v53  ;;  %v7550_v29 = vpop.f32.mrb[48].mxu1 }
 0x2f1   :  { %v2137_v19 = vadd.f32 %v2064_v18, %v1705_v4  ;;  %v2138_v12 = vadd.f32 %v5836_v34, %v2064_v18  ;;  %v2141_v32 = vadd.f32 %v2072_v0, %v1725_v52  ;;  %v2142_v38 = vadd.f32 %v5842_v1, %v2072_v0  ;;  %v7554_v8 = vpop.f32.mrb[49].mxu1 }
 0x2f2   :  { %v2139_v22 = vadd.f32 %v2068_v41, %v7480_v21  ;;  %v2140_v55 = vadd.f32 %v7478_v6, %v2068_v41  ;;  %v2145_v31 = vadd.f32 %v2080_v7, %v1745_v33  ;;  %v2146_v9 = vadd.f32 %v5848_v17, %v2080_v7 }
 0x2f3   :  { %v2003_v5 = vcombine.high %v1999_v39, %v1999_v39  ;;  %v2076_v59 = vrot.slane %v1999_v39, %v6605_v30  ;;  %v7558_v40 = vadd.f32 %v7518_v61, %v2134_v23  ;;  %v7561_v48 = vadd.f32 %v7518_v61, %v2136_v47 }
 0x2f4   :  { %v7564_v34 = vadd.f32 %v7518_v61, %v2138_v12  ;;  %v7567_v4 = vadd.f32 %v7518_v61, %v2140_v55  ;;  %v7570_v6 = vadd.f32 %v7518_v61, %v2142_v38  ;;  %v7573_v21 = vadd.f32 %v7522_v3, %v2133_v49 }
 0x2f5   :  { %v2084_v1 = vrot.slane %v2003_v5, %v6605_v30  ;;  %v2143_v52 = vadd.f32 %v2076_v59, %v7484_v26  ;;  %v2144_v17 = vadd.f32 %v7482_v28, %v2076_v59  ;;  %v2295_v33 = vmax.f32 %v7558_v40, 0.0 }
 0x2f6   :  { %v2004_v2 = vcombine.high %v7504_v57, %v7504_v57  ;;  %v2092_v53 = vrot.slane %v7534_v37, %v6605_v30  ;;  %v7592_v26 = vadd.f32 %v7522_v3, %v2135_v14  ;;  %v7598_v18 = vadd.f32 %v7522_v3, %v2139_v22 }
 0x2f7   :  { %v2148_v25 = vadd.f32 %v7486_v24, %v2084_v1  ;;  %v7581_v44 = vadd.f32 %v7518_v61, %v2144_v17  ;;  %v2147_v27 = vadd.f32 %v2084_v1, %v7488_v20  ;;  %v2328_v28 = vsel %vm2326_vm10, %v2295_v33, 0.0 }
 0x2f8   :  { %v7595_v24 = vadd.f32 %v7522_v3, %v2137_v19  ;;  %v7601_v20 = vadd.f32 %v7522_v3, %v2141_v32  ;;  %v7604_v57 = vadd.f32 %v7522_v3, %v2143_v52  ;;  %v7607_v0 = vadd.f32 %v7522_v3, %v2145_v31 }
 0x2f9   :  { %v2294_v49 = vmax.f32 %v7573_v21, 0.0  ;;  %v2296_v23 = vmax.f32 %v7592_v26, 0.0  ;;  %v2152_v39 = vadd.f32 %v7490_v15, %v2092_v53  ;;  %v2297_v41 = vmax.f32 %v7561_v48, 0.0 }
 0x2fa   :  { %v2018_v19 = vrot.slane %v2004_v2, %v6595_v46  ;;  %v2298_v12 = vmax.f32 %v7595_v24, 0.0  ;;  %v7623_v32 = vadd.f32 %v7540_v13, %v7529_v63  ;;  %v2151_v22 = vadd.f32 %v2092_v53, %v7492_v43 }
 0x2fb   :  { %v2327_v7 = vsel %vm2326_vm10, %v2294_v49, 0.0  ;;  %v2330_v47 = vsel %vm2326_vm10, %v2296_v23, 0.0  ;;  %v7626_v15 = vadd.f32 %v7540_v13, %v2152_v39  ;;  %v7630_v55 = vadd.f32 %v7518_v61, %v2146_v9 }
 0x2fc   :  { %v2329_v14 = vadd.f32 %v2328_v28, %v2327_v7  ;;  %v7633_v31 = vadd.f32 %v7522_v3, %v2147_v27  ;;  %v2299_v5 = vmax.f32 %v7564_v34, 0.0  ;;  %v2332_v59 = vsel %vm2326_vm10, %v2297_v41, 0.0 }
 0x2fd   :  { %v7640_v63 = vadd.f32 %v7518_v61, %v2148_v25  ;;  %v7644_v1 = vadd.f32 %v7546_v50, %v7531_v58  ;;  %v10468_v43 = vmax.f32 %v7567_v4, 0.0  ;;  %v7648_v52 = vadd.f32 %v7546_v50, %v2151_v22 }
 0x2fe   :  { %v2331_v38 = vadd.f32 %v2330_v47, %v2329_v14  ;;  %v2049_v3 = vcombine.high %v7512_v62, %v7512_v62  ;;  %v2020_v17 = vcombine.high %v2018_v19, %v2018_v19  ;;  %v10466_v27 = vmax.f32 %v7570_v6, 0.0 }
 0x2ff   :  { %v2300_v2 = vmax.f32 %v7598_v18, 0.0  ;;  %v2334_v61 = vsel %vm2326_vm10, %v2298_v12, 0.0  ;;  %v2336_v25 = vsel %vm2326_vm10, %v2299_v5, 0.0  ;;  %v10467_v53 = vmax.f32 %v7601_v20, 0.0 }
 0x300   :  { %v2333_v9 = vadd.f32 %v2332_v59, %v2331_v38  ;;  %v2340_v62 = vsel %vm2326_vm10, %v10468_v43, 0.0  ;;  %v2096_v39 = vrot.slane %v2049_v3, %v6605_v30  ;;  %v2051_v7 = vcombine.high %v7534_v37, %v7534_v37 }
 0x301   :  { %v2344_v14 = vsel %vm2326_vm10, %v10466_v27, 0.0  ;;  %v2338_v47 = vsel %vm2326_vm10, %v2300_v2, 0.0  ;;  %v2034_v38 = vrot.slane %v2018_v19, %v6595_v46  ;;  %v2048_v22 = vrot.slane %v2020_v17, %v6595_v46 }
 0x302   :  { %v2335_v58 = vadd.f32 %v2334_v61, %v2333_v9  ;;  %v2154_v9 = vadd.f32 %v7494_v11, %v2096_v39  ;;  %v2153_v3 = vadd.f32 %v2096_v39, %v7496_v56  ;;  %v2100_v61 = vrot.slane %v2051_v7, %v6605_v30 }
 0x303   :  { %v2304_v37 = vmax.f32 %v7604_v57, 0.0  ;;  %v2108_v27 = vrot.slane %v2048_v22, %v6605_v30  ;;  %v10678_v18 = vmax.f32 %v7601_v20, 0.0 }
 0x304   :  { %v2337_v28 = vadd.f32 %v2336_v25, %v2335_v58  ;;  %v2342_v58 = vsel %vm2326_vm10, %v10467_v53, 0.0  ;;  %v2104_v25 = vrot.slane %v2034_v38, %v6605_v30  ;;  %v7685_v17 = vadd.f32 %v7540_v13, %v2154_v9 }
 0x305   :  { %v7688_v11 = vadd.f32 %v7546_v50, %v2153_v3  ;;  %v2156_v56 = vadd.f32 %v7498_v54, %v2100_v61  ;;  %v2305_v53 = vmax.f32 %v7581_v44, 0.0  ;;  %v2346_v3 = vsel %vm2326_vm10, %v2304_v37, 0.0 }
 0x306   :  { %v2339_v59 = vadd.f32 %v2338_v47, %v2337_v28  ;;  %v2155_v28 = vadd.f32 %v2100_v61, %v7500_v36  ;;  %v2158_v39 = vadd.f32 %v7502_v51, %v2104_v25  ;;  %v2157_v7 = vadd.f32 %v2104_v25, %v7506_v10 }
 0x307   :  { %v2160_v47 = vadd.f32 %v7514_v60, %v2108_v27  ;;  %v2306_v60 = vmax.f32 %v7607_v0, 0.0 }
 0x308   :  { %v2341_v19 = vadd.f32 %v2340_v62, %v2339_v59  ;;  %v7697_v62 = vadd.f32 %v7540_v13, %v2156_v56  ;;  %v2050_v59 = vcombine.high %v2034_v38, %v2034_v38  ;;  %v7700_v9 = vadd.f32 %v7546_v50, %v2155_v28 }
 0x309   :  { %v7703_v54 = vadd.f32 %v7540_v13, %v2158_v39  ;;  %v7706_v36 = vadd.f32 %v7546_v50, %v2157_v7  ;;  %v7709_v51 = vadd.f32 %v7540_v13, %v2160_v47  ;;  %v2052_v38 = vcombine.high %v2048_v22, %v2048_v22 }
 0x30a   :  { %v2343_v43 = vadd.f32 %v2342_v58, %v2341_v19  ;;  %v2159_v58 = vadd.f32 %v2108_v27, %v7520_v35  ;;  %v2112_v25 = vrot.slane %v2050_v59, %v6605_v30  ;;  %v2307_v19 = vmax.f32 %v7630_v55, 0.0 }
 0x30b   :  { %v2348_v56 = vsel %vm2326_vm10, %v2305_v53, 0.0  ;;  %v2308_v22 = vmax.f32 %v7633_v31, 0.0  ;;  %v2350_v35 = vsel %vm2326_vm10, %v2306_v60, 0.0  ;;  %v2116_v27 = vrot.slane %v2052_v38, %v6605_v30 }
 0x30c   :  { %v2345_v10 = vadd.f32 %v2344_v14, %v2343_v43  ;;  %v7722_v43 = vadd.f32 %v7546_v50, %v2159_v58  ;;  %v2162_v14 = vadd.f32 %v7536_v42, %v2112_v25  ;;  %v2161_v39 = vadd.f32 %v2112_v25, %v7542_v16 }
 0x30d   :  { %v2352_v42 = vsel %vm2326_vm10, %v2307_v19, 0.0  ;;  %v2164_v16 = vadd.f32 %v7550_v29, %v2116_v27  ;;  %v2310_v38 = vmax.f32 %v7644_v1, 0.0  ;;  %v2354_v58 = vsel %vm2326_vm10, %v2308_v22, 0.0 }
 0x30e   :  { %v2347_v61 = vadd.f32 %v2346_v3, %v2345_v10  ;;  %v7732_v47 = vadd.f32 %v7540_v13, %v2162_v14  ;;  %v7735_v59 = vadd.f32 %v7546_v50, %v2161_v39  ;;  %v2309_v10 = vmax.f32 %v7640_v63, 0.0 }
 0x30f   :  { %v2163_v3 = vadd.f32 %v2116_v27, %v7554_v8  ;;  %v7748_v25 = vadd.f32 %v7540_v13, %v2164_v16  ;;  %v10473_v14 = vmax.f32 %v7623_v32, 0.0  ;;  %v10470_v39 = vmax.f32 %v7648_v52, 0.0 }
 0x310   :  { %v2349_v28 = vadd.f32 %v2348_v56, %v2347_v61  ;;  %v2356_v29 = vsel %vm2326_vm10, %v2309_v10, 0.0  ;;  %v10469_v13 = vmax.f32 %v7626_v15, 0.0  ;;  %v10471_v16 = vmax.f32 %v7688_v11, 0.0 }
 0x311   :  { %v7751_v56 = vadd.f32 %v7546_v50, %v2163_v3  ;;  %v2360_v50 = vsel %vm2326_vm10, %v10473_v14, 0.0  ;;  %v10680_v63 = vmax.f32 %v7623_v32, 0.0  ;;  %v10681_v1 = vmax.f32 %v7648_v52, 0.0  ;;  %v2573_v32 = vld [vmem:[%s10449_s9] sm:$0xff] }
 0x312   :  { %v2351_v7 = vadd.f32 %v2350_v35, %v2349_v28  ;;  %v2358_v35 = vsel %vm2326_vm10, %v2310_v38, 0.0 }
 0x314   :  { %v2353_v61 = vadd.f32 %v2352_v42, %v2351_v7  ;;  %v2362_v42 = vsel %vm2326_vm10, %v10470_v39, 0.0 }
 0x316   :  { %v2355_v28 = vadd.f32 %v2354_v58, %v2353_v61  ;;  %v2364_v61 = vsel %vm2326_vm10, %v10469_v13, 0.0  ;;  %v10472_v58 = vmax.f32 %v7685_v17, 0.0  ;;  %v2318_v13 = vmax.f32 %v7706_v36, 0.0 }
 0x317   :  { %v2322_v36 = vmax.f32 %v7735_v59, 0.0 }
 0x318   :  { %v2357_v8 = vadd.f32 %v2356_v29, %v2355_v28  ;;  %v2366_v29 = vsel %vm2326_vm10, %v10471_v16, 0.0 }
 0x31a   :  { %v2359_v27 = vadd.f32 %v2358_v35, %v2357_v8  ;;  %v2316_v8 = vmax.f32 %v7700_v9, 0.0  ;;  %v2374_v9 = vsel %vm2326_vm10, %v2318_v13, 0.0 }
 0x31c   :  { %v2361_v7 = vadd.f32 %v2360_v50, %v2359_v27  ;;  %v2368_v27 = vsel %vm2326_vm10, %v10472_v58, 0.0  ;;  %v2317_v50 = vmax.f32 %v7697_v62, 0.0  ;;  %v2321_v62 = vmax.f32 %v7709_v51, 0.0 }
 0x31d   :  { %v2325_v51 = vmax.f32 %v7748_v25, 0.0 }
 0x31e   :  { %v2363_v3 = vadd.f32 %v2362_v42, %v2361_v7  ;;  %v2370_v42 = vsel %vm2326_vm10, %v2316_v8, 0.0 }
 0x31f   :  { %v2388_v59 = vsel %vm2326_vm10, %v2325_v51, 0.0 }
 0x320   :  { %v2365_v28 = vadd.f32 %v2364_v61, %v2363_v3  ;;  %v2372_v3 = vsel %vm2326_vm10, %v2317_v50, 0.0  ;;  %v2319_v61 = vmax.f32 %v7703_v54, 0.0  ;;  %v2323_v54 = vmax.f32 %v7732_v47, 0.0  ;;  %v2565_v47 = vld [vmem:[%s10447_s7] sm:$0xff] }
 0x322   :  { %v2367_v35 = vadd.f32 %v2366_v29, %v2365_v28  ;;  %v2320_v28 = vmax.f32 %v7722_v43, 0.0  ;;  %v2376_v58 = vsel %vm2326_vm10, %v2319_v61, 0.0  ;;  %v2324_v43 = vmax.f32 %v7751_v56, 0.0  ;;  %v2566_v56 = vld [vmem:[%s10447_s7 + $0x8] sm:$0xff] }
 0x324   :  { %v2369_v7 = vadd.f32 %v2368_v27, %v2367_v35  ;;  %v2378_v27 = vsel %vm2326_vm10, %v2320_v28, 0.0 }
 0x326   :  { %v2371_v39 = vadd.f32 %v2370_v42, %v2369_v7  ;;  %v2380_v42 = vsel %vm2326_vm10, %v2321_v62, 0.0 }
 0x328   :  { %v2373_v16 = vadd.f32 %v2372_v3, %v2371_v39  ;;  %v2382_v3 = vsel %vm2326_vm10, %v2322_v36, 0.0 }
 0x32a   :  { %v2375_v29 = vadd.f32 %v2374_v9, %v2373_v16  ;;  %v2384_v9 = vsel %vm2326_vm10, %v2323_v54, 0.0 }
 0x32c   :  { %v2377_v35 = vadd.f32 %v2376_v58, %v2375_v29  ;;  %v2386_v29 = vsel %vm2326_vm10, %v2324_v43, 0.0 }
 0x32e   :  { %v2379_v7 = vadd.f32 %v2378_v27, %v2377_v35 }
 0x330   :  { %v2381_v39 = vadd.f32 %v2380_v42, %v2379_v7  ;;  %v5986_v7 = vpack.c.bf16 %v2566_v56, %v2565_v47 }
 0x332   :  { %v2383_v16 = vadd.f32 %v2382_v3, %v2381_v39  ;;  %5987 = vmatprep.subr.bf16.mxu0 %v5986_v7  ;;  %v2569_v39 = vld [vmem:[%s10448_s8] sm:$0xff]  ;;  %v2567_v3 = vld [vmem:[%s10447_s7 + $0x10] sm:$0xff] }
 0x333   :  { %5989 = vmatpush3.bf16.msra.mxu0 %v5986_v7 }
 0x334   :  { %v2385_v58 = vadd.f32 %v2384_v9, %v2383_v16  ;;  %v2568_v9 = vld [vmem:[%s10447_s7 + $0x18] sm:$0xff] }
 0x336   :  { %v2387_v14 = vadd.f32 %v2386_v29, %v2385_v58  ;;  %v5990_v29 = vpack.c.bf16 %v2568_v9, %v2567_v3 }
 0x338   :  { %v2389_v35 = vadd.f32 %v2388_v59, %v2387_v14  ;;  %v2570_v14 = vld [vmem:[%s10448_s8 + $0x8] sm:$0xff]  ;;  %5991 = vmatprep.subr.bf16.mxu0 %v5990_v29 }
 0x339   :  { %v5994_v16 = vpack.c.bf16 %v2570_v14, %v2569_v39  ;;  %5993 = vmatpush3.bf16.msra.mxu0 %v5990_v29 }
 0x33a   :  { %v2390_v27 = vrot.slane %v2389_v35, 4 }
 0x33b   :  { %5995 = vmatprep.subr.bf16.mxu1 %v5994_v16 }
 0x33c   :  { %v2391_v42 = vadd.f32 %v2390_v27, %v2389_v35  ;;  %5997 = vmatpush3.bf16.msra.mxu1 %v5994_v16 }
 0x33e   :  { %v2392_v25 = vrot.slane %v2391_v42, 2 }
 0x340   :  { %v2393_v58 = vadd.f32 %v2392_v25, %v2391_v42 }
 0x342   :  { %v2394_v59 = vrot.slane %v2393_v58, 1 }
 0x344   :  { %v2395_v35 = vadd.f32 %v2394_v59, %v2393_v58  ;;  %v2572_v59 = vld [vmem:[%s10448_s8 + $0x18] sm:$0xff] }
 0x346   :  { %v7817_v47 = vmul.f32 0.00390625, %v2395_v35 }
 0x348   :  { %v7820_v56 = vsub.f32 %v2316_v8, %v7817_v47  ;;  %v7823_v27 = vsub.f32 %v2317_v50, %v7817_v47  ;;  %v7826_v7 = vsub.f32 %v2318_v13, %v7817_v47  ;;  %v7829_v42 = vsub.f32 %v2319_v61, %v7817_v47 }
 0x349   :  { %v7832_v25 = vsub.f32 %v2320_v28, %v7817_v47  ;;  %v7835_v39 = vsub.f32 %v2321_v62, %v7817_v47  ;;  %v7838_v14 = vsub.f32 %v2322_v36, %v7817_v47  ;;  %v7841_v8 = vsub.f32 %v2323_v54, %v7817_v47 }
 0x34a   :  { %v7844_v50 = vsub.f32 %v2324_v43, %v7817_v47  ;;  %v7847_v13 = vsub.f32 %v2325_v51, %v7817_v47  ;;  %v7852_v61 = vsub.f32 %v2294_v49, %v7817_v47  ;;  %v7857_v28 = vsub.f32 %v2295_v33, %v7817_v47 }
 0x34b   :  { %v7862_v62 = vsub.f32 %v2296_v23, %v7817_v47  ;;  %v7867_v36 = vsub.f32 %v2297_v41, %v7817_v47  ;;  %v7876_v40 = vsub.f32 %v2298_v12, %v7817_v47  ;;  %v7883_v48 = vsub.f32 %v2299_v5, %v7817_v47 }
 0x34c   :  { %v2429_v21 = vmul.f32 %v7852_v61, %v7852_v61  ;;  %v2430_v49 = vmul.f32 %v7857_v28, %v7857_v28  ;;  %v7892_v24 = vsub.f32 %v2300_v2, %v7817_v47  ;;  %v10677_v43 = vmax.f32 %v7567_v4, 0.0  ;;  %v2571_v4 = vld [vmem:[%s10448_s8 + $0x10] sm:$0xff] }
 0x34d   :  { %v2431_v33 = vmul.f32 %v7862_v62, %v7862_v62  ;;  %v2432_v26 = vmul.f32 %v7867_v36, %v7867_v36  ;;  %v2433_v12 = vmul.f32 %v7876_v40, %v7876_v40  ;;  %v2434_v3 = vmul.f32 %v7883_v48, %v7883_v48 }
 0x34e   :  { %v2461_v23 = vsel %vm2326_vm10, %v2429_v21, 0.0  ;;  %v2462_v41 = vsel %vm2326_vm10, %v2430_v49, 0.0  ;;  %v7900_v51 = vsub.f32 %v10677_v43, %v7817_v47  ;;  %v7908_v2 = vsub.f32 %v10678_v18, %v7817_v47 }
 0x34f   :  { %v2463_v54 = vadd.f32 %v2462_v41, %v2461_v23  ;;  %v2464_v34 = vsel %vm2326_vm10, %v2431_v33, 0.0  ;;  %v2466_v16 = vsel %vm2326_vm10, %v2432_v26, 0.0  ;;  %v2435_v58 = vmul.f32 %v7892_v24, %v7892_v24 }
 0x350   :  { %v2468_v29 = vsel %vm2326_vm10, %v2433_v12, 0.0  ;;  %v10679_v21 = vmax.f32 %v7570_v6, 0.0  ;;  %v2436_v49 = vmul.f32 %v7900_v51, %v7900_v51  ;;  %v2470_v33 = vsel %vm2326_vm10, %v2434_v3, 0.0 }
 0x351   :  { %v2465_v5 = vadd.f32 %v2464_v34, %v2463_v54  ;;  %v5998_v23 = vpack.c.bf16 %v2572_v59, %v2571_v4  ;;  %v7930_v41 = vsub.f32 %v2304_v37, %v7817_v47  ;;  %v2437_v54 = vmul.f32 %v7908_v2, %v7908_v2 }
 0x352   :  { %v7922_v20 = vsub.f32 %v10679_v21, %v7817_v47  ;;  %v2472_v12 = vsel %vm2326_vm10, %v2435_v58, 0.0  ;;  %v7938_v34 = vsub.f32 %v2305_v53, %v7817_v47  ;;  %v2474_v43 = vsel %vm2326_vm10, %v2436_v49, 0.0 }
 0x353   :  { %v2467_v9 = vadd.f32 %v2466_v16, %v2465_v5  ;;  %5999 = vmatprep.subr.bf16.mxu1 %v5998_v23  ;;  %v7946_v37 = vsub.f32 %v2306_v60, %v7817_v47  ;;  %v2439_v3 = vmul.f32 %v7930_v41, %v7930_v41  ;;  %v2476_v16 = vsel %vm2326_vm10, %v2437_v54, 0.0 }
 0x354   :  { %v2438_v5 = vmul.f32 %v7922_v20, %v7922_v20  ;;  %6001 = vmatpush3.bf16.msra.mxu1 %v5998_v23  ;;  %v7954_v53 = vsub.f32 %v2307_v19, %v7817_v47  ;;  %v7962_v0 = vsub.f32 %v2308_v22, %v7817_v47  ;;  %v7970_v55 = vsub.f32 %v2309_v10, %v7817_v47 }
 0x355   :  { %v2469_v35 = vadd.f32 %v2468_v29, %v2467_v9  ;;  %v2440_v9 = vmul.f32 %v7938_v34, %v7938_v34  ;;  %v2441_v60 = vmul.f32 %v7946_v37, %v7946_v37  ;;  %v2480_v29 = vsel %vm2326_vm10, %v2439_v3, 0.0 }
 0x356   :  { %v2478_v18 = vsel %vm2326_vm10, %v2438_v5, 0.0  ;;  %v2442_v19 = vmul.f32 %v7954_v53, %v7954_v53  ;;  %v7978_v31 = vsub.f32 %v2310_v38, %v7817_v47  ;;  %v2443_v22 = vmul.f32 %v7962_v0, %v7962_v0  ;;  %v2574_v5 = vld [vmem:[%s10449_s9 + $0x8] sm:$0xff] }
 0x357   :  { %v2471_v26 = vadd.f32 %v2470_v33, %v2469_v35  ;;  %v2482_v59 = vsel %vm2326_vm10, %v2440_v9, 0.0  ;;  %v2484_v21 = vsel %vm2326_vm10, %v2441_v60, 0.0  ;;  %v7986_v10 = vsub.f32 %v10680_v63, %v7817_v47 }
 0x358   :  { %v2444_v33 = vmul.f32 %v7970_v55, %v7970_v55  ;;  %v7994_v38 = vsub.f32 %v10681_v1, %v7817_v47  ;;  %v2445_v54 = vmul.f32 %v7978_v31, %v7978_v31  ;;  %v10684_v9 = vmax.f32 %v7688_v11, 0.0 }
 0x359   :  { %v2473_v6 = vadd.f32 %v2472_v12, %v2471_v26  ;;  %v2486_v26 = vsel %vm2326_vm10, %v2442_v19, 0.0  ;;  %v2488_v12 = vsel %vm2326_vm10, %v2443_v22, 0.0 }
 0x35a   :  { %v2490_v3 = vsel %vm2326_vm10, %v2444_v33, 0.0 }
 0x35b   :  { %v2475_v57 = vadd.f32 %v2474_v43, %v2473_v6  ;;  %v10682_v43 = vmax.f32 %v7626_v15, 0.0  ;;  %v2492_v15 = vsel %vm2326_vm10, %v2445_v54, 0.0 }
 0x35d   :  { %v2477_v44 = vadd.f32 %v2476_v16, %v2475_v57  ;;  %v8008_v52 = vsub.f32 %v10682_v43, %v7817_v47  ;;  %v2446_v57 = vmul.f32 %v7986_v10, %v7986_v10  ;;  %v8013_v16 = vpack.c.bf16 %v2574_v5, %v2573_v32 }
 0x35e   :  { %v2454_v5 = vmul.f32 %v7829_v42, %v7829_v42 }
 0x35f   :  { %v2479_v58 = vadd.f32 %v2478_v18, %v2477_v44  ;;  %10683 = vst [vmem:[#allocation5_spill] sm:$0xff] %v8013_v16  ;;  %v8018_v18 = vsub.f32 %v10684_v9, %v7817_v47  ;;  %6003 = vmatprep.subr.bf16.mxu1 %v8013_v16  ;;  %v2448_v19 = vmul.f32 %v8008_v52, %v8008_v52 }
 0x361   :  { %v2481_v4 = vadd.f32 %v2480_v29, %v2479_v58  ;;  %v2447_v58 = vmul.f32 %v7994_v38, %v7994_v38  ;;  %v10685_v29 = vmax.f32 %v7685_v17, 0.0  ;;  %v2498_v63 = vsel %vm2326_vm10, %v2448_v19, 0.0 }
 0x362   :  { %v2451_v17 = vmul.f32 %v7820_v56, %v7820_v56 }
 0x363   :  { %v2483_v35 = vadd.f32 %v2482_v59, %v2481_v4  ;;  %v2418_v4 = vsub.f32 %v10685_v29, %v7817_v47  ;;  %v2494_v59 = vsel %vm2326_vm10, %v2446_v57, 0.0  ;;  %v2496_v22 = vsel %vm2326_vm10, %v2447_v58, 0.0 }
 0x364   :  { %v2456_v58 = vmul.f32 %v7835_v39, %v7835_v39  ;;  %v2457_v29 = vmul.f32 %v7838_v14, %v7838_v14 }
 0x365   :  { %v2485_v49 = vadd.f32 %v2484_v21, %v2483_v35  ;;  %v2449_v35 = vmul.f32 %v8018_v18, %v8018_v18 }
 0x367   :  { %v2487_v23 = vadd.f32 %v2486_v26, %v2485_v49  ;;  %v2450_v49 = vmul.f32 %v2418_v4, %v2418_v4  ;;  %v2500_v47 = vsel %vm2326_vm10, %v2449_v35, 0.0  ;;  %v2514_v35 = vsel %vm2326_vm10, %v2456_v58, 0.0 }
 0x369   :  { %v2489_v6 = vadd.f32 %v2488_v12, %v2487_v23  ;;  %v2452_v23 = vmul.f32 %v7823_v27, %v7823_v27  ;;  %v2502_v1 = vsel %vm2326_vm10, %v2450_v49, 0.0  ;;  %v2453_v12 = vmul.f32 %v7826_v7, %v7826_v7 }
 0x36a   :  { %v2516_v49 = vsel %vm2326_vm10, %v2457_v29, 0.0 }
 0x36b   :  { %v2491_v44 = vadd.f32 %v2490_v3, %v2489_v6  ;;  %v2504_v6 = vsel %vm2326_vm10, %v2451_v17, 0.0  ;;  %v2506_v43 = vsel %vm2326_vm10, %v2452_v23, 0.0  ;;  %v2455_v3 = vmul.f32 %v7832_v25, %v7832_v25 }
 0x36d   :  { %v2493_v60 = vadd.f32 %v2492_v15, %v2491_v44  ;;  %v2508_v44 = vsel %vm2326_vm10, %v2453_v12, 0.0  ;;  %v2510_v15 = vsel %vm2326_vm10, %v2454_v5, 0.0  ;;  %v2512_v19 = vsel %vm2326_vm10, %v2455_v3, 0.0 }
 0x36f   :  { %v2495_v11 = vadd.f32 %v2494_v59, %v2493_v60 }
 0x371   :  { %v2497_v21 = vadd.f32 %v2496_v22, %v2495_v11  ;;  %v2458_v11 = vmul.f32 %v7841_v8, %v7841_v8 }
 0x373   :  { %v2499_v33 = vadd.f32 %v2498_v63, %v2497_v21  ;;  %v2459_v21 = vmul.f32 %v7844_v50, %v7844_v50  ;;  %v2518_v17 = vsel %vm2326_vm10, %v2458_v11, 0.0 }
 0x375   :  { %v2501_v26 = vadd.f32 %v2500_v47, %v2499_v33  ;;  %v2460_v33 = vmul.f32 %v7847_v13, %v7847_v13 }
 0x377   :  { %v2503_v54 = vadd.f32 %v2502_v1, %v2501_v26  ;;  %v2520_v26 = vsel %vm2326_vm10, %v2459_v21, 0.0  ;;  %v2522_v1 = vsel %vm2326_vm10, %v2460_v33, 0.0 }
 0x379   :  { %v2505_v32 = vadd.f32 %v2504_v6, %v2503_v54 }
 0x37b   :  { %v2507_v57 = vadd.f32 %v2506_v43, %v2505_v32 }
 0x37d   :  { %v2509_v9 = vadd.f32 %v2508_v44, %v2507_v57 }
 0x37f   :  { %v2511_v60 = vadd.f32 %v2510_v15, %v2509_v9 }
 0x381   :  { %v2513_v59 = vadd.f32 %v2512_v19, %v2511_v60 }
 0x383   :  { %v2515_v22 = vadd.f32 %v2514_v35, %v2513_v59 }
 0x385   :  { %v2517_v63 = vadd.f32 %v2516_v49, %v2515_v22 }
 0x387   :  { %v2519_v47 = vadd.f32 %v2518_v17, %v2517_v63 }
 0x389   :  { %v2521_v23 = vadd.f32 %v2520_v26, %v2519_v47 }
 0x38b   :  { %v2523_v54 = vadd.f32 %v2522_v1, %v2521_v23 }
 0x38d   :  { %v2524_v12 = vrot.slane %v2523_v54, 4 }
 0x38f   :  { %v2525_v6 = vadd.f32 %v2524_v12, %v2523_v54 }
 0x391   :  { %v2526_v32 = vrot.slane %v2525_v6, 2 }
 0x393   :  { %v2527_v5 = vadd.f32 %v2526_v32, %v2525_v6 }
 0x395   :  { %v2528_v43 = vrot.slane %v2527_v5, 1 }
 0x397   :  { %v2529_v57 = vadd.f32 %v2528_v43, %v2527_v5 }
 0x399   :  { %v2530_v3 = vmul.f32 0.00390625, %v2529_v57 }
 0x39b   :  { %v2531_v44 = vadd.f32 1e-05, %v2530_v3 }
 0x39d   :  { %6135 = vrsqrt.f32 %v2531_v44 }
 0x3a7   :  { %v8066_v9 = vpop.eup %6135 }
 0x3a8   :  { %v8070_v58 = vmul.f32 %v8066_v9, %v7844_v50  ;;  %v8074_v15 = vmul.f32 %v8066_v9, %v7847_v13  ;;  %v8078_v60 = vmul.f32 %v8066_v9, %v7978_v31  ;;  %v8082_v29 = vmul.f32 %v8066_v9, %v7986_v10 }
 0x3a9   :  { %v8086_v19 = vmul.f32 %v8066_v9, %v7994_v38  ;;  %v8090_v50 = vmul.f32 %v8066_v9, %v8008_v52  ;;  %v8094_v13 = vmul.f32 %v8066_v9, %v8018_v18  ;;  %v8097_v59 = vmul.f32 %v8066_v9, %v2418_v4 }
 0x3aa   :  { %10686 = vst [vmem:[#allocation6_spill] sm:$0xff] %v8070_v58  ;;  %10687 = vst [vmem:[#allocation7_spill] sm:$0xff] %v8074_v15  ;;  %v8101_v31 = vsel %vm2326_vm10, %v8070_v58, 0.0  ;;  %v8105_v10 = vsel %vm2326_vm10, %v8074_v15, 0.0  ;;  %v8109_v38 = vmul.f32 %v8066_v9, %v7820_v56  ;;  %v8113_v52 = vmul.f32 %v8066_v9, %v7823_v27 }
 0x3ab   :  { %10688 = vst [vmem:[#allocation8_spill] sm:$0xff] %v8082_v29  ;;  %10689 = vst [vmem:[#allocation9_spill] sm:$0xff] %v8086_v19  ;;  %v2714_v18 = vadd.f32 %v8105_v10, %v8101_v31  ;;  %v8119_v4 = vmul.f32 %v8066_v9, %v7826_v7  ;;  %v8123_v11 = vmul.f32 %v8066_v9, %v7829_v42  ;;  %v2649_v42 = vsel %vm2326_vm10, %v8078_v60, 0.0 }
 0x3ac   :  { %10690 = vst [vmem:[#allocation10_spill] sm:$0xff] %v8090_v50  ;;  %10691 = vst [vmem:[#allocation11_spill] sm:$0xff] %v8094_v13  ;;  %v8127_v35 = vmul.f32 %v8066_v9, %v7832_v25  ;;  %v8131_v56 = vmul.f32 %v8066_v9, %v7835_v39  ;;  %v8135_v27 = vmul.f32 %v8066_v9, %v7838_v14  ;;  %v2650_v25 = vsel %vm2326_vm10, %v8082_v29, 0.0 }
 0x3ad   :  { %10692 = vst [vmem:[#allocation12_spill] sm:$0xff] %v8097_v59  ;;  %10693 = vst [vmem:[#allocation13_spill] sm:$0xff] %v8101_v31  ;;  %v8139_v7 = vmul.f32 %v8066_v9, %v7841_v8  ;;  %v2715_v22 = vrot.slane %v2714_v18, 4  ;;  %v2658_v21 = vsel %vm2326_vm10, %v8086_v19, 0.0  ;;  %v2659_v39 = vsel %vm2326_vm10, %v8090_v50, 0.0 }
 0x3ae   :  { %10694 = vst [vmem:[#allocation14_spill] sm:$0xff] %v8105_v10  ;;  %10695 = vst [vmem:[#allocation15_spill] sm:$0xff] %v8109_v38  ;;  %v2667_v14 = vsel %vm2326_vm10, %v8094_v13, 0.0  ;;  %v2668_v8 = vsel %vm2326_vm10, %v8097_v59, 0.0  ;;  %v2676_v49 = vsel %vm2326_vm10, %v8109_v38, 0.0  ;;  %v2677_v63 = vsel %vm2326_vm10, %v8113_v52, 0.0 }
 0x3af   :  { %10696 = vst [vmem:[#allocation16_spill] sm:$0xff] %v8113_v52  ;;  %10697 = vst [vmem:[#allocation17_spill] sm:$0xff] %v8119_v4  ;;  %v2716_v33 = vadd.f32 %v2715_v22, %v2714_v18  ;;  %v2685_v17 = vsel %vm2326_vm10, %v8119_v4, 0.0  ;;  %v8161_v47 = vsel %vm2326_vm10, %v8123_v11, 0.0  ;;  %v2694_v26 = vsel %vm2326_vm10, %v8127_v35, 0.0 }
 0x3b0   :  { %10698 = vst [vmem:[#allocation18_spill] sm:$0xff] %v8123_v11  ;;  %10699 = vst [vmem:[#allocation19_spill] sm:$0xff] %v8127_v35  ;;  %v8167_v23 = vsel %vm2326_vm10, %v8131_v56, 0.0  ;;  %v8171_v1 = vsel %vm2326_vm10, %v8135_v27, 0.0  ;;  %v8175_v54 = vsel %vm2326_vm10, %v8139_v7, 0.0  ;;  %v2651_v12 = vadd.f32 %v2650_v25, %v2649_v42 }
 0x3b1   :  { %10700 = vst [vmem:[#allocation20_spill] sm:$0xff] %v8131_v56  ;;  %10701 = vst [vmem:[#allocation21_spill] sm:$0xff] %v8135_v27  ;;  %v2660_v6 = vadd.f32 %v2659_v39, %v2658_v21  ;;  %v2669_v32 = vadd.f32 %v2668_v8, %v2667_v14  ;;  %v2678_v5 = vadd.f32 %v2677_v63, %v2676_v49  ;;  %v2717_v18 = vrot.slane %v2716_v33, 2 }
 0x3b2   :  { %10702 = vst [vmem:[#allocation22_spill] sm:$0xff] %v8139_v7  ;;  %10703 = vst [vmem:[#allocation23_spill] sm:$0xff] %v8175_v54  ;;  %v2687_v43 = vadd.f32 %v8161_v47, %v2685_v17  ;;  %v2696_v57 = vadd.f32 %v8167_v23, %v2694_v26  ;;  %v2705_v3 = vadd.f32 %v8175_v54, %v8171_v1  ;;  %v2652_v45 = vrot.slane %v2651_v12, 4 }
 0x3b3   :  { %v2751_v44 = vadd.f32 %v2658_v21, %v2649_v42  ;;  %v2758_v22 = vadd.f32 %v2659_v39, %v2650_v25  ;;  %v2661_v30 = vrot.slane %v2660_v6, 4  ;;  %v2670_v46 = vrot.slane %v2669_v32, 4 }
 0x3b4   :  { %v2679_v15 = vrot.slane %v2678_v5, 4  ;;  %v2688_v58 = vrot.slane %v2687_v43, 4  ;;  %v2697_v7 = vrot.slane %v2696_v57, 4  ;;  %v2653_v27 = vadd.f32 %v2652_v45, %v2651_v12 }
 0x3b5   :  { %v2662_v56 = vadd.f32 %v2661_v30, %v2660_v6  ;;  %v2706_v35 = vrot.slane %v2705_v3, 4  ;;  %v2752_v11 = vadd.f32 %v2751_v44, %v2667_v14  ;;  %v2671_v4 = vadd.f32 %v2670_v46, %v2669_v32 }
 0x3b6   :  { %v2680_v52 = vadd.f32 %v2679_v15, %v2678_v5  ;;  %v2689_v38 = vadd.f32 %v2688_v58, %v2687_v43  ;;  %v2698_v59 = vadd.f32 %v2697_v7, %v2696_v57  ;;  %v2654_v16 = vrot.slane %v2653_v27, 2 }
 0x3b7   :  { %v2663_v13 = vrot.slane %v2662_v56, 2  ;;  %v2707_v50 = vadd.f32 %v2706_v35, %v2705_v3  ;;  %v2753_v42 = vadd.f32 %v2752_v11, %v2676_v49  ;;  %v2672_v21 = vrot.slane %v2671_v4, 2 }
 0x3b8   :  { %v2681_v25 = vrot.slane %v2680_v52, 2  ;;  %v2690_v39 = vrot.slane %v2689_v38, 2  ;;  %v2699_v19 = vrot.slane %v2698_v59, 2  ;;  %v2655_v29 = vadd.f32 %v2654_v16, %v2653_v27 }
 0x3b9   :  { %v2664_v10 = vadd.f32 %v2663_v13, %v2662_v56  ;;  %v2708_v54 = vrot.slane %v2707_v50, 2  ;;  %v2754_v31 = vadd.f32 %v2753_v42, %v2685_v17  ;;  %v2673_v45 = vadd.f32 %v2672_v21, %v2671_v4 }
 0x3ba   :  { %v2682_v30 = vadd.f32 %v2681_v25, %v2680_v52  ;;  %v2691_v12 = vadd.f32 %v2690_v39, %v2689_v38  ;;  %v2700_v14 = vadd.f32 %v2699_v19, %v2698_v59  ;;  %v2656_v46 = vrot.slane %v2655_v29, 1 }
 0x3bb   :  { %v2665_v15 = vrot.slane %v2664_v10, 1  ;;  %v8181_v58 = vadd.f32 %v2708_v54, %v2707_v50  ;;  %v8183_v7 = vadd.f32 %v2754_v31, %v2694_v26  ;;  %v2674_v35 = vrot.slane %v2673_v45, 1 }
 0x3bc   :  { %v2683_v11 = vrot.slane %v2682_v30, 1  ;;  %v2692_v49 = vrot.slane %v2691_v12, 1  ;;  %v2701_v6 = vrot.slane %v2700_v14, 1  ;;  %v2657_v32 = vadd.f32 %v2656_v46, %v2655_v29 }
 0x3bd   :  { %v2759_v5 = vadd.f32 %v2758_v22, %v2668_v8  ;;  %v8185_v16 = vadd.f32 %v2717_v18, %v2716_v33  ;;  %v2666_v13 = vadd.f32 %v2665_v15, %v2664_v10  ;;  %v2710_v4 = vrot.slane %v8181_v58, 1 }
 0x3be   :  { %v2533_v19 = vmul.f32 %v8066_v9, %v7852_v61  ;;  %v2675_v59 = vadd.f32 %v2674_v35, %v2673_v45  ;;  %v2684_v50 = vadd.f32 %v2683_v11, %v2682_v30  ;;  %v2693_v38 = vadd.f32 %v2692_v49, %v2691_v12 }
 0x3bf   :  { %v2760_v52 = vadd.f32 %v2759_v5, %v2677_v63  ;;  %v2702_v31 = vadd.f32 %v2701_v6, %v2700_v14  ;;  %v8190_v56 = vmul.f32 0.0625, %v2657_v32  ;;  %v2534_v29 = vmul.f32 %v8066_v9, %v7857_v28 }
 0x3c0   :  { %v2577_v8 = vsel %vm2326_vm10, %v2533_v19, 0.0  ;;  %5901 = vmatprep.mubr.msk.f32.mxu0 %vm2326_vm10, %v2533_v19  ;;  %v2535_v10 = vmul.f32 %v8066_v9, %v7862_v62  ;;  %v2536_v61 = vmul.f32 %v8066_v9, %v7867_v36  ;;  %v2537_v63 = vmul.f32 %v8066_v9, %v7876_v40 }
 0x3c1   :  { %v2761_v27 = vadd.f32 %v2760_v52, %v8161_v47  ;;  %v2538_v33 = vmul.f32 %v8066_v9, %v7883_v48  ;;  %v2578_v28 = vsel %vm2326_vm10, %v2534_v29, 0.0  ;;  %5902 = vmatmul.mubr.msk.f32.vlgmr.msra.gmra.mrb[26].mxu0 %vm2326_vm10, %v2534_v29  ;;  %v2539_v47 = vmul.f32 %v8066_v9, %v7892_v24 }
 0x3c2   :  { %v2540_v62 = vmul.f32 %v8066_v9, %v7900_v51  ;;  %v2579_v36 = vadd.f32 %v2578_v28, %v2577_v8  ;;  %v2586_v26 = vsel %vm2326_vm10, %v2535_v10, 0.0  ;;  %5904 = vmatprep.mubr.msk.f32.mxu0 %vm2326_vm10, %v2535_v10  ;;  %v2587_v40 = vsel %vm2326_vm10, %v2536_v61, 0.0 }
 0x3c3   :  { %v8206_v17 = vadd.f32 %v2761_v27, %v8167_v23  ;;  %v2595_v48 = vsel %vm2326_vm10, %v2537_v63, 0.0  ;;  %v2730_v23 = vmul.f32 0.0625, %v2666_v13  ;;  %v8218_v54 = vmul.f32 0.0625, %v2675_v59 }
 0x3c4   :  { %v2588_v43 = vadd.f32 %v2587_v40, %v2586_v26  ;;  %v2596_v57 = vsel %vm2326_vm10, %v2538_v33, 0.0  ;;  %v2580_v3 = vrot.slane %v2579_v36, 4  ;;  %v2604_v44 = vsel %vm2326_vm10, %v2539_v47, 0.0 }
 0x3c5   :  { %v2597_v24 = vadd.f32 %v2596_v57, %v2595_v48  ;;  %v8223_v51 = vsel %vm2326_vm10, %v2540_v62, 0.0  ;;  %v8225_v18 = vmul.f32 0.0625, %v2684_v50  ;;  %v2737_v22 = vadd.f32 %v2586_v26, %v2577_v8  ;;  %5905 = vmatmul.mubr.msk.f32.gmra.mrb[28].mxu0 %vm2326_vm10, %v2536_v61 }
 0x3c6   :  { %v2589_v42 = vrot.slane %v2588_v43, 4  ;;  %v2606_v21 = vadd.f32 %v8223_v51, %v2604_v44  ;;  %v2581_v25 = vadd.f32 %v2580_v3, %v2579_v36  ;;  %5907 = vmatprep.mubr.msk.f32.mxu0 %vm2326_vm10, %v2537_v63  ;;  %v2541_v45 = vmul.f32 %v8066_v9, %v7908_v2 }
 0x3c7   :  { %v2598_v39 = vrot.slane %v2597_v24, 4  ;;  %v2542_v30 = vmul.f32 %v8066_v9, %v7922_v20  ;;  %v8234_v12 = vmul.f32 0.0625, %v2693_v38  ;;  %v8236_v14 = vmul.f32 0.0625, %v2702_v31 }
 0x3c8   :  { %v2590_v46 = vadd.f32 %v2589_v42, %v2588_v43  ;;  %v2607_v15 = vrot.slane %v2606_v21, 4  ;;  %v2582_v35 = vrot.slane %v2581_v25, 2  ;;  %v2613_v49 = vsel %vm2326_vm10, %v2541_v45, 0.0 }
 0x3c9   :  { %v2599_v11 = vadd.f32 %v2598_v39, %v2597_v24  ;;  %v8240_v6 = vsel %vm2326_vm10, %v2542_v30, 0.0  ;;  %v2738_v5 = vadd.f32 %v2737_v22, %v2595_v48  ;;  %5908 = vmatmul.mubr.msk.f32.gmra.mrb[30].mxu0 %vm2326_vm10, %v2538_v33  ;;  %v2744_v52 = vadd.f32 %v2587_v40, %v2578_v28 }
 0x3ca   :  { %v2591_v32 = vrot.slane %v2590_v46, 2  ;;  %v2608_v2 = vadd.f32 %v2607_v15, %v2606_v21  ;;  %v2615_v20 = vadd.f32 %v8240_v6, %v2613_v49  ;;  %v2583_v13 = vadd.f32 %v2582_v35, %v2581_v25  ;;  %5910 = vmatprep.mubr.msk.f32.mxu0 %vm2326_vm10, %v2539_v47 }
 0x3cb   :  { %v2600_v19 = vrot.slane %v2599_v11, 2  ;;  %v2543_v59 = vmul.f32 %v8066_v9, %v7930_v41  ;;  %v2544_v27 = vmul.f32 %v8066_v9, %v7938_v34  ;;  %v2545_v61 = vmul.f32 %v8066_v9, %v7946_v37 }
 0x3cc   :  { %v2592_v50 = vadd.f32 %v2591_v32, %v2590_v46  ;;  %v2609_v38 = vrot.slane %v2608_v2, 2  ;;  %v2616_v31 = vrot.slane %v2615_v20, 4  ;;  %v2584_v29 = vrot.slane %v2583_v13, 1 }
 0x3cd   :  { %v2601_v8 = vadd.f32 %v2600_v19, %v2599_v11  ;;  %v2622_v10 = vsel %vm2326_vm10, %v2543_v59, 0.0  ;;  %v2739_v33 = vadd.f32 %v2738_v5, %v2604_v44  ;;  %5911 = vmatmul.mubr.msk.f32.gmra.mrb[32].mxu0 %vm2326_vm10, %v2540_v62  ;;  %v8255_v26 = vsel %vm2326_vm10, %v2544_v27, 0.0 }
 0x3ce   :  { %v2593_v63 = vrot.slane %v2592_v50, 1  ;;  %v2610_v28 = vadd.f32 %v2609_v38, %v2608_v2  ;;  %v2617_v47 = vadd.f32 %v2616_v31, %v2615_v20  ;;  %v2585_v41 = vadd.f32 %v2584_v29, %v2583_v13  ;;  %5913 = vmatprep.mubr.msk.f32.mxu0 %vm2326_vm10, %v2541_v45 }
 0x3cf   :  { %v2602_v36 = vrot.slane %v2601_v8, 1  ;;  %v2546_v34 = vmul.f32 %v8066_v9, %v7954_v53  ;;  %v3113_v40 = vsel %vm606_vm2, %v2730_v23, %v8190_v56  ;;  %v2624_v43 = vadd.f32 %v8255_v26, %v2622_v10 }
 0x3d0   :  { %v2594_v37 = vadd.f32 %v2593_v63, %v2592_v50  ;;  %v2618_v48 = vrot.slane %v2617_v47, 2  ;;  %v2721_v3 = vmul.f32 0.0625, %v2585_v41  ;;  %v2611_v24 = vrot.slane %v2610_v28, 1 }
 0x3d1   :  { %v2603_v62 = vadd.f32 %v2602_v36, %v2601_v8  ;;  %v2631_v44 = vsel %vm2326_vm10, %v2545_v61, 0.0  ;;  %v2745_v42 = vadd.f32 %v2744_v52, %v2596_v57  ;;  %5914 = vmatmul.mubr.msk.f32.gmra.mrb[34].mxu0 %vm2326_vm10, %v2542_v30  ;;  %v2625_v25 = vrot.slane %v2624_v43, 4 }
 0x3d2   :  { %v2722_v22 = vmul.f32 0.0625, %v2594_v37  ;;  %v2619_v21 = vadd.f32 %v2618_v48, %v2617_v47  ;;  %v2740_v39 = vadd.f32 %v2739_v33, %v2613_v49  ;;  %5916 = vmatprep.mubr.msk.f32.mxu0 %vm2326_vm10, %v2543_v59  ;;  %v8266_v53 = vsel %vm2326_vm10, %v2546_v34, 0.0 }
 0x3d3   :  { %v2547_v56 = vmul.f32 %v8066_v9, %v7962_v0  ;;  %v2548_v23 = vmul.f32 %v8066_v9, %v7970_v55  ;;  %v2723_v45 = vmul.f32 0.0625, %v2603_v62  ;;  %v2626_v15 = vadd.f32 %v2625_v25, %v2624_v43 }
 0x3d4   :  { %v2620_v46 = vrot.slane %v2619_v21, 1  ;;  %v2633_v57 = vadd.f32 %v8266_v53, %v2631_v44  ;;  %v2612_v35 = vadd.f32 %v2611_v24, %v2610_v28  ;;  %v3106_v49 = vsel %vm606_vm2, %v2722_v22, %v2721_v3  ;;  %v10705_v3 = vld [vmem:[#allocation23_spill] sm:$0xff]  ;;  %v10706_v22 = vld [vmem:[#allocation14_spill] sm:$0xff] }
 0x3d5   :  { %v2640_v30 = vsel %vm2326_vm10, %v2547_v56, 0.0  ;;  %v8275_v11 = vsel %vm2326_vm10, %v2548_v23, 0.0  ;;  %v2627_v32 = vrot.slane %v2626_v15, 2  ;;  %5917 = vmatmul.mubr.msk.f32.gmra.mrb[36].mxu0 %vm2326_vm10, %v2544_v27  ;;  %v2746_v9 = vadd.f32 %v2745_v42, %v8223_v51 }
 0x3d6   :  { %v2634_v0 = vrot.slane %v2633_v57, 4  ;;  %v2621_v5 = vadd.f32 %v2620_v46, %v2619_v21  ;;  %v2642_v55 = vadd.f32 %v8275_v11, %v2640_v30  ;;  %5919 = vmatprep.mubr.msk.f32.mxu0 %vm2326_vm10, %v2545_v61  ;;  %v2711_v2 = vadd.f32 %v2710_v4, %v8181_v58 }
 0x3d7   :  { %v2719_v20 = vrot.slane %v8185_v16, 1  ;;  %v3114_v13 = vsel %vm608_vm3, %v8218_v54, %v3113_v40  ;;  %v2628_v52 = vadd.f32 %v2627_v32, %v2626_v15  ;;  %v3107_v50 = vsel %vm608_vm3, %v2723_v45, %v3106_v49  ;;  %v10710_v49 = vld [vmem:[#allocation11_spill] sm:$0xff]  ;;  %v10711_v32 = vld [vmem:[#allocation5_spill] sm:$0xff] }
 0x3d8   :  { %v2635_v19 = vadd.f32 %v2634_v0, %v2633_v57  ;;  %v2643_v59 = vrot.slane %v2642_v55, 4  ;;  %v2741_v38 = vadd.f32 %v2740_v39, %v2622_v10  ;;  %v2724_v31 = vmul.f32 0.0625, %v2612_v35  ;;  %v10709_v35 = vld [vmem:[#allocation10_spill] sm:$0xff]  ;;  %v10712_v0 = vld [vmem:[#allocation12_spill] sm:$0xff] }
 0x3d9   :  { %v2720_v51 = vadd.f32 %v2719_v20, %v8185_v16  ;;  %v3115_v27 = vsel %vm610_vm4, %v8225_v18, %v3114_v13  ;;  %v2629_v8 = vrot.slane %v2628_v52, 1  ;;  %v2725_v4 = vmul.f32 0.0625, %v2621_v5  ;;  %5920 = vmatmul.mubr.msk.f32.gmra.mrb[38].mxu0 %vm2326_vm10, %v2546_v34  ;;  %v10713_v5 = vld [vmem:[#allocation15_spill] sm:$0xff]  ;;  %v10715_v20 = vld [vmem:[#allocation17_spill] sm:$0xff]  ;;  %v10716_v13 = vld [vmem:[#allocation18_spill] sm:$0xff] }
 0x3da   :  { %v2636_v29 = vrot.slane %v2635_v19, 2  ;;  %v2644_v58 = vadd.f32 %v2643_v59, %v2642_v55  ;;  %v3108_v54 = vsel %vm610_vm4, %v2724_v31, %v3107_v50  ;;  %v2735_v61 = vmul.f32 0.0625, %v2711_v2  ;;  %5922 = vmatprep.mubr.msk.f32.mxu0 %vm2326_vm10, %v2547_v56  ;;  %v10707_v56 = vld [vmem:[#allocation8_spill] sm:$0xff]  ;;  %v10719_v59 = vld [vmem:[#allocation21_spill] sm:$0xff]  ;;  %v10720_v50 = vld [vmem:[#allocation22_spill] sm:$0xff] }
 0x3db   :  { %v2736_v63 = vmul.f32 0.0625, %v2720_v51  ;;  %v3116_v33 = vsel %vm612_vm5, %v8234_v12, %v3115_v27  ;;  %v2630_v10 = vadd.f32 %v2629_v8, %v2628_v52  ;;  %v2747_v47 = vadd.f32 %v2746_v9, %v8240_v6  ;;  %v10714_v9 = vld [vmem:[#allocation16_spill] sm:$0xff]  ;;  %v10717_v52 = vld [vmem:[#allocation19_spill] sm:$0xff] }
 0x3dc   :  { %v2637_v16 = vadd.f32 %v2636_v29, %v2635_v19  ;;  %v2645_v28 = vrot.slane %v2644_v58, 2  ;;  %v3117_v18 = vsel %vm614_vm6, %v8236_v14, %v3116_v33  ;;  %v2756_v36 = vadd.f32 %v8183_v7, %v8171_v1  ;;  %v10704_v14 = vld [vmem:[#allocation13_spill] sm:$0xff]  ;;  %v10718_v19 = vld [vmem:[#allocation20_spill] sm:$0xff]  ;;  %v10722_v31 = vld [vmem:[#allocation7_spill] sm:$0xff] }
 0x3dd   :  { %v3118_v41 = vsel %vm616_vm7, %v2735_v61, %v3117_v18  ;;  %v3109_v37 = vsel %vm612_vm5, %v2725_v4, %v3108_v54  ;;  %5923 = vmatmul.mubr.msk.f32.gmra.mrb[40].mxu0 %vm2326_vm10, %v2548_v23  ;;  %v2726_v48 = vmul.f32 0.0625, %v2630_v10  ;;  %v2742_v43 = vadd.f32 %v2741_v38, %v2631_v44  ;;  %v10708_v23 = vld [vmem:[#allocation9_spill] sm:$0xff]  ;;  %v10721_v38 = vld [vmem:[#allocation6_spill] sm:$0xff] }
 0x3de   :  { %v2638_v34 = vrot.slane %v2637_v16, 1  ;;  %v2646_v40 = vadd.f32 %v2645_v28, %v2644_v58  ;;  %v3119_v12 = vsel %vm618_vm8, %v2736_v63, %v3118_v41  ;;  %5925 = vmatprep.mubr.msk.f32.mxu0 %vm2326_vm10, %v8078_v60  ;;  %v2757_v6 = vadd.f32 %v2756_v36, %v10704_v14  ;;  %v2575_v60 = vld [vmem:[%s10449_s9 + $0x10] sm:$0xff] }
 0x3df   :  { %v2763_v62 = vadd.f32 %v8206_v17, %v10705_v3  ;;  %v3110_v7 = vsel %vm614_vm6, %v2726_v48, %v3109_v37  ;;  %v2748_v21 = vadd.f32 %v2747_v47, %v8255_v26  ;;  %v2743_v44 = vadd.f32 %v2742_v43, %v2640_v30  ;;  %v2576_v17 = vld [vmem:[%s10449_s9 + $0x18] sm:$0xff] }
 0x3e0   :  { %v2639_v24 = vadd.f32 %v2638_v34, %v2637_v16  ;;  %v2647_v1 = vrot.slane %v2646_v40, 1  ;;  %v6006_v57 = vpack.c.bf16 %v2576_v17, %v2575_v60  ;;  %v2767_v2 = vmul.f32 0.125, %v2757_v6  ;;  %v10723_v6 = vld [vmem:[#allocation3_spill] sm:$0xff]  ;;  %v10724_v60 = vld [vmem:[#allocation4_spill] sm:$0xff] }
 0x3e1   :  { %v2764_v42 = vadd.f32 %v2763_v62, %v10706_v22  ;;  %5926 = vmatmul.mubr.msk.f32.gmra.mrb[42].mxu0 %vm2326_vm10, %v10707_v56  ;;  %v2749_v46 = vadd.f32 %v2748_v21, %v8266_v53  ;;  %v2765_v30 = vmul.f32 0.125, %v2743_v44  ;;  %v10507_v51 = vmov 8  }
 0x3e2   :  { %v2648_v25 = vadd.f32 %v2647_v1, %v2646_v40  ;;  %v2727_v39 = vmul.f32 0.0625, %v2639_v24  ;;  %5928 = vmatprep.mubr.msk.f32.mxu0 %vm2326_vm10, %v10708_v23  ;;  %6026 = vset.pattern.permute.xlu1 %v10507_v51  ;;  %v10512_v27 = vmov 4  }
 0x3e3   :  { %v2750_v53 = vadd.f32 %v2749_v46, %v8275_v11  ;;  %v2768_v11 = vmul.f32 0.125, %v2764_v42  ;;  %6025 = vset.pattern.permute.xlu0 %v10512_v27 }
 0x3e4   :  { %v2728_v45 = vmul.f32 0.0625, %v2648_v25  ;;  %v3111_v26 = vsel %vm616_vm7, %v2727_v39, %v3110_v7 }
 0x3e5   :  { %5929 = vmatmul.mubr.msk.f32.gmra.mrb[44].mxu0 %vm2326_vm10, %v10709_v35  ;;  %v2766_v55 = vmul.f32 0.125, %v2750_v53 }
 0x3e6   :  { %v3112_v15 = vsel %vm618_vm8, %v2728_v45, %v3111_v26  ;;  %5931 = vmatprep.mubr.msk.f32.mxu0 %vm2326_vm10, %v10710_v49 }
 0x3e7   :  { %5957 = vmatprep.mubr.msk.f32.mxu1 %vm2326_vm10, %v3112_v15 }
 0x3e8   :  { %5958 = vmatmul.mubr.msk.f32.vlgmr.msra.gmra.mrb[50].mxu1 %vm2326_vm10, %v3119_v12 }
 0x3e9   :  { %6005 = vmatpush3.bf16.msra.mxu1 %v10711_v32  ;;  %5968 = vmatprep.mubr.msk.f32.mxu1 %vm2326_vm10, %v2765_v30 }
 0x3ea   :  { %6007 = vmatprep.subr.bf16.mxu1 %v6006_v57  ;;  %5932 = vmatmul.mubr.msk.f32.gmra.mrb[46].mxu0 %vm2326_vm10, %v10712_v0 }
 0x3eb   :  { %5934 = vmatprep.mubr.msk.f32.mxu0 %vm2326_vm10, %v10713_v5 }
 0x3ed   :  { %6009 = vmatpush3.bf16.msra.mxu1 %v6006_v57 }
 0x3ee   :  { %5935 = vmatmul.mubr.msk.f32.gmra.mrb[48].mxu0 %vm2326_vm10, %v10714_v9 }
 0x3ef   :  { %5937 = vmatprep.mubr.msk.f32.mxu0 %vm2326_vm10, %v10715_v20 }
 0x3f0   :  { %5969 = vmatmul.mubr.msk.f32.vlgmr.msra.gmra.mrb[52].mxu1 %vm2326_vm10, %v2766_v55 }
 0x3f1   :  { %5971 = vmatprep.mubr.msk.f32.mxu1 %vm2326_vm10, %v2767_v2 }
 0x3f2   :  { %5938 = vmatmul.mubr.msk.f32.gmra.mrb[50].mxu0 %vm2326_vm10, %v10716_v13 }
 0x3f3   :  { %5940 = vmatprep.mubr.msk.f32.mxu0 %vm2326_vm10, %v10717_v52 }
 0x3f4   :  { %5972 = vmatmul.mubr.msk.f32.gmra.mrb[54].mxu1 %vm2326_vm10, %v2768_v11 }
 0x3f6   :  { %5941 = vmatmul.mubr.msk.f32.gmra.mrb[52].mxu0 %vm2326_vm10, %v10718_v19 }
 0x3f7   :  { %5943 = vmatprep.mubr.msk.f32.mxu0 %vm2326_vm10, %v10719_v59 }
 0x3fa   :  { %5944 = vmatmul.mubr.msk.f32.gmra.mrb[54].mxu0 %vm2326_vm10, %v10720_v50 }
 0x3fb   :  { %5946 = vmatprep.mubr.msk.f32.mxu0 %vm2326_vm10, %v10721_v38 }
 0x3fe   :  { %5947 = vmatmul.mubr.msk.f32.gmra.mrb[56].mxu0 %vm2326_vm10, %v10722_v31 }
 0x494   :  { %v5903_v29 = vpop.f32.mrb[26].mxu0 }
 0x495   :  { %v2931_v8 = vpop.f32.mrb[27].mxu0 }
 0x498   :  { %v5906_v58 = vpop.f32.mrb[28].mxu0 }
 0x499   :  { %v2941_v4 = vpop.f32.mrb[29].mxu0 }
 0x49c   :  { %v5909_v54 = vpop.f32.mrb[30].mxu0 }
 0x49d   :  { %v2951_v61 = vpop.f32.mrb[31].mxu0 }
 0x4a0   :  { %v5912_v63 = vpop.f32.mrb[32].mxu0 }
 0x4a1   :  { %v2961_v33 = vpop.f32.mrb[33].mxu0 }
 0x4a4   :  { %v5915_v10 = vpop.f32.mrb[34].mxu0 }
 0x4a5   :  { %v2971_v16 = vpop.f32.mrb[35].mxu0 }
 0x4a8   :  { %v8363_v28 = vpop.f32.mrb[36].mxu0 }
 0x4a9   :  { %v8365_v18 = vpop.f32.mrb[37].mxu0 }
 0x4ac   :  { %v5921_v47 = vpop.f32.mrb[38].mxu0 }
 0x4ad   :  { %v2991_v41 = vpop.f32.mrb[39].mxu0 }
 0x4b0   :  { %v8367_v36 = vpop.f32.mrb[40].mxu0 }
 0x4b1   :  { %v8369_v34 = vpop.f32.mrb[41].mxu0 }
 0x4b4   :  { %v5927_v40 = vpop.f32.mrb[42].mxu0 }
 0x4b5   :  { %v3011_v37 = vpop.f32.mrb[43].mxu0 }
 0x4b8   :  { %v8371_v12 = vpop.f32.mrb[44].mxu0 }
 0x4b9   :  { %v8373_v48 = vpop.f32.mrb[45].mxu0 }
 0x4bb   :  { %v5959_v43 = vpop.f32.mrb[50].mxu1 }
 0x4bc   :  { %v3250_v14 = vcombine.high %v5959_v43, %v5959_v43  ;;  %v3257_v3 = vrot.slane %v5959_v43, %v10723_v6  ;;  %v3190_v62 = vpop.f32.mrb[51].mxu1 }
 0x4bd   :  { %v3201_v24 = vcombine.high %v3190_v62, %v3190_v62  ;;  %v3208_v1 = vrot.slane %v3190_v62, %v10723_v6  ;;  %v8377_v7 = vpop.f32.mrb[46].mxu0 }
 0x4be   :  { %v3265_v22 = vcombine.high %v3257_v3, %v3257_v3  ;;  %v8380_v42 = vrot.slane %v3257_v3, %v10723_v6  ;;  %v8382_v21 = vpop.f32.mrb[47].mxu0  ;;  %v8387_v44 = vrot.slane %v3250_v14, %v10723_v6 }
 0x4bf   :  { %v3215_v25 = vrot.slane %v3201_v24, %v10723_v6  ;;  %v3216_v39 = vcombine.high %v3208_v1, %v3208_v1  ;;  %v3224_v56 = vrot.slane %v3208_v1, %v10723_v6 }
 0x4c0   :  { %v3334_v17 = vrot.slane %v8380_v42, %v10724_v60  ;;  %v8392_v23 = vrot.slane %v3265_v22, %v10723_v6  ;;  %v3295_v45 = vcombine.high %v8380_v42, %v8380_v42 }
 0x4c1   :  { %v3217_v26 = vcombine.high %v3215_v25, %v3215_v25  ;;  %v3231_v46 = vrot.slane %v3215_v25, %v10723_v6  ;;  %v3238_v15 = vrot.slane %v3216_v39, %v10723_v6  ;;  %v3246_v57 = vcombine.high %v3224_v56, %v3224_v56  ;;  %v8398_v35 = vpop.f32.mrb[48].mxu0 }
 0x4c2   :  { %v3302_v30 = vrot.slane %v3224_v56, %v10724_v60  ;;  %v3396_v49 = vadd.f32 %v5927_v40, %v3334_v17  ;;  %v3395_v32 = vadd.f32 %v3334_v17, %v3011_v37  ;;  %v3338_v53 = vrot.slane %v8392_v23, %v10724_v60  ;;  %v8403_v0 = vpop.f32.mrb[49].mxu0 }
 0x4c3   :  { %v3247_v5 = vcombine.high %v3231_v46, %v3231_v46  ;;  %v3248_v55 = vcombine.high %v3238_v15, %v3238_v15  ;;  %v3306_v9 = vrot.slane %v3238_v15, %v10724_v60  ;;  %v3310_v2 = vrot.slane %v3246_v57, %v10724_v60  ;;  %v8407_v20 = vpop.f32.mrb[52].mxu1 }
 0x4c4   :  { %v3318_v11 = vrot.slane %v3231_v46, %v10724_v60  ;;  %v3379_v13 = vadd.f32 %v3302_v30, %v2931_v8  ;;  %v3380_v52 = vadd.f32 %v5903_v29, %v3302_v30  ;;  %v3245_v19 = vrot.slane %v3217_v26, %v10723_v6  ;;  %v8411_v59 = vpop.f32.mrb[53].mxu1 }
 0x4c5   :  { %v3314_v50 = vrot.slane %v3248_v55, %v10724_v60  ;;  %v3326_v38 = vrot.slane %v3247_v5, %v10724_v60  ;;  %v3381_v31 = vadd.f32 %v3306_v9, %v2941_v4  ;;  %v3382_v40 = vadd.f32 %v5906_v58, %v3306_v9  ;;  %v8415_v37 = vpop.f32.mrb[50].mxu0 }
 0x4c6   :  { %v3383_v43 = vadd.f32 %v3310_v2, %v2951_v61  ;;  %v3384_v14 = vadd.f32 %v5909_v54, %v3310_v2  ;;  %v3387_v3 = vadd.f32 %v3318_v11, %v2971_v16  ;;  %v3388_v62 = vadd.f32 %v5915_v10, %v3318_v11  ;;  %v8417_v24 = vpop.f32.mrb[51].mxu0 }
 0x4c7   :  { %v3385_v8 = vadd.f32 %v3314_v50, %v2961_v33  ;;  %v3386_v29 = vadd.f32 %v5912_v63, %v3314_v50  ;;  %v3391_v1 = vadd.f32 %v3326_v38, %v2991_v41  ;;  %v3392_v22 = vadd.f32 %v5921_v47, %v3326_v38  ;;  %v8419_v25 = vpop.f32.mrb[54].mxu1 }
 0x4c8   :  { %v3249_v39 = vcombine.high %v3245_v19, %v3245_v19  ;;  %v3322_v56 = vrot.slane %v3245_v19, %v10724_v60  ;;  %v8423_v4 = vadd.f32 %v8407_v20, %v3380_v52  ;;  %v8426_v58 = vadd.f32 %v8407_v20, %v3382_v40  ;;  %v8428_v54 = vpop.f32.mrb[55].mxu1 }
 0x4c9   :  { %v8431_v61 = vadd.f32 %v8407_v20, %v3384_v14  ;;  %v8434_v63 = vadd.f32 %v8407_v20, %v3386_v29  ;;  %v8437_v33 = vadd.f32 %v8407_v20, %v3388_v62  ;;  %v8440_v10 = vadd.f32 %v8407_v20, %v3392_v22  ;;  %v8442_v16 = vpop.f32.mrb[52].mxu0 }
 0x4ca   :  { %v3330_v47 = vrot.slane %v3249_v39, %v10724_v60  ;;  %v3389_v41 = vadd.f32 %v3322_v56, %v8365_v18  ;;  %v3390_v17 = vadd.f32 %v8363_v28, %v3322_v56  ;;  %v8448_v26 = vadd.f32 %v8411_v59, %v3379_v13  ;;  %v8450_v46 = vpop.f32.mrb[53].mxu0 }
 0x4cb   :  { %v8453_v15 = vadd.f32 %v8411_v59, %v3381_v31  ;;  %v8456_v57 = vadd.f32 %v8411_v59, %v3383_v43  ;;  %v8459_v30 = vadd.f32 %v8411_v59, %v3385_v8  ;;  %v8462_v5 = vadd.f32 %v8411_v59, %v3387_v3 }
 0x4cc   :  { %v8465_v18 = vadd.f32 %v8367_v36, %v3330_v47  ;;  %v8468_v28 = vadd.f32 %v3330_v47, %v8369_v34  ;;  %v8471_v55 = vadd.f32 %v8407_v20, %v3390_v17  ;;  %v8474_v9 = vadd.f32 %v8411_v59, %v3389_v41 }
 0x4cd   :  { %v8477_v2 = vadd.f32 %v8411_v59, %v3391_v1  ;;  %v3398_v11 = vadd.f32 %v8371_v12, %v3338_v53  ;;  %v8481_v13 = vadd.f32 %v8419_v25, %v3396_v49  ;;  %v3397_v36 = vadd.f32 %v3338_v53, %v8373_v48  ;;  %v8484_v52 = vpop.f32.mrb[54].mxu0 }
 0x4ce   :  { %v8487_v34 = vadd.f32 %v8428_v54, %v3395_v32  ;;  %v8489_v19 = vpop.f32.mrb[55].mxu0  ;;  %v3342_v12 = vrot.slane %v3295_v45, %v10724_v60  ;;  %v3297_v49 = vcombine.high %v8392_v23, %v8392_v23  ;;  %v8505_v38 = vrot.slane %v8387_v44, %v10723_v6 }
 0x4cf   :  { %v3527_v50 = vadd.f32 %v8419_v25, %v3398_v11  ;;  %v3585_v48 = vsel %vm70_vm1, %v8481_v13, 0.0  ;;  %v3526_v53 = vadd.f32 %v8428_v54, %v3397_v36 }
 0x4d0   :  { %v3570_v32 = vsel %vm70_vm1, %v8487_v34, 0.0  ;;  %v3400_v23 = vadd.f32 %v8377_v7, %v3342_v12  ;;  %v3399_v7 = vadd.f32 %v3342_v12, %v8382_v21  ;;  %v3346_v56 = vrot.slane %v3297_v49, %v10724_v60 }
 0x4d1   :  { %v3586_v31 = vsel %vm70_vm1, %v3527_v50, 0.0  ;;  %v3773_v42 = vsel %vm3690_vm11, %v3527_v50, 0.0  ;;  %v3934_v45 = vsel %vm3851_vm12, %v3527_v50, 0.0  ;;  %v8511_v40 = vpop.f32.mrb[56].mxu0  ;;  %v3571_v14 = vsel %vm70_vm1, %v3526_v53, 0.0 }
 0x4d2   :  { %v3587_v43 = vadd.f32 %v3586_v31, %v3585_v48  ;;  %v3772_v3 = vsel %vm3690_vm11, %v3526_v53, 0.0  ;;  %v3933_v62 = vsel %vm3851_vm12, %v3526_v53, 0.0  ;;  %v8516_v8 = vpop.f32.mrb[57].mxu0  ;;  %v3572_v29 = vadd.f32 %v3571_v14, %v3570_v32 }
 0x4d3   :  { %v8518_v1 = vadd.f32 %v3773_v42, %v3772_v3  ;;  %v8520_v22 = vadd.f32 %v3934_v45, %v3933_v62  ;;  %v3529_v39 = vadd.f32 %v8419_v25, %v3400_v23  ;;  %v3350_v41 = vrot.slane %v8505_v38, %v10724_v60 }
 0x4d4   :  { %v3528_v36 = vadd.f32 %v8428_v54, %v3399_v7  ;;  %v3402_v50 = vadd.f32 %v8398_v35, %v3346_v56  ;;  %v3266_v48 = vcombine.high %v8387_v44, %v8387_v44  ;;  %v3401_v21 = vadd.f32 %v3346_v56, %v8403_v0 }
 0x4d5   :  { %v3588_v47 = vsel %vm70_vm1, %v3529_v39, 0.0  ;;  %v3782_v11 = vsel %vm3690_vm11, %v3529_v39, 0.0  ;;  %v3943_v53 = vsel %vm3851_vm12, %v3529_v39, 0.0  ;;  %v3404_v12 = vadd.f32 %v8415_v37, %v3350_v41 }
 0x4d6   :  { %v3589_v17 = vadd.f32 %v3588_v47, %v3587_v43  ;;  %v3573_v49 = vsel %vm70_vm1, %v3528_v36, 0.0  ;;  %v3781_v32 = vsel %vm3690_vm11, %v3528_v36, 0.0  ;;  %v3942_v31 = vsel %vm3851_vm12, %v3528_v36, 0.0 }
 0x4d7   :  { %v3531_v42 = vadd.f32 %v8419_v25, %v3402_v50  ;;  %v3574_v45 = vadd.f32 %v3573_v49, %v3572_v29  ;;  %v8540_v23 = vadd.f32 %v3782_v11, %v3781_v32  ;;  %v8542_v35 = vadd.f32 %v3943_v53, %v3942_v31 }
 0x4d8   :  { %v3294_v37 = vrot.slane %v3266_v48, %v10723_v6  ;;  %v3530_v3 = vadd.f32 %v8428_v54, %v3401_v21  ;;  %v3533_v62 = vadd.f32 %v8419_v25, %v3404_v12  ;;  %v3403_v39 = vadd.f32 %v3350_v41, %v8417_v24 }
 0x4d9   :  { %v3590_v44 = vsel %vm70_vm1, %v3531_v42, 0.0  ;;  %v3791_v0 = vsel %vm3690_vm11, %v3531_v42, 0.0  ;;  %v3952_v14 = vsel %vm3851_vm12, %v3531_v42, 0.0  ;;  %v3852_v31 = vsel %vm3851_vm12, %v8448_v26, 0.0 }
 0x4da   :  { %v3591_v43 = vadd.f32 %v3590_v44, %v3589_v17  ;;  %v3575_v29 = vsel %vm70_vm1, %v3530_v3, 0.0  ;;  %v3790_v7 = vsel %vm3690_vm11, %v3530_v3, 0.0  ;;  %v3951_v56 = vsel %vm3851_vm12, %v3530_v3, 0.0 }
 0x4db   :  { %v3576_v47 = vadd.f32 %v3575_v29, %v3574_v45  ;;  %v8554_v17 = vadd.f32 %v3791_v0, %v3790_v7  ;;  %v8556_v11 = vadd.f32 %v3952_v14, %v3951_v56  ;;  %v3592_v6 = vsel %vm70_vm1, %v3533_v62, 0.0 }
 0x4dc   :  { %v3354_v36 = vrot.slane %v3294_v37, %v10724_v60  ;;  %v3593_v50 = vadd.f32 %v3592_v6, %v3591_v43  ;;  %v3800_v48 = vsel %vm3690_vm11, %v3533_v62, 0.0  ;;  %v3532_v24 = vadd.f32 %v8428_v54, %v3403_v39 }
 0x4dd   :  { %v3961_v21 = vsel %vm3851_vm12, %v3533_v62, 0.0  ;;  %v3853_v43 = vsel %vm3851_vm12, %v8423_v4, 0.0 }
 0x4de   :  { %v3406_v41 = vadd.f32 %v8442_v16, %v3354_v36  ;;  %v3405_v53 = vadd.f32 %v3354_v36, %v8450_v46  ;;  %v3577_v12 = vsel %vm70_vm1, %v3532_v24, 0.0  ;;  %v3799_v49 = vsel %vm3690_vm11, %v3532_v24, 0.0 }
 0x4df   :  { %v3960_v32 = vsel %vm3851_vm12, %v3532_v24, 0.0  ;;  %v3578_v42 = vadd.f32 %v3577_v12, %v3576_v47  ;;  %v8570_v45 = vadd.f32 %v3800_v48, %v3799_v49  ;;  %v3854_v0 = vadd.f32 %v3853_v43, %v3852_v31 }
 0x4e0   :  { %v8572_v44 = vadd.f32 %v3961_v21, %v3960_v32  ;;  %v3535_v16 = vadd.f32 %v8419_v25, %v3406_v41  ;;  %v3534_v46 = vadd.f32 %v8428_v54, %v3405_v53  ;;  %v3691_v24 = vsel %vm3690_vm11, %v8448_v26, 0.0 }
 0x4e1   :  { %v3855_v48 = vrot.slane %v3854_v0, 4  ;;  %v3692_v41 = vsel %vm3690_vm11, %v8423_v4, 0.0  ;;  %v3296_v21 = vcombine.high %v8505_v38, %v8505_v38  ;;  %v3298_v12 = vcombine.high %v3294_v37, %v3294_v37 }
 0x4e2   :  { %v3594_v14 = vsel %vm70_vm1, %v3535_v16, 0.0  ;;  %v3809_v3 = vsel %vm3690_vm11, %v3535_v16, 0.0  ;;  %v3970_v62 = vsel %vm3851_vm12, %v3535_v16, 0.0  ;;  %v3579_v29 = vsel %vm70_vm1, %v3534_v46, 0.0 }
 0x4e3   :  { %v3595_v39 = vadd.f32 %v3594_v14, %v3593_v50  ;;  %v3808_v7 = vsel %vm3690_vm11, %v3534_v46, 0.0  ;;  %v3969_v56 = vsel %vm3851_vm12, %v3534_v46, 0.0  ;;  %v3580_v47 = vadd.f32 %v3579_v29, %v3578_v42 }
 0x4e4   :  { %v8584_v6 = vadd.f32 %v3809_v3, %v3808_v7  ;;  %v8586_v36 = vadd.f32 %v3970_v62, %v3969_v56  ;;  %v3693_v53 = vadd.f32 %v3692_v41, %v3691_v24  ;;  %v3856_v50 = vadd.f32 %v3855_v48, %v3854_v0 }
 0x4e5   :  { %v3358_v31 = vrot.slane %v3296_v21, %v10724_v60  ;;  %v3362_v42 = vrot.slane %v3298_v12, %v10724_v60 }
 0x4e6   :  { %v3694_v49 = vrot.slane %v3693_v53, 4  ;;  %v3857_v32 = vrot.slane %v3856_v50, 2 }
 0x4e7   :  { %v3408_v43 = vadd.f32 %v8484_v52, %v3358_v31  ;;  %v3407_v14 = vadd.f32 %v3358_v31, %v8489_v19  ;;  %v3410_v3 = vadd.f32 %v8511_v40, %v3362_v42  ;;  %v3409_v0 = vadd.f32 %v3362_v42, %v8516_v8 }
 0x4e8   :  { %v3695_v16 = vadd.f32 %v3694_v49, %v3693_v53  ;;  %v3858_v46 = vadd.f32 %v3857_v32, %v3856_v50 }
 0x4e9   :  { %v3537_v38 = vadd.f32 %v8419_v25, %v3408_v43  ;;  %v3536_v37 = vadd.f32 %v8428_v54, %v3407_v14  ;;  %v8603_v7 = vadd.f32 %v8419_v25, %v3410_v3  ;;  %v8606_v48 = vadd.f32 %v8428_v54, %v3409_v0 }
 0x4ea   :  { %v3696_v62 = vrot.slane %v3695_v16, 2  ;;  %v3859_v29 = vrot.slane %v3858_v46, 1  ;;  %v3701_v3 = vsel %vm3690_vm11, %v8426_v58, 0.0 }
 0x4eb   :  { %v3596_v19 = vsel %vm70_vm1, %v3537_v38, 0.0  ;;  %v3818_v40 = vsel %vm3690_vm11, %v3537_v38, 0.0  ;;  %v3979_v24 = vsel %vm3851_vm12, %v3537_v38, 0.0  ;;  %v3581_v53 = vsel %vm70_vm1, %v3536_v37, 0.0 }
 0x4ec   :  { %v3697_v56 = vadd.f32 %v3696_v62, %v3695_v16  ;;  %v3860_v52 = vadd.f32 %v3859_v29, %v3858_v46  ;;  %v8611_v41 = vadd.f32 %v3596_v19, %v3595_v39  ;;  %v3817_v50 = vsel %vm3690_vm11, %v3536_v37, 0.0 }
 0x4ed   :  { %v8617_v21 = vadd.f32 %v3581_v53, %v3580_v47  ;;  %v8619_v54 = vadd.f32 %v3818_v40, %v3817_v50  ;;  %v3978_v12 = vsel %vm3851_vm12, %v3536_v37, 0.0  ;;  %v3827_v31 = vsel %vm3690_vm11, %v8603_v7, 0.0 }
 0x4ee   :  { %v3698_v8 = vrot.slane %v3697_v56, 1  ;;  %v8615_v25 = vmul.f32 0.0625, %v3860_v52  ;;  %v8622_v32 = vadd.f32 %v3979_v24, %v3978_v12  ;;  %v3988_v39 = vsel %vm3851_vm12, %v8603_v7, 0.0 }
 0x4ef   :  { %10726 = vst [vmem:[#allocation23_spill] sm:$0xff] %v8619_v54  ;;  %v3826_v42 = vsel %vm3690_vm11, %v8606_v48, 0.0  ;;  %v3700_v47 = vsel %vm3690_vm11, %v8453_v15, 0.0  ;;  %v3987_v43 = vsel %vm3851_vm12, %v8606_v48, 0.0  ;;  %v3709_v62 = vsel %vm3690_vm11, %v8456_v57, 0.0 }
 0x4f0   :  { %10725 = vst [vmem:[#allocation13_spill] sm:$0xff] %v8615_v25  ;;  %v3699_v49 = vadd.f32 %v3698_v8, %v3697_v56  ;;  %4118 = vperm.xlu1 %6026, %v8615_v25   ;;  %v8635_v46 = vadd.f32 %v3827_v31, %v3826_v42  ;;  %v8639_v14 = vadd.f32 %v3988_v39, %v3987_v43  ;;  %v3710_v29 = vsel %vm3690_vm11, %v8431_v61, 0.0 }
 0x4f1   :  { %v3702_v0 = vadd.f32 %v3701_v3, %v3700_v47  ;;  %v10501_v38 = vmov 9   ;;  %v3711_v37 = vadd.f32 %v3710_v29, %v3709_v62  ;;  %v3727_v56 = vsel %vm3690_vm11, %v8462_v5, 0.0 }
 0x4f2   :  { %v8633_v16 = vmul.f32 0.0625, %v3699_v49  ;;  %10728 = vst [vmem:[#allocation8_spill] sm:$0xff] %v8639_v14  ;;  %v3728_v19 = vsel %vm3690_vm11, %v8437_v33, 0.0  ;;  %v10503_v8 = vmov 5   ;;  %v3861_v50 = vsel %vm3851_vm12, %v8453_v15, 0.0 }
 0x4f3   :  { %v3703_v52 = vrot.slane %v3702_v0, 4  ;;  %v3712_v40 = vrot.slane %v3711_v37, 4  ;;  %v3729_v24 = vadd.f32 %v3728_v19, %v3727_v56  ;;  %v10499_v31 = vmov 7  }
 0x4f4   :  { %10727 = vst [vmem:[#allocation14_spill] sm:$0xff] %v8633_v16  ;;  %4014 = vperm.xlu0 %6025, %v8633_v16   ;;  %6028 = vset.pattern.permute.xlu1 %v10501_v38  ;;  %v3862_v42 = vsel %vm3851_vm12, %v8426_v58, 0.0  ;;  %v3925_v62 = vsel %vm3851_vm12, %v8481_v13, 0.0  ;;  %v3870_v29 = vsel %vm3851_vm12, %v8456_v57, 0.0  ;;  %v3924_v56 = vsel %vm3851_vm12, %v8487_v34, 0.0 }
 0x4f5   :  { %4373 = vperm.xlu1 %6028, %v8615_v25   ;;  %v3704_v53 = vadd.f32 %v3703_v52, %v3702_v0  ;;  %v3713_v12 = vadd.f32 %v3712_v40, %v3711_v37  ;;  %v3730_v49 = vrot.slane %v3729_v24, 4  ;;  %v3863_v3 = vadd.f32 %v3862_v42, %v3861_v50 }
 0x4f6   :  { %v3871_v37 = vsel %vm3851_vm12, %v8431_v61, 0.0  ;;  %v10505_v52 = vmov 6  }
 0x4f7   :  { %v3705_v39 = vrot.slane %v3704_v53, 2  ;;  %v3714_v47 = vrot.slane %v3713_v12, 2  ;;  %v3731_v43 = vadd.f32 %v3730_v49, %v3729_v24  ;;  %v3864_v24 = vrot.slane %v3863_v3, 4 }
 0x4f8   :  { %6027 = vset.pattern.permute.xlu0 %v10503_v8  ;;  %v3872_v49 = vadd.f32 %v3871_v37, %v3870_v29  ;;  %v3736_v29 = vsel %vm3690_vm11, %v8474_v9, 0.0  ;;  %v10520_v37 = vmov 10  }
 0x4f9   :  { %4285 = vperm.xlu0 %6027, %v8633_v16   ;;  %6031 = vset.pattern.permute.xlu1 %v10499_v31  ;;  %v3706_v0 = vadd.f32 %v3705_v39, %v3704_v53  ;;  %v3715_v19 = vadd.f32 %v3714_v47, %v3713_v12  ;;  %v3732_v40 = vrot.slane %v3731_v43, 2  ;;  %v3888_v53 = vsel %vm3851_vm12, %v8462_v5, 0.0 }
 0x4fa   :  { %4829 = vperm.xlu1 %6031, %v8633_v16   ;;  %v3889_v39 = vsel %vm3851_vm12, %v8437_v33, 0.0  ;;  %v3865_v38 = vadd.f32 %v3864_v24, %v3863_v3  ;;  %v3873_v12 = vrot.slane %v3872_v49, 4  ;;  %v8677_v47 = vadd.f32 %v3925_v62, %v3924_v56 }
 0x4fb   :  { %v3707_v50 = vrot.slane %v3706_v0, 1  ;;  %v3716_v42 = vrot.slane %v3715_v19, 1  ;;  %v3733_v31 = vadd.f32 %v3732_v40, %v3731_v43  ;;  %v3890_v8 = vadd.f32 %v3889_v39, %v3888_v53 }
 0x4fc   :  { %v3874_v60 = vadd.f32 %v3873_v12, %v3872_v49  ;;  %v3737_v43 = vsel %vm3690_vm11, %v8471_v55, 0.0  ;;  %v3763_v40 = vsel %vm3690_vm11, %v8487_v34, 0.0  ;;  %v10515_v49 = vmov 11  }
 0x4fd   :  { %6029 = vset.pattern.permute.xlu0 %v10505_v52  ;;  %v3708_v52 = vadd.f32 %v3707_v50, %v3706_v0  ;;  %v3717_v51 = vadd.f32 %v3716_v42, %v3715_v19  ;;  %v3891_v14 = vrot.slane %v3890_v8, 4  ;;  %v3764_v0 = vsel %vm3690_vm11, %v8481_v13, 0.0 }
 0x4fe   :  { %4605 = vperm.xlu0 %6029, %v8633_v16   ;;  %6033 = vset.pattern.permute.xlu1 %v10512_v27  ;;  %v3866_v16 = vrot.slane %v3865_v38, 2  ;;  %v3734_v27 = vrot.slane %v3733_v31, 1  ;;  %v3875_v56 = vrot.slane %v3874_v60, 2  ;;  %v8690_v19 = vadd.f32 %v3737_v43, %v3736_v29 }
 0x4ff   :  { %v8682_v54 = vmul.f32 0.0625, %v3708_v52  ;;  %v3892_v62 = vadd.f32 %v3891_v14, %v3890_v8  ;;  %v3906_v52 = vsel %vm3851_vm12, %v8477_v2, 0.0  ;;  %v8698_v14 = vmul.f32 0.0625, %v3717_v51 }
 0x500   :  { %v3867_v3 = vadd.f32 %v3866_v16, %v3865_v38  ;;  %v3907_v16 = vsel %vm3851_vm12, %v8440_v10, 0.0  ;;  %v3735_v38 = vadd.f32 %v3734_v27, %v3733_v31  ;;  %v3876_v13 = vadd.f32 %v3875_v56, %v3874_v60 }
 0x501   :  { %10729 = vst [vmem:[#allocation9_spill] sm:$0xff] %v8682_v54  ;;  %4019 = vperm.xlu1 %6033, %v8682_v54   ;;  %v3893_v50 = vrot.slane %v3892_v62, 2  ;;  %10730 = vst [vmem:[#allocation10_spill] sm:$0xff] %v8698_v14  ;;  %v8700_v8 = vadd.f32 %v3907_v16, %v3906_v52  ;;  %v3718_v42 = vsel %vm3690_vm11, %v8459_v30, 0.0  ;;  %v3719_v34 = vsel %vm3690_vm11, %v8434_v63, 0.0 }
 0x502   :  { %6030 = vset.pattern.permute.xlu0 %v10520_v37  ;;  %v3868_v24 = vrot.slane %v3867_v3, 1  ;;  %v3877_v51 = vrot.slane %v3876_v13, 1  ;;  %v8709_v60 = vadd.f32 %v3719_v34, %v3718_v42  ;;  %v8711_v31 = vadd.f32 %v3764_v0, %v3763_v40 }
 0x503   :  { %4685 = vperm.xlu0 %6030, %v8615_v25   ;;  %v3894_v39 = vadd.f32 %v3893_v50, %v3892_v62  ;;  %v8713_v12 = vmul.f32 0.0625, %v3735_v38  ;;  %v3897_v62 = vsel %vm3851_vm12, %v8474_v9, 0.0  ;;  %v10733_v56 = vmov 8  }
 0x504   :  { %v3869_v53 = vadd.f32 %v3868_v24, %v3867_v3  ;;  %v3878_v43 = vadd.f32 %v3877_v51, %v3876_v13  ;;  %v3898_v52 = vsel %vm3851_vm12, %v8471_v55, 0.0  ;;  %v3745_v50 = vsel %vm3690_vm11, %v8477_v2, 0.0 }
 0x505   :  { %4024 = vperm.xlu1 %6033, %v8698_v14   ;;  %v3895_v27 = vrot.slane %v3894_v39, 1  ;;  %10731 = vst [vmem:[#allocation11_spill] sm:$0xff] %v8713_v12  ;;  %v8724_v0 = vadd.f32 %v3898_v52, %v3897_v62  ;;  %v3746_v16 = vsel %vm3690_vm11, %v8440_v10, 0.0  ;;  %v3879_v13 = vsel %vm3851_vm12, %v8459_v30, 0.0 }
 0x506   :  { %v8715_v29 = vmul.f32 0.0625, %v3869_v53  ;;  %v8726_v40 = vmul.f32 0.0625, %v3878_v43  ;;  %v8735_v38 = vadd.f32 %v3746_v16, %v3745_v50  ;;  %v3880_v53 = vsel %vm3851_vm12, %v8434_v63, 0.0 }
 0x507   :  { %6032 = vset.pattern.permute.xlu0 %v10515_v49  ;;  %v3896_v3 = vadd.f32 %v3895_v27, %v3894_v39  ;;  %v3927_v39 = vrot.slane %v8677_v47, 4  ;;  %v8744_v42 = vadd.f32 %v3880_v53, %v3879_v13  ;;  %v3522_v34 = vadd.f32 %v8411_v59, %v8468_v28 }
 0x508   :  { %4909 = vperm.xlu0 %6032, %v8615_v25   ;;  %10732 = vst [vmem:[#allocation5_spill] sm:$0xff] %v8715_v29  ;;  %10734 = vst [vmem:[#allocation12_spill] sm:$0xff] %v8726_v40  ;;  %v10736_v51 = vmov 5   ;;  %v10737_v27 = vmov 9   ;;  %v3540_v43 = vsel %vm70_vm1, %v8448_v26, 0.0  ;;  %v3543_v59 = vsel %vm70_vm1, %v8456_v57, 0.0 }
 0x509   :  { %4034 = vperm.xlu1 %6033, %v8713_v12   ;;  %v8728_v24 = vmul.f32 0.0625, %v3896_v3  ;;  %v3541_v3 = vsel %vm70_vm1, %v8453_v15, 0.0  ;;  %v3928_v52 = vadd.f32 %v3927_v39, %v8677_v47  ;;  %v3545_v50 = vsel %vm70_vm1, %v8459_v30, 0.0 }
 0x50a   :  { %v3542_v62 = vadd.f32 %v3541_v3, %v3540_v43  ;;  %v3739_v16 = vrot.slane %v8690_v19, 4  ;;  %v3547_v13 = vsel %vm70_vm1, %v8462_v5, 0.0  ;;  %v3523_v47 = vadd.f32 %v8407_v20, %v8465_v18 }
 0x50b   :  { %10735 = vst [vmem:[#allocation15_spill] sm:$0xff] %v8728_v24  ;;  %v3929_v15 = vrot.slane %v3928_v52, 2  ;;  %v3555_v57 = vsel %vm70_vm1, %v8423_v4, 0.0  ;;  %v3556_v30 = vsel %vm70_vm1, %v8426_v58, 0.0  ;;  %v3549_v39 = vsel %vm70_vm1, %v8474_v9, 0.0 }
 0x50c   :  { %6034 = vset.pattern.permute.xlu0 %v10733_v56  ;;  %v3544_v28 = vadd.f32 %v3543_v59, %v3542_v62  ;;  %v3557_v43 = vadd.f32 %v3556_v30, %v3555_v57  ;;  %v3754_v5 = vsel %vm3690_vm11, %v3522_v34, 0.0  ;;  %v3915_v20 = vsel %vm3851_vm12, %v3522_v34, 0.0 }
 0x50d   :  { %4123 = vperm.xlu0 %6034, %v8715_v29   ;;  %6035 = vset.pattern.permute.xlu1 %v10733_v56  ;;  %v3558_v18 = vsel %vm70_vm1, %v8431_v61, 0.0  ;;  %v3930_v4 = vadd.f32 %v3929_v15, %v3928_v52  ;;  %v3740_v58 = vadd.f32 %v3739_v16, %v8690_v19  ;;  %v3551_v9 = vsel %vm70_vm1, %v8477_v2, 0.0 }
 0x50e   :  { %4128 = vperm.xlu1 %6035, %v8726_v40   ;;  %v3546_v26 = vadd.f32 %v3545_v50, %v3544_v28  ;;  %v3559_v62 = vadd.f32 %v3558_v18, %v3557_v43  ;;  %v3560_v28 = vsel %vm70_vm1, %v8434_v63, 0.0  ;;  %v3755_v50 = vsel %vm3690_vm11, %v3523_v47, 0.0 }
 0x50f   :  { %v3909_v2 = vrot.slane %v8700_v8, 4  ;;  %v3562_v63 = vsel %vm70_vm1, %v8437_v33, 0.0  ;;  %v3931_v15 = vrot.slane %v3930_v4, 1  ;;  %v3564_v16 = vsel %vm70_vm1, %v8471_v55, 0.0 }
 0x510   :  { %v3548_v53 = vadd.f32 %v3547_v13, %v3546_v26  ;;  %v3916_v26 = vsel %vm3851_vm12, %v3523_v47, 0.0  ;;  %v3553_v13 = vsel %vm70_vm1, %v3522_v34, 0.0  ;;  %v3561_v61 = vadd.f32 %v3560_v28, %v3559_v62 }
 0x511   :  { %4138 = vperm.xlu0 %6034, %v8728_v24   ;;  %v8791_v52 = vadd.f32 %v3916_v26, %v3915_v20  ;;  %v3741_v57 = vrot.slane %v3740_v58, 2  ;;  %v3566_v43 = vsel %vm70_vm1, %v8440_v10, 0.0  ;;  %v10738_v33 = vmov 6  }
 0x512   :  { %6036 = vset.pattern.permute.xlu1 %v10736_v51  ;;  %v3550_v3 = vadd.f32 %v3549_v39, %v3548_v53  ;;  %v8789_v53 = vadd.f32 %v3755_v50, %v3754_v5  ;;  %v3563_v34 = vadd.f32 %v3562_v63, %v3561_v61  ;;  %v3910_v39 = vadd.f32 %v3909_v2, %v8700_v8 }
 0x513   :  { %4289 = vperm.xlu1 %6036, %v8682_v54   ;;  %v3932_v5 = vadd.f32 %v3931_v15, %v3930_v4  ;;  %v3721_v20 = vrot.slane %v8709_v60, 4  ;;  %v3598_v55 = vsel %vm70_vm1, %v8603_v7, 0.0  ;;  %v3568_v10 = vsel %vm70_vm1, %v3523_v47, 0.0 }
 0x514   :  { %v3552_v59 = vadd.f32 %v3551_v9, %v3550_v3  ;;  %v3565_v30 = vadd.f32 %v3564_v16, %v3563_v34  ;;  %v3583_v3 = vsel %vm70_vm1, %v8606_v48, 0.0  ;;  %v3742_v8 = vadd.f32 %v3741_v57, %v3740_v58 }
 0x515   :  { %6037 = vset.pattern.permute.xlu0 %v10737_v27  ;;  %v3911_v48 = vrot.slane %v3910_v39, 2  ;;  %v8819_v62 = vadd.f32 %v3583_v3, %v8617_v21  ;;  %v8821_v4 = vmul.f32 0.0625, %v3932_v5  ;;  %v8825_v28 = vadd.f32 %v3598_v55, %v8611_v41 }
 0x516   :  { %4377 = vperm.xlu0 %6037, %v8715_v29   ;;  %v8795_v19 = vadd.f32 %v3553_v13, %v3552_v59  ;;  %v3567_v18 = vadd.f32 %v3566_v43, %v3565_v30  ;;  %v3722_v59 = vadd.f32 %v3721_v20, %v8709_v60  ;;  %v3743_v7 = vrot.slane %v3742_v8, 1 }
 0x517   :  { %4293 = vperm.xlu1 %6036, %v8698_v14   ;;  %10739 = vst [vmem:[#allocation16_spill] sm:$0xff] %v8821_v4  ;;  %v3912_v47 = vadd.f32 %v3911_v48, %v3910_v39  ;;  %v10740_v41 = vmov 7   ;;  %v10742_v13 = vmov 4   ;;  %v3766_v63 = vrot.slane %v8711_v31, 4 }
 0x518   :  { %v8816_v9 = vadd.f32 %v3568_v10, %v3567_v18  ;;  %v3723_v58 = vrot.slane %v3722_v59, 2  ;;  %v3744_v21 = vadd.f32 %v3743_v7, %v3742_v8  ;;  %v3900_v39 = vrot.slane %v8724_v0, 4 }
 0x519   :  { %v3913_v60 = vrot.slane %v3912_v47, 1  ;;  %v3767_v16 = vadd.f32 %v3766_v63, %v8711_v31  ;;  %v3748_v48 = vrot.slane %v8735_v38, 4  ;;  %v3882_v7 = vrot.slane %v8744_v42, 4 }
 0x51a   :  { %4389 = vperm.xlu0 %6037, %v8728_v24   ;;  %v3724_v50 = vadd.f32 %v3723_v58, %v3722_v59  ;;  %v8835_v26 = vmul.f32 0.0625, %v3744_v21  ;;  %v3901_v43 = vadd.f32 %v3900_v39, %v8724_v0 }
 0x51b   :  { %4301 = vperm.xlu1 %6036, %v8713_v12   ;;  %v3914_v61 = vadd.f32 %v3913_v60, %v3912_v47  ;;  %v3768_v30 = vrot.slane %v3767_v16, 2  ;;  %v3749_v59 = vadd.f32 %v3748_v48, %v8735_v38  ;;  %v3883_v58 = vadd.f32 %v3882_v7, %v8744_v42 }
 0x51c   :  { %10741 = vst [vmem:[#allocation17_spill] sm:$0xff] %v8835_v26  ;;  %v3725_v2 = vrot.slane %v3724_v50, 1  ;;  %v3902_v5 = vrot.slane %v3901_v43, 2  ;;  %v3757_v48 = vrot.slane %v8789_v53, 4 }
 0x51d   :  { %v8842_v15 = vmul.f32 0.0625, %v3914_v61  ;;  %v3769_v31 = vadd.f32 %v3768_v30, %v3767_v16  ;;  %v3750_v47 = vrot.slane %v3749_v59, 2  ;;  %v3884_v60 = vrot.slane %v3883_v58, 2 }
 0x51e   :  { %6040 = vset.pattern.permute.xlu0 %v10520_v37  ;;  %v3726_v34 = vadd.f32 %v3725_v2, %v3724_v50  ;;  %v3903_v0 = vadd.f32 %v3902_v5, %v3901_v43 }
 0x51f   :  { %4689 = vperm.xlu0 %6040, %v8715_v29   ;;  %6038 = vset.pattern.permute.xlu1 %v10737_v27  ;;  %10743 = vst [vmem:[#allocation18_spill] sm:$0xff] %v8842_v15  ;;  %v3770_v3 = vrot.slane %v3769_v31, 1  ;;  %v3751_v21 = vadd.f32 %v3750_v47, %v3749_v59  ;;  %v3885_v50 = vadd.f32 %v3884_v60, %v3883_v58  ;;  %v3775_v47 = vrot.slane %v8518_v1, 4 }
 0x520   :  { %4381 = vperm.xlu1 %6038, %v8726_v40   ;;  %v8849_v57 = vmul.f32 0.0625, %v3726_v34  ;;  %v3904_v55 = vrot.slane %v3903_v0, 1  ;;  %v3758_v58 = vadd.f32 %v3757_v48, %v8789_v53  ;;  %v3918_v60 = vrot.slane %v8791_v52, 4 }
 0x521   :  { %v3771_v20 = vadd.f32 %v3770_v3, %v3769_v31  ;;  %v3752_v38 = vrot.slane %v3751_v21, 1  ;;  %v3886_v2 = vrot.slane %v3885_v50, 1  ;;  %v3600_v31 = vmul.f32 0.125, %v8795_v19 }
 0x522   :  { %10744 = vst [vmem:[#allocation19_spill] sm:$0xff] %v8849_v57  ;;  %v3905_v10 = vadd.f32 %v3904_v55, %v3903_v0  ;;  %v3601_v3 = vmul.f32 0.125, %v8816_v9 }
 0x523   :  { %4693 = vperm.xlu0 %6040, %v8726_v40   ;;  %v8866_v18 = vmul.f32 0.0625, %v3771_v20  ;;  %v3753_v61 = vadd.f32 %v3752_v38, %v3751_v21  ;;  %v3887_v34 = vadd.f32 %v3886_v2, %v3885_v50  ;;  %v3776_v38 = vadd.f32 %v3775_v47, %v8518_v1 }
 0x524   :  { %6039 = vset.pattern.permute.xlu1 %v10738_v33  ;;  %v8875_v8 = vmul.f32 0.0625, %v3905_v10  ;;  %v3759_v50 = vrot.slane %v3758_v58, 2 }
 0x525   :  { %4609 = vperm.xlu1 %6039, %v8682_v54   ;;  %10745 = vst [vmem:[#allocation20_spill] sm:$0xff] %v8866_v18  ;;  %v8896_v42 = vmul.f32 0.0625, %v3753_v61  ;;  %v8901_v30 = vmul.f32 0.0625, %v3887_v34  ;;  %v3936_v34 = vrot.slane %v8520_v22, 4  ;;  %v3777_v53 = vrot.slane %v3776_v38, 2 }
 0x526   :  { %10746 = vst [vmem:[#allocation21_spill] sm:$0xff] %v8875_v8 }
 0x527   :  { %6047 = vset.pattern.permute.xlu0 %v10515_v49  ;;  %10747 = vst [vmem:[#allocation22_spill] sm:$0xff] %v8896_v42  ;;  %10748 = vst [vmem:[#allocation6_spill] sm:$0xff] %v8901_v30  ;;  %v3937_v48 = vadd.f32 %v3936_v34, %v8520_v22  ;;  %v10754_v22 = vmov 10  }
 0x528   :  { %4925 = vperm.xlu0 %6047, %v8728_v24  }
 0x529   :  { %4613 = vperm.xlu1 %6039, %v8698_v14  }
 0x52c   :  { %6049 = vset.pattern.permute.xlu0 %v10733_v56 }
 0x52d   :  { %4158 = vperm.xlu0 %6049, %v8821_v4   ;;  %4621 = vperm.xlu1 %6039, %v8713_v12  }
 0x531   :  { %6051 = vset.pattern.permute.xlu0 %v10737_v27  ;;  %6041 = vset.pattern.permute.xlu1 %v10740_v41 }
 0x532   :  { %4405 = vperm.xlu0 %6051, %v8821_v4   ;;  %4833 = vperm.xlu1 %6041, %v8682_v54  }
 0x536   :  { %6057 = vset.pattern.permute.xlu0 %v10742_v13  ;;  %6042 = vset.pattern.permute.xlu1 %v10515_v49 }
 0x537   :  { %4039 = vperm.xlu0 %6057, %v8835_v26   ;;  %4913 = vperm.xlu1 %6042, %v8715_v29   ;;  %v10770_v29 = vmov 11  }
 0x53b   :  { %6059 = vset.pattern.permute.xlu0 %v10733_v56  ;;  %6043 = vset.pattern.permute.xlu1 %v10740_v41 }
 0x53c   :  { %4148 = vperm.xlu0 %6059, %v8842_v15   ;;  %4837 = vperm.xlu1 %6043, %v8698_v14  }
 0x540   :  { %6060 = vset.pattern.permute.xlu0 %v10736_v51  ;;  %6044 = vset.pattern.permute.xlu1 %v10515_v49 }
 0x541   :  { %4297 = vperm.xlu0 %6060, %v8849_v57   ;;  %4917 = vperm.xlu1 %6044, %v8726_v40  }
 0x545   :  { %4305 = vperm.xlu0 %6060, %v8835_v26   ;;  %6045 = vset.pattern.permute.xlu1 %v10520_v37 }
 0x546   :  { %4701 = vperm.xlu1 %6045, %v8728_v24  }
 0x549   :  { %6063 = vset.pattern.permute.xlu0 %v10737_v27 }
 0x54a   :  { %4397 = vperm.xlu0 %6063, %v8842_v15   ;;  %6046 = vset.pattern.permute.xlu1 %v10740_v41 }
 0x54b   :  { %4845 = vperm.xlu1 %6046, %v8713_v12  }
 0x54e   :  { %6064 = vset.pattern.permute.xlu0 %v10738_v33 }
 0x54f   :  { %4617 = vperm.xlu0 %6064, %v8849_v57   ;;  %6048 = vset.pattern.permute.xlu1 %v10742_v13 }
 0x550   :  { %4054 = vperm.xlu1 %6048, %v8866_v18  }
 0x553   :  { %4625 = vperm.xlu0 %6064, %v8835_v26  }
 0x554   :  { %6050 = vset.pattern.permute.xlu1 %v10736_v51 }
 0x555   :  { %4317 = vperm.xlu1 %6050, %v8866_v18  }
 0x557   :  { %6067 = vset.pattern.permute.xlu0 %v10740_v41 }
 0x558   :  { %4841 = vperm.xlu0 %6067, %v8849_v57  }
 0x559   :  { %6052 = vset.pattern.permute.xlu1 %v10738_v33 }
 0x55a   :  { %4637 = vperm.xlu1 %6052, %v8866_v18  }
 0x55c   :  { %6071 = vset.pattern.permute.xlu0 %v10515_v49 }
 0x55d   :  { %4929 = vperm.xlu0 %6071, %v8875_v8  }
 0x55e   :  { %6053 = vset.pattern.permute.xlu1 %v10520_v37 }
 0x55f   :  { %4717 = vperm.xlu1 %6053, %v8821_v4  }
 0x561   :  { %4933 = vperm.xlu0 %6071, %v8842_v15  }
 0x563   :  { %6054 = vset.pattern.permute.xlu1 %v10740_v41 }
 0x564   :  { %4861 = vperm.xlu1 %6054, %v8866_v18  }
 0x568   :  { %6055 = vset.pattern.permute.xlu1 %v10515_v49 }
 0x569   :  { %4941 = vperm.xlu1 %6055, %v8821_v4   ;;  %v3778_v4 = vadd.f32 %v3777_v53, %v3776_v38 }
 0x56b   :  { %v3779_v24 = vrot.slane %v3778_v4, 1 }
 0x56d   :  { %6056 = vset.pattern.permute.xlu1 %v10742_v13  ;;  %v3780_v25 = vadd.f32 %v3779_v24, %v3778_v4 }
 0x56e   :  { %4029 = vperm.xlu1 %6056, %v8849_v57  }
 0x56f   :  { %v8894_v63 = vpop.permute.xlu1 %4118 }
 0x572   :  { %4044 = vperm.xlu1 %6056, %v8896_v42  }
 0x573   :  { %v8908_v43 = vpop.permute.xlu0 %4014 }
 0x574   :  { %v8899_v16 = vpop.permute.xlu1 %4373 }
 0x576   :  { %6058 = vset.pattern.permute.xlu1 %v10733_v56 }
 0x577   :  { %4133 = vperm.xlu1 %6058, %v8901_v30  }
 0x578   :  { %v8916_v20 = vpop.permute.xlu0 %4285 }
 0x579   :  { %v8905_v39 = vpop.permute.xlu1 %4829 }
 0x57a   :  { %10749 = vst [vmem:[#allocation7_spill] sm:$0xff] %v8905_v39 }
 0x57b   :  { %4143 = vperm.xlu1 %6058, %v8875_v8  }
 0x57d   :  { %v8922_v19 = vpop.permute.xlu0 %4605 }
 0x57e   :  { %10750 = vst [vmem:[#allocation3_spill] sm:$0xff] %v8922_v19 }
 0x57f   :  { %3604 = vxpose.xlu0.b32.start [1/2] (short) (narrow) %v3600_v31, 8  ;;  %6061 = vset.pattern.permute.xlu1 %v10736_v51  ;;  %v3919_v31 = vadd.f32 %v3918_v60, %v8791_v52  ;;  %v3938_v52 = vrot.slane %v3937_v48, 2 }
 0x580   :  { %v8913_v5 = vpop.permute.xlu1 %4019  ;;  %4309 = vperm.xlu1 %6061, %v8896_v42  }
 0x581   :  { %v3939_v34 = vadd.f32 %v3938_v52, %v3937_v48  ;;  %v8981_v48 = vmul.f32 0.0625, %v3780_v25  ;;  %v3945_v25 = vrot.slane %v8542_v35, 4 }
 0x582   :  { %v8927_v9 = vpop.permute.xlu0 %4685 }
 0x583   :  { %3605 = vxpose.xlu0.b32.end [2/2] (short) (narrow) %v3601_v3, 8  ;;  %10751 = vst [vmem:[#allocation24_spill] sm:$0xff] %v8927_v9  ;;  %v3760_v3 = vadd.f32 %v3759_v50, %v3758_v58  ;;  %10758 = vst [vmem:[#allocation30_spill] sm:$0xff] %v8981_v48 }
 0x584   :  { %v8918_v0 = vpop.permute.xlu1 %4024  ;;  %6062 = vset.pattern.permute.xlu1 %v10737_v27 }
 0x585   :  { %4385 = vperm.xlu1 %6062, %v8901_v30   ;;  %v3761_v18 = vrot.slane %v3760_v3, 1 }
 0x587   :  { %v8937_v7 = vpop.permute.xlu0 %4909  ;;  %v3762_v58 = vadd.f32 %v3761_v18, %v3760_v3 }
 0x588   :  { %v8924_v55 = vpop.permute.xlu1 %4034  ;;  %10752 = vst [vmem:[#allocation25_spill] sm:$0xff] %v8937_v7 }
 0x589   :  { %4393 = vperm.xlu1 %6062, %v8875_v8   ;;  %v8971_v53 = vmul.f32 0.0625, %v3762_v58 }
 0x58b   :  { %10756 = vst [vmem:[#allocation28_spill] sm:$0xff] %v8971_v53 }
 0x58c   :  { %v8948_v61 = vpop.permute.xlu0 %4123 }
 0x58d   :  { %v8929_v10 = vpop.permute.xlu1 %4128  ;;  %6065 = vset.pattern.permute.xlu1 %v10738_v33 }
 0x58e   :  { %4629 = vperm.xlu1 %6065, %v8896_v42  }
 0x590   :  { %v8957_v1 = vpop.permute.xlu0 %4138 }
 0x592   :  { %v8934_v59 = vpop.permute.xlu1 %4289  ;;  %6066 = vset.pattern.permute.xlu1 %v10520_v37 }
 0x593   :  { %4697 = vperm.xlu1 %6066, %v8901_v30  }
 0x595   :  { %v8965_v50 = vpop.permute.xlu0 %4377 }
 0x596   :  { %v8942_v21 = vpop.permute.xlu1 %4293 }
 0x597   :  { %6068 = vset.pattern.permute.xlu1 %v10515_v49  ;;  %v3920_v49 = vrot.slane %v3919_v31, 2 }
 0x598   :  { %4921 = vperm.xlu1 %6068, %v8901_v30  }
 0x599   :  { %v3921_v60 = vadd.f32 %v3920_v49, %v3919_v31  ;;  %v3940_v49 = vrot.slane %v3939_v34, 1  ;;  %v8975_v31 = vpop.permute.xlu0 %4389 }
 0x59a   :  { %v8950_v2 = vpop.permute.xlu1 %4301 }
 0x59b   :  { %v3941_v24 = vadd.f32 %v3940_v49, %v3939_v34  ;;  %v3784_v49 = vrot.slane %v8540_v23, 4 }
 0x59c   :  { %6069 = vset.pattern.permute.xlu1 %v10520_v37 }
 0x59d   :  { %4705 = vperm.xlu1 %6069, %v8875_v8   ;;  %v3922_v8 = vrot.slane %v3921_v60, 1 }
 0x59e   :  { %v8987_v4 = vpop.permute.xlu0 %4689 }
 0x59f   :  { %v8959_v47 = vpop.permute.xlu1 %4381  ;;  %v3923_v18 = vadd.f32 %v3922_v8, %v3921_v60  ;;  %10760 = vst [vmem:[#allocation32_spill] sm:$0xff] %v8987_v4  ;;  %v8994_v8 = vmul.f32 0.0625, %v3941_v24  ;;  %v3603_v4 = vmul.f32 0.125, %v8825_v28 }
 0x5a1   :  { %6070 = vset.pattern.permute.xlu1 %v10740_v41  ;;  %v8984_v52 = vmul.f32 0.0625, %v3923_v18  ;;  %10762 = vst [vmem:[#allocation34_spill] sm:$0xff] %v8994_v8  ;;  %v3946_v18 = vadd.f32 %v3945_v25, %v8542_v35 }
 0x5a2   :  { %4849 = vperm.xlu1 %6070, %v8835_v26   ;;  %v9000_v34 = vpop.permute.xlu0 %4693 }
 0x5a3   :  { %10759 = vst [vmem:[#allocation31_spill] sm:$0xff] %v8984_v52  ;;  %10764 = vst [vmem:[#allocation36_spill] sm:$0xff] %v9000_v34 }
 0x5a4   :  { %v8963_v37 = vpop.permute.xlu1 %4609 }
 0x5a5   :  { %10753 = vst [vmem:[#allocation26_spill] sm:$0xff] %v8963_v37 }
 0x5a6   :  { %6072 = vset.pattern.permute.xlu1 %v10754_v22 }
 0x5a7   :  { %4709 = vperm.xlu1 %6072, %v8842_v15   ;;  %v3785_v15 = vadd.f32 %v3784_v49, %v8540_v23  ;;  %v9012_v26 = vpop.permute.xlu0 %4925  ;;  %v3793_v49 = vrot.slane %v8554_v17, 4 }
 0x5a8   :  { %v8969_v38 = vpop.permute.xlu1 %4613  ;;  %10766 = vst [vmem:[#allocation38_spill] sm:$0xff] %v9012_v26 }
 0x5a9   :  { %10755 = vst [vmem:[#allocation27_spill] sm:$0xff] %v8969_v38  ;;  %v3786_v12 = vrot.slane %v3785_v15, 2 }
 0x5ab   :  { %6073 = vset.pattern.permute.xlu1 %v10740_v41  ;;  %v3787_v23 = vadd.f32 %v3786_v12, %v3785_v15 }
 0x5ac   :  { %6074 = vset.pattern.permute.xlu0 %v10742_v13  ;;  %v8978_v3 = vpop.permute.xlu1 %4621  ;;  %4853 = vperm.xlu1 %6073, %v8896_v42   ;;  %v3947_v42 = vrot.slane %v3946_v18, 2  ;;  %v9019_v25 = vpop.permute.xlu0 %4158 }
 0x5ad   :  { %4049 = vperm.xlu0 %6074, %v8971_v53   ;;  %10757 = vst [vmem:[#allocation29_spill] sm:$0xff] %v8978_v3  ;;  %10768 = vst [vmem:[#allocation40_spill] sm:$0xff] %v9019_v25  ;;  %v3788_v14 = vrot.slane %v3787_v23, 1 }
 0x5ae   :  { %v3948_v35 = vadd.f32 %v3947_v42, %v3946_v18  ;;  %v3794_v42 = vadd.f32 %v3793_v49, %v8554_v17 }
 0x5b0   :  { %6075 = vset.pattern.permute.xlu1 %v10733_v56  ;;  %v3949_v40 = vrot.slane %v3948_v35, 1  ;;  %v3795_v54 = vrot.slane %v3794_v42, 2 }
 0x5b1   :  { %4059 = vperm.xlu0 %6074, %v8981_v48   ;;  %v8989_v58 = vpop.permute.xlu1 %4833  ;;  %4153 = vperm.xlu1 %6075, %v8984_v52   ;;  %v9030_v18 = vpop.permute.xlu0 %4405 }
 0x5b2   :  { %10761 = vst [vmem:[#allocation33_spill] sm:$0xff] %v8989_v58  ;;  %10771 = vst [vmem:[#allocation42_spill] sm:$0xff] %v9030_v18  ;;  %v3950_v12 = vadd.f32 %v3949_v40, %v3948_v35  ;;  %v3796_v40 = vadd.f32 %v3795_v54, %v3794_v42 }
 0x5b4   :  { %v9038_v25 = vmul.f32 0.0625, %v3950_v12 }
 0x5b5   :  { %6076 = vset.pattern.permute.xlu0 %v10736_v51  ;;  %4163 = vperm.xlu1 %6075, %v8994_v8  }
 0x5b6   :  { %4313 = vperm.xlu0 %6076, %v8971_v53   ;;  %v8998_v60 = vpop.permute.xlu1 %4913  ;;  %10773 = vst [vmem:[#allocation44_spill] sm:$0xff] %v9038_v25  ;;  %v9041_v17 = vpop.permute.xlu0 %4039 }
 0x5b7   :  { %10763 = vst [vmem:[#allocation35_spill] sm:$0xff] %v8998_v60 }
 0x5b9   :  { %6077 = vset.pattern.permute.xlu1 %v10737_v27 }
 0x5ba   :  { %4321 = vperm.xlu0 %6076, %v8981_v48   ;;  %4401 = vperm.xlu1 %6077, %v8984_v52  }
 0x5bb   :  { %v9007_v24 = vpop.permute.xlu1 %4837 }
 0x5bc   :  { %10765 = vst [vmem:[#allocation37_spill] sm:$0xff] %v9007_v24 }
 0x5be   :  { %6078 = vset.pattern.permute.xlu0 %v10738_v33  ;;  %4409 = vperm.xlu1 %6077, %v8994_v8  }
 0x5bf   :  { %4633 = vperm.xlu0 %6078, %v8971_v53  }
 0x5c0   :  { %v9015_v30 = vpop.permute.xlu1 %4917 }
 0x5c1   :  { %10767 = vst [vmem:[#allocation39_spill] sm:$0xff] %v9015_v30 }
 0x5c2   :  { %6079 = vset.pattern.permute.xlu1 %v10754_v22 }
 0x5c3   :  { %4641 = vperm.xlu0 %6078, %v8981_v48   ;;  %4721 = vperm.xlu1 %6079, %v8994_v8  }
 0x5c5   :  { %v9024_v57 = vpop.permute.xlu1 %4701 }
 0x5c6   :  { %10769 = vst [vmem:[#allocation41_spill] sm:$0xff] %v9024_v57 }
 0x5c7   :  { %6080 = vset.pattern.permute.xlu0 %v10740_v41  ;;  %6081 = vset.pattern.permute.xlu1 %v10770_v29 }
 0x5c8   :  { %4865 = vperm.xlu0 %6080, %v8981_v48   ;;  %4945 = vperm.xlu1 %6081, %v8994_v8   ;;  %v3789_v48 = vadd.f32 %v3788_v14, %v3787_v23  ;;  %v3954_v8 = vrot.slane %v8556_v11, 4  ;;  %v3797_v14 = vrot.slane %v3796_v40, 1 }
 0x5ca   :  { %v9033_v15 = vpop.permute.xlu1 %4845  ;;  %v9046_v35 = vmul.f32 0.0625, %v3789_v48  ;;  %v3955_v12 = vadd.f32 %v3954_v8, %v8556_v11  ;;  %v3798_v54 = vadd.f32 %v3797_v14, %v3796_v40  ;;  %v3802_v40 = vrot.slane %v8570_v45, 4 }
 0x5cb   :  { %10772 = vst [vmem:[#allocation43_spill] sm:$0xff] %v9033_v15 }
 0x5cc   :  { %6082 = vset.pattern.permute.xlu0 %v10754_v22  ;;  %6083 = vset.pattern.permute.xlu1 %v10740_v41  ;;  %10775 = vst [vmem:[#allocation46_spill] sm:$0xff] %v9046_v35  ;;  %v3956_v48 = vrot.slane %v3955_v12, 2  ;;  %v9068_v11 = vmul.f32 0.0625, %v3798_v54  ;;  %v3803_v54 = vadd.f32 %v3802_v40, %v8570_v45 }
 0x5cd   :  { %4713 = vperm.xlu0 %6082, %v8984_v52   ;;  %4857 = vperm.xlu1 %6083, %v8971_v53   ;;  %v9056_v53 = vpop.permute.xlu0 %4148 }
 0x5ce   :  { %10778 = vst [vmem:[#allocation49_spill] sm:$0xff] %v9068_v11  ;;  %v3957_v8 = vadd.f32 %v3956_v48, %v3955_v12 }
 0x5cf   :  { %v9043_v49 = vpop.permute.xlu1 %4054 }
 0x5d0   :  { %10774 = vst [vmem:[#allocation45_spill] sm:$0xff] %v9043_v49  ;;  %v3958_v14 = vrot.slane %v3957_v8, 1 }
 0x5d1   :  { %6085 = vset.pattern.permute.xlu0 %v10733_v56  ;;  %6084 = vset.pattern.permute.xlu1 %v10742_v13  ;;  %v9064_v18 = vpop.permute.xlu0 %4297 }
 0x5d2   :  { %4168 = vperm.xlu0 %6085, %v9038_v25   ;;  %4064 = vperm.xlu1 %6084, %v9046_v35  }
 0x5d4   :  { %v9052_v23 = vpop.permute.xlu1 %4317 }
 0x5d5   :  { %10776 = vst [vmem:[#allocation47_spill] sm:$0xff] %v9052_v23  ;;  %v3963_v23 = vrot.slane %v8572_v44, 4  ;;  %v9078_v26 = vpop.permute.xlu0 %4305 }
 0x5d6   :  { %6087 = vset.pattern.permute.xlu0 %v10737_v27  ;;  %6086 = vset.pattern.permute.xlu1 %v10736_v51 }
 0x5d7   :  { %4413 = vperm.xlu0 %6087, %v9038_v25   ;;  %4325 = vperm.xlu1 %6086, %v9046_v35  }
 0x5d9   :  { %v9061_v42 = vpop.permute.xlu1 %4637 }
 0x5da   :  { %10777 = vst [vmem:[#allocation48_spill] sm:$0xff] %v9061_v42  ;;  %v3964_v42 = vadd.f32 %v3963_v23, %v8572_v44  ;;  %v3804_v44 = vrot.slane %v3803_v54, 2 }
 0x5db   :  { %6090 = vset.pattern.permute.xlu0 %v10740_v41  ;;  %6088 = vset.pattern.permute.xlu1 %v10738_v33 }
 0x5dc   :  { %4869 = vperm.xlu0 %6090, %v9046_v35   ;;  %4645 = vperm.xlu1 %6088, %v9046_v35   ;;  %v3965_v48 = vrot.slane %v3964_v42, 2  ;;  %v3959_v35 = vadd.f32 %v3958_v14, %v3957_v8  ;;  %v3805_v45 = vadd.f32 %v3804_v44, %v3803_v54  ;;  %v3811_v8 = vrot.slane %v8584_v6, 4 }
 0x5de   :  { %v9072_v49 = vpop.permute.xlu1 %4717  ;;  %v9094_v30 = vmul.f32 0.0625, %v3959_v35  ;;  %v3806_v35 = vrot.slane %v3805_v45, 1 }
 0x5df   :  { %10779 = vst [vmem:[#allocation50_spill] sm:$0xff] %v9072_v49  ;;  %v9088_v49 = vpop.permute.xlu0 %4397 }
 0x5e0   :  { %6092 = vset.pattern.permute.xlu0 %v10742_v13  ;;  %6089 = vset.pattern.permute.xlu1 %v10754_v22  ;;  %10782 = vst [vmem:[#allocation53_spill] sm:$0xff] %v9094_v30  ;;  %v3807_v7 = vadd.f32 %v3806_v35, %v3805_v45  ;;  %v3972_v45 = vrot.slane %v8586_v36, 4 }
 0x5e1   :  { %4069 = vperm.xlu0 %6092, %v9068_v11   ;;  %4725 = vperm.xlu1 %6089, %v9038_v25  }
 0x5e3   :  { %v9082_v12 = vpop.permute.xlu1 %4861  ;;  %v9100_v14 = vpop.permute.xlu0 %4617 }
 0x5e4   :  { %10780 = vst [vmem:[#allocation51_spill] sm:$0xff] %v9082_v12  ;;  %v3966_v12 = vadd.f32 %v3965_v48, %v3964_v42  ;;  %10783 = vst [vmem:[#allocation54_spill] sm:$0xff] %v9100_v14  ;;  %v3812_v42 = vadd.f32 %v3811_v8, %v8584_v6 }
 0x5e5   :  { %6094 = vset.pattern.permute.xlu0 %v10736_v51  ;;  %6091 = vset.pattern.permute.xlu1 %v10770_v29 }
 0x5e6   :  { %4329 = vperm.xlu0 %6094, %v9068_v11   ;;  %4949 = vperm.xlu1 %6091, %v9038_v25   ;;  %v3967_v40 = vrot.slane %v3966_v12, 1 }
 0x5e7   :  { %v9110_v48 = vpop.permute.xlu0 %4625 }
 0x5e8   :  { %v9091_v23 = vpop.permute.xlu1 %4941  ;;  %v3968_v54 = vadd.f32 %v3967_v40, %v3966_v12  ;;  %10784 = vst [vmem:[#allocation55_spill] sm:$0xff] %v9110_v48  ;;  %v9120_v12 = vmul.f32 0.0625, %v3807_v7  ;;  %v3973_v7 = vadd.f32 %v3972_v45, %v8586_v36 }
 0x5e9   :  { %10781 = vst [vmem:[#allocation52_spill] sm:$0xff] %v9091_v23  ;;  %v3813_v23 = vrot.slane %v3812_v42, 2 }
 0x5ea   :  { %6096 = vset.pattern.permute.xlu0 %v10738_v33  ;;  %6093 = vset.pattern.permute.xlu1 %v10733_v56  ;;  %v9116_v15 = vmul.f32 0.0625, %v3968_v54  ;;  %10786 = vst [vmem:[#allocation57_spill] sm:$0xff] %v9120_v12  ;;  %v3981_v54 = vrot.slane %v8622_v32, 4 }
 0x5eb   :  { %4649 = vperm.xlu0 %6096, %v9068_v11   ;;  %4173 = vperm.xlu1 %6093, %v9094_v30   ;;  %v3814_v6 = vadd.f32 %v3813_v23, %v3812_v42  ;;  %v9122_v8 = vpop.permute.xlu0 %4841 }
 0x5ec   :  { %10785 = vst [vmem:[#allocation56_spill] sm:$0xff] %v9116_v15  ;;  %10787 = vst [vmem:[#allocation58_spill] sm:$0xff] %v9122_v8  ;;  %v3982_v8 = vadd.f32 %v3981_v54, %v8622_v32 }
 0x5ed   :  { %v9102_v25 = vpop.permute.xlu1 %4029  ;;  %v3815_v35 = vrot.slane %v3814_v6, 1 }
 0x5ef   :  { %6097 = vset.pattern.permute.xlu0 %v10754_v22  ;;  %6095 = vset.pattern.permute.xlu1 %v10737_v27  ;;  %v9133_v23 = vpop.permute.xlu0 %4929 }
 0x5f0   :  { %4729 = vperm.xlu0 %6097, %v9094_v30   ;;  %4417 = vperm.xlu1 %6095, %v9094_v30   ;;  %10788 = vst [vmem:[#allocation59_spill] sm:$0xff] %v9133_v23 }
 0x5f1   :  { %v9112_v44 = vpop.permute.xlu1 %4044 }
 0x5f3   :  { %v9146_v45 = vpop.permute.xlu0 %4933 }
 0x5f4   :  { %6099 = vset.pattern.permute.xlu0 %v10770_v29  ;;  %6098 = vset.pattern.permute.xlu1 %v10740_v41  ;;  %10790 = vst [vmem:[#allocation61_spill] sm:$0xff] %v9146_v45 }
 0x5f5   :  { %4953 = vperm.xlu0 %6099, %v9094_v30   ;;  %4873 = vperm.xlu1 %6098, %v9068_v11   ;;  %v3816_v30 = vadd.f32 %v3815_v35, %v3814_v6  ;;  %v3974_v11 = vrot.slane %v3973_v7, 2  ;;  %v3983_v35 = vrot.slane %v3982_v8, 2 }
 0x5f6   :  { %v9124_v40 = vpop.permute.xlu1 %4133 }
 0x5f7   :  { %v9144_v36 = vmul.f32 0.0625, %v3816_v30  ;;  %v3975_v6 = vadd.f32 %v3974_v11, %v3973_v7  ;;  %v3984_v54 = vadd.f32 %v3983_v35, %v3982_v8  ;;  %v3829_v11 = vrot.slane %v8635_v46, 4 }
 0x5f9   :  { %6101 = vset.pattern.permute.xlu0 %v10733_v56  ;;  %6100 = vset.pattern.permute.xlu1 %v10742_v13  ;;  %10789 = vst [vmem:[#allocation60_spill] sm:$0xff] %v9144_v36  ;;  %v3976_v32 = vrot.slane %v3975_v6, 1  ;;  %v3985_v39 = vrot.slane %v3984_v54, 1  ;;  %v3830_v60 = vadd.f32 %v3829_v11, %v8635_v46 }
 0x5fa   :  { %4178 = vperm.xlu0 %6101, %v9116_v15   ;;  %4074 = vperm.xlu1 %6100, %v9120_v12   ;;  %v9135_v42 = vpop.permute.xlu1 %4143 }
 0x5fb   :  { %v3977_v7 = vadd.f32 %v3976_v32, %v3975_v6  ;;  %v3986_v35 = vadd.f32 %v3985_v39, %v3984_v54 }
 0x5fd   :  { %v9166_v57 = vmul.f32 0.0625, %v3977_v7  ;;  %v9172_v6 = vmul.f32 0.0625, %v3986_v35 }
 0x5fe   :  { %6103 = vset.pattern.permute.xlu0 %v10737_v27  ;;  %6102 = vset.pattern.permute.xlu1 %v10736_v51 }
 0x5ff   :  { %4421 = vperm.xlu0 %6103, %v9116_v15   ;;  %4333 = vperm.xlu1 %6102, %v9120_v12   ;;  %v9148_v23 = vpop.permute.xlu1 %4309  ;;  %v3620_v24 = vpop.trf.xlu0  ;;  %10791 = vst [vmem:[#allocation62_spill] sm:$0xff] %v9166_v57  ;;  %10793 = vst [vmem:[#allocation64_spill] sm:$0xff] %v9172_v6 }
 0x600   :  { %v3668_v45 = vmul.f32 %v3620_v24, %v3620_v24 }
 0x603   :  { %6105 = vset.pattern.permute.xlu0 %v10754_v22  ;;  %6104 = vset.pattern.permute.xlu1 %v10738_v33 }
 0x604   :  { %4733 = vperm.xlu0 %6105, %v9116_v15   ;;  %4653 = vperm.xlu1 %6104, %v9120_v12   ;;  %v9155_v30 = vpop.permute.xlu1 %4385 }
 0x608   :  { %6108 = vset.pattern.permute.xlu0 %v10742_v13  ;;  %6106 = vset.pattern.permute.xlu1 %v10740_v41  ;;  %v9163_v58 = vpop.permute.xlu1 %4393 }
 0x609   :  { %4079 = vperm.xlu0 %6108, %v9144_v36   ;;  %4877 = vperm.xlu1 %6106, %v9120_v12   ;;  %v3672_v12 = vrot.slane %v3668_v45, 2 }
 0x60b   :  { %v3676_v8 = vadd.f32 %v3672_v12, %v3668_v45 }
 0x60d   :  { %6110 = vset.pattern.permute.xlu0 %v10736_v51  ;;  %6107 = vset.pattern.permute.xlu1 %v10770_v29  ;;  %v9170_v34 = vpop.permute.xlu1 %4629  ;;  %6137 = vrsqrt.f32 %v3676_v8 }
 0x60e   :  { %4337 = vperm.xlu0 %6110, %v9144_v36   ;;  %4957 = vperm.xlu1 %6107, %v9116_v15   ;;  %v3831_v15 = vrot.slane %v3830_v60, 2  ;;  %10792 = vst [vmem:[#allocation63_spill] sm:$0xff] %v9170_v34 }
 0x610   :  { %v3832_v32 = vadd.f32 %v3831_v15, %v3830_v60  ;;  %v10798_v60 = vld [vmem:[#allocation2_spill] sm:$0xff] }
 0x611   :  { %v10568_v15 = vsub.s32 2, %v10798_v60 }
 0x612   :  { %6112 = vset.pattern.permute.xlu0 %v10738_v33  ;;  %v9176_v46 = vpop.permute.xlu1 %4697  ;;  %v3833_v12 = vrot.slane %v3832_v32, 1 }
 0x613   :  { %4657 = vperm.xlu0 %6112, %v9144_v36   ;;  %10794 = vst [vmem:[#allocation65_spill] sm:$0xff] %v9176_v46 }
 0x614   :  { %v3834_v54 = vadd.f32 %v3833_v12, %v3832_v32  ;;  %v10572_v32 = vsub.s32 1, %v10798_v60  ;;  %v10573_v12 = vsub.s32 3, %v10798_v60 }
 0x616   :  { %v9184_v7 = vmul.f32 0.0625, %v3834_v54  ;;  %v10802_v54 = vld [vmem:[#allocation4_spill] sm:$0xff] }
 0x617   :  { %6113 = vset.pattern.permute.xlu0 %v10754_v22  ;;  %v6138_v39 = vpop.eup %6137  ;;  %v9180_v45 = vpop.permute.xlu1 %4921 }
 0x618   :  { %4737 = vperm.xlu0 %6113, %v9166_v57   ;;  %10795 = vst [vmem:[#allocation66_spill] sm:$0xff] %v9180_v45  ;;  %v3684_v11 = vrot.slane %v6138_v39, 6  ;;  %10796 = vst [vmem:[#allocation67_spill] sm:$0xff] %v9184_v7  ;;  %v9186_v8 = vmul.f32 %v6138_v39, %v3620_v24 }
 0x61a   :  { %10797 = vst [vmem:[#allocation68_spill] sm:$0xff] %v9186_v8  ;;  %v9190_v35 = vmul.f32 %v3684_v11, %v3620_v24  ;;  %v9201_v39 = vrot.slane %v9186_v8, %v10802_v54  ;;  %v9215_v11 = vrot.slane %v9186_v8, %v10572_v32 }
 0x61c   :  { %6117 = vset.pattern.permute.xlu0 %v10733_v56  ;;  %10799 = vst [vmem:[#allocation69_spill] sm:$0xff] %v9190_v35  ;;  %v9192_v34 = vpop.permute.xlu1 %4705  ;;  %10803 = vst [vmem:[#allocation72_spill] sm:$0xff] %v9201_v39  ;;  %v9206_v45 = vrot.slane %v9190_v35, %v10568_v15  ;;  %v9220_v54 = vrot.slane %v9190_v35, %v10573_v12  ;;  %v3602_v15 = vmul.f32 0.125, %v8819_v62 }
 0x61d   :  { %4188 = vperm.xlu0 %6117, %v9172_v6   ;;  %10800 = vst [vmem:[#allocation70_spill] sm:$0xff] %v9192_v34  ;;  %10806 = vst [vmem:[#allocation75_spill] sm:$0xff] %v9215_v11  ;;  %v9232_v9 = vmul.f32 %v9201_v39, %v8913_v5  ;;  %v9236_v32 = vmul.f32 %v9201_v39, %v8918_v0  ;;  %v9240_v12 = vmul.f32 %v9201_v39, %v9102_v25 }
 0x61e   :  { %10804 = vst [vmem:[#allocation73_spill] sm:$0xff] %v9206_v45  ;;  %10807 = vst [vmem:[#allocation76_spill] sm:$0xff] %v9220_v54  ;;  %v9244_v62 = vmul.f32 %v9201_v39, %v8924_v55  ;;  %v9248_v28 = vmul.f32 %v9201_v39, %v9041_v17  ;;  %v9252_v60 = vmul.f32 %v9201_v39, %v9112_v44 }
 0x61f   :  { %v9260_v48 = vmul.f32 %v9206_v45, %v8948_v61  ;;  %v9264_v3 = vmul.f32 %v9206_v45, %v8929_v10  ;;  %v9268_v14 = vmul.f32 %v9206_v45, %v9124_v40  ;;  %v9272_v38 = vmul.f32 %v9206_v45, %v8957_v1 }
 0x620   :  { %v9279_v19 = vmul.f32 %v9206_v45, %v9135_v42  ;;  %v9283_v52 = vmul.f32 %v9206_v45, %v9056_v53  ;;  %v4238_v33 = vmul.f32 %v9206_v45, %v8918_v0  ;;  %v4240_v8 = vmul.f32 %v9206_v45, %v8924_v55 }
 0x621   :  { %6119 = vset.pattern.permute.xlu0 %v10737_v27  ;;  %v9222_v34 = vpop.permute.xlu1 %4849  ;;  %v9298_v35 = vmul.f32 %v9206_v45, %v9041_v17  ;;  %v4253_v0 = vmul.f32 %v8948_v61, %v9201_v39  ;;  %v4255_v55 = vmul.f32 %v9124_v40, %v9201_v39  ;;  %v4256_v17 = vmul.f32 %v8957_v1, %v9201_v39 }
 0x622   :  { %4429 = vperm.xlu0 %6119, %v9172_v6   ;;  %10808 = vst [vmem:[#allocation77_spill] sm:$0xff] %v9222_v34  ;;  %v9256_v34 = vmul.f32 %v9206_v45, %v8894_v63  ;;  %v9326_v61 = vmul.f32 %v9215_v11, %v8916_v20  ;;  %v4358_v40 = vmul.f32 %v9215_v11, %v8942_v21 }
 0x623   :  { %v4445_v1 = vmul.f32 %v9220_v54, %v8965_v50  ;;  %v4448_v27 = vmul.f32 %v9220_v54, %v8975_v31  ;;  %v9359_v57 = vmul.f32 %v9220_v54, %v9088_v49  ;;  %v4493_v56 = vmul.f32 %v8965_v50, %v9215_v11 }
 0x626   :  { %6121 = vset.pattern.permute.xlu0 %v10754_v22  ;;  %v4236_v22 = vmul.f32 %v9206_v45, %v8908_v43 }
 0x627   :  { %4741 = vperm.xlu0 %6121, %v9172_v6   ;;  %v4237_v6 = vmul.f32 %v9206_v45, %v8913_v5  ;;  %v4252_v5 = vmul.f32 %v8894_v63, %v9201_v39  ;;  %v9322_v63 = vmul.f32 %v9056_v53, %v9201_v39  ;;  %v9340_v53 = vmul.f32 %v9215_v11, %v8950_v2 }
 0x629   :  { %v4269_v50 = vadd.f32 %v4253_v0, %v4237_v6 }
 0x62b   :  { %6124 = vset.pattern.permute.xlu0 %v10742_v13  ;;  %v4477_v13 = vmul.f32 %v9220_v54, %v8934_v59 }
 0x62c   :  { %4089 = vperm.xlu0 %6124, %v9184_v7   ;;  %v9195_v46 = vpop.permute.xlu0 %4049 }
 0x62d   :  { %10801 = vst [vmem:[#allocation71_spill] sm:$0xff] %v9195_v46  ;;  %v4481_v46 = vmul.f32 %v9220_v54, %v9078_v26 }
 0x630   :  { %6126 = vset.pattern.permute.xlu0 %v10736_v51  ;;  %v9209_v24 = vpop.permute.xlu0 %4059  ;;  %v4239_v51 = vmul.f32 %v9206_v45, %v9102_v25  ;;  %v4254_v25 = vmul.f32 %v8929_v10, %v9201_v39  ;;  %v4357_v10 = vmul.f32 %v9215_v11, %v8934_v59  ;;  %v4476_v59 = vmul.f32 %v9220_v54, %v8916_v20 }
 0x631   :  { %10805 = vst [vmem:[#allocation74_spill] sm:$0xff] %v9209_v24  ;;  %4345 = vperm.xlu0 %6126, %v9184_v7   ;;  %v9228_v24 = vmul.f32 %v9201_v39, %v8908_v43  ;;  %v9302_v43 = vmul.f32 %v9206_v45, %v9112_v44  ;;  %v9318_v44 = vmul.f32 %v9135_v42, %v9201_v39 }
 0x632   :  { %v9336_v42 = vmul.f32 %v9215_v11, %v9064_v18  ;;  %v4221_v39 = vsub.f32 %v9232_v9, %v9260_v48  ;;  %v4461_v45 = vsub.f32 %v4357_v10, %v4445_v1 }
 0x633   :  { %v4220_v9 = vsub.f32 %v9228_v24, %v9256_v34  ;;  %v4268_v24 = vadd.f32 %v4252_v5, %v4236_v22  ;;  %v4362_v22 = vmul.f32 %v9215_v11, %v9148_v23  ;;  %v4274_v5 = vadd.f32 %v9322_v63, %v9302_v43 }
 0x634   :  { %v4525_v6 = vadd.f32 %v4461_v45, %v4221_v39 }
 0x635   :  { %6130 = vset.pattern.permute.xlu0 %v10740_v41  ;;  %v9275_v37 = vpop.permute.xlu0 %4313  ;;  %v4446_v41 = vmul.f32 %v9220_v54, %v8959_v47 }
 0x636   :  { %10809 = vst [vmem:[#allocation78_spill] sm:$0xff] %v9275_v37  ;;  %4889 = vperm.xlu0 %6130, %v9184_v7   ;;  %v9310_v7 = vpop.permute.xlu1 %4709  ;;  %v4480_v37 = vmul.f32 %v9220_v54, %v8950_v2  ;;  %v4496_v2 = vmul.f32 %v8975_v31, %v9215_v11 }
 0x637   :  { %10810 = vst [vmem:[#allocation79_spill] sm:$0xff] %v9310_v7  ;;  %3636 = vxpose.xlu1.b32.start [1/2] (short) (narrow) %v3602_v15, 8  ;;  %v9344_v7 = vmul.f32 %v9215_v11, %v9078_v26  ;;  %v4444_v15 = vmul.f32 %v9220_v54, %v8899_v16  ;;  %v4498_v26 = vmul.f32 %v9088_v49, %v9215_v11 }
 0x638   :  { %v4270_v49 = vadd.f32 %v4254_v25, %v4238_v33  ;;  %v4462_v48 = vsub.f32 %v4358_v40, %v4446_v41  ;;  %v4512_v33 = vadd.f32 %v4496_v2, %v4480_v37  ;;  %v4495_v41 = vmul.f32 %v9155_v30, %v9215_v11 }
 0x639   :  { %10811 = vst [vmem:[#allocation80_spill] sm:$0xff] %v9344_v7  ;;  %v9348_v36 = vpop.permute.xlu0 %4321  ;;  %v4509_v7 = vadd.f32 %v4493_v56, %v4477_v13  ;;  %v4225_v56 = vsub.f32 %v9248_v28, %v9279_v19  ;;  %v4226_v13 = vsub.f32 %v9252_v60, %v9283_v52  ;;  %v4464_v19 = vsub.f32 %v9340_v53, %v4448_v27 }
 0x63a   :  { %10812 = vst [vmem:[#allocation81_spill] sm:$0xff] %v9348_v36  ;;  %6132 = vset.pattern.permute.xlu0 %v10770_v29  ;;  %v4478_v36 = vmul.f32 %v9220_v54, %v8942_v21  ;;  %v4479_v29 = vmul.f32 %v9220_v54, %v9064_v18  ;;  %v9375_v20 = vpop.permute.xlu1 %4853  ;;  %v4492_v21 = vmul.f32 %v8899_v16, %v9215_v11 }
 0x63b   :  { %3637 = vxpose.xlu1.b32.end [2/2] (short) (narrow) %v3603_v4, 8  ;;  %v4494_v18 = vmul.f32 %v8959_v47, %v9215_v11  ;;  %v4222_v4 = vsub.f32 %v9236_v32, %v9264_v3  ;;  %v4223_v16 = vsub.f32 %v9240_v12, %v9268_v14  ;;  %v4224_v47 = vsub.f32 %v9244_v62, %v9272_v38 }
 0x63c   :  { %v4271_v3 = vadd.f32 %v4255_v55, %v4239_v51  ;;  %v4541_v32 = vadd.f32 %v4509_v7, %v4269_v50  ;;  %v4447_v14 = vmul.f32 %v9220_v54, %v9155_v30  ;;  %v4272_v12 = vadd.f32 %v4256_v17, %v4240_v8 }
 0x63d   :  { %v4510_v34 = vadd.f32 %v4494_v18, %v4478_v36  ;;  %v4460_v38 = vsub.f32 %v9326_v61, %v4444_v15  ;;  %v4482_v52 = vmul.f32 %v9220_v54, %v9148_v23  ;;  %v4508_v62 = vadd.f32 %v4492_v21, %v4476_v59 }
 0x63e   :  { %v9397_v31 = vpop.permute.xlu0 %4633  ;;  %v4154_v60 = vpop.permute.xlu1 %4153  ;;  %v4449_v51 = vmul.f32 %v9220_v54, %v9163_v58  ;;  %v4526_v36 = vadd.f32 %v4462_v48, %v4222_v4  ;;  %v4557_v7 = vmul.f32 %v4525_v6, %v4525_v6  ;;  %v4573_v8 = vmul.f32 %v4541_v32, %v4541_v32 }
 0x63f   :  { %v4542_v45 = vadd.f32 %v4510_v34, %v4270_v49  ;;  %v4463_v27 = vsub.f32 %v9336_v42, %v4447_v14  ;;  %v4511_v39 = vadd.f32 %v4495_v41, %v4479_v29  ;;  %v4497_v28 = vmul.f32 %v9163_v58, %v9215_v11  ;;  %v10819_v41 = vld [vmem:[#allocation78_spill] sm:$0xff] }
 0x640   :  { %v4273_v30 = vadd.f32 %v9318_v44, %v9298_v35  ;;  %v4466_v23 = vsub.f32 %v4362_v22, %v9359_v57  ;;  %v4514_v0 = vadd.f32 %v4498_v26, %v4482_v52  ;;  %v4524_v25 = vadd.f32 %v4460_v38, %v4220_v9  ;;  %v10814_v17 = vld [vmem:[#allocation80_spill] sm:$0xff] }
 0x641   :  { %v4540_v55 = vadd.f32 %v4508_v62, %v4268_v24  ;;  %v4465_v61 = vsub.f32 %v10814_v17, %v4449_v51  ;;  %v4513_v10 = vadd.f32 %v4497_v28, %v4481_v46  ;;  %v4528_v29 = vadd.f32 %v4464_v19, %v4224_v47  ;;  %v10818_v19 = vld [vmem:[#allocation71_spill] sm:$0xff] }
 0x642   :  { %v9414_v37 = vpop.permute.xlu0 %4641  ;;  %v4544_v40 = vadd.f32 %v4512_v33, %v4272_v12  ;;  %v4558_v1 = vmul.f32 %v4526_v36, %v4526_v36  ;;  %v4574_v58 = vmul.f32 %v4542_v45, %v4542_v45  ;;  %v9422_v42 = vpop.permute.xlu1 %4163  ;;  %v4589_v53 = vadd.f32 %v4573_v8, %v4557_v7 }
 0x643   :  { %10813 = vst [vmem:[#allocation82_spill] sm:$0xff] %v9414_v37  ;;  %v4527_v15 = vadd.f32 %v4463_v27, %v4223_v16  ;;  %v4543_v35 = vadd.f32 %v4511_v39, %v4271_v3  ;;  %v4530_v44 = vadd.f32 %v4466_v23, %v4226_v13  ;;  %v4546_v59 = vadd.f32 %v4514_v0, %v4274_v5  ;;  %v10816_v3 = vld [vmem:[#allocation73_spill] sm:$0xff]  ;;  %v10823_v0 = vld [vmem:[#allocation23_spill] sm:$0xff] }
 0x644   :  { %v4556_v43 = vmul.f32 %v4524_v25, %v4524_v25  ;;  %v4572_v63 = vmul.f32 %v4540_v55, %v4540_v55  ;;  %v4529_v57 = vadd.f32 %v4465_v61, %v4225_v56  ;;  %v4545_v21 = vadd.f32 %v4513_v10, %v4273_v30  ;;  %v10817_v56 = vld [vmem:[#allocation72_spill] sm:$0xff] }
 0x645   :  { %v4560_v50 = vmul.f32 %v4528_v29, %v4528_v29  ;;  %v4576_v2 = vmul.f32 %v4544_v40, %v4544_v40  ;;  %v4590_v46 = vadd.f32 %v4574_v58, %v4558_v1  ;;  %v5148_v26 = vrot.slane %v4589_v53, 7 }
 0x646   :  { %v4559_v9 = vmul.f32 %v4527_v15, %v4527_v15  ;;  %v4575_v4 = vmul.f32 %v4543_v35, %v4543_v35  ;;  %v4562_v47 = vmul.f32 %v4530_v44, %v4530_v44  ;;  %v4402_v49 = vpop.permute.xlu1 %4401  ;;  %v4578_v48 = vmul.f32 %v4546_v59, %v4546_v59 }
 0x647   :  { %v9424_v18 = vpop.permute.xlu0 %4865  ;;  %v4588_v34 = vadd.f32 %v4572_v63, %v4556_v43  ;;  %v4561_v16 = vmul.f32 %v4529_v57, %v4529_v57  ;;  %v4577_v6 = vmul.f32 %v4545_v21, %v4545_v21  ;;  %v4592_v13 = vadd.f32 %v4576_v2, %v4560_v50 }
 0x648   :  { %10815 = vst [vmem:[#allocation80_spill] sm:$0xff] %v9424_v18  ;;  %v5150_v24 = vrot.slane %v4590_v46, 6  ;;  %v4211_v32 = vmul.f32 %v10816_v3, %v4154_v60  ;;  %v4259_v14 = vmul.f32 %v4154_v60, %v10817_v56  ;;  %v4591_v38 = vadd.f32 %v4575_v4, %v4559_v9  ;;  %v10827_v46 = vld [vmem:[#allocation62_spill] sm:$0xff]  ;;  %v10879_v18 = vld [vmem:[#allocation25_spill] sm:$0xff] }
 0x649   :  { %v5149_v12 = vsel %vm606_vm2, %v5148_v26, %v4588_v34  ;;  %v4107_v52 = vmul.f32 %v10817_v56, %v10818_v19  ;;  %v4243_v62 = vmul.f32 %v10816_v3, %v10818_v19  ;;  %v4363_v51 = vmul.f32 %v9215_v11, %v10819_v41 }
 0x64a   :  { %v4483_v22 = vmul.f32 %v9220_v54, %v10819_v41  ;;  %v4451_v36 = vmul.f32 %v9220_v54, %v4402_v49  ;;  %v4499_v60 = vmul.f32 %v4402_v49, %v9215_v11  ;;  %v4593_v45 = vadd.f32 %v4577_v6, %v4561_v16  ;;  %v9445_v5 = vpop.permute.xlu1 %4409 }
 0x64b   :  { %v4227_v7 = vsub.f32 %v4107_v52, %v4211_v32  ;;  %v4275_v8 = vadd.f32 %v4259_v14, %v4243_v62  ;;  %v9441_v27 = vmul.f32 %v9397_v31, %v10817_v56  ;;  %v4787_v30 = vmul.f32 %v9397_v31, %v10816_v3  ;;  %10821 = vst [vmem:[#allocation72_spill] sm:$0xff] %v9445_v5  ;;  %v10835_v62 = vld [vmem:[#allocation8_spill] sm:$0xff] }
 0x64c   :  { %v4714_v33 = vpop.permute.xlu0 %4713  ;;  %v4467_v39 = vsub.f32 %v4363_v51, %v4451_v36  ;;  %v4515_v28 = vadd.f32 %v4499_v60, %v4483_v22  ;;  %v3820_v25 = vrot.slane %v10823_v0, 4  ;;  %v5152_v17 = vrot.slane %v4591_v38, 5  ;;  %v10837_v51 = vld [vmem:[#allocation69_spill] sm:$0xff]  ;;  %v10838_v22 = vld [vmem:[#allocation68_spill] sm:$0xff] }
 0x64d   :  { %10820 = vst [vmem:[#allocation73_spill] sm:$0xff] %v9441_v27  ;;  %v9448_v23 = vmul.f32 %v4714_v33, %v10816_v3  ;;  %v4803_v55 = vmul.f32 %v4714_v33, %v10817_v56  ;;  %v5154_v40 = vrot.slane %v4592_v13, 4  ;;  %v4594_v58 = vadd.f32 %v4578_v48, %v4562_v47 }
 0x64e   :  { %v4531_v61 = vadd.f32 %v4467_v39, %v4227_v7  ;;  %v4547_v10 = vadd.f32 %v4515_v28, %v4275_v8  ;;  %v5151_v31 = vsel %vm608_vm3, %v5150_v24, %v5149_v12  ;;  %v5156_v53 = vrot.slane %v4593_v45, 3  ;;  %v9460_v63 = vpop.permute.xlu1 %4721  ;;  %v10831_v24 = vld [vmem:[#allocation60_spill] sm:$0xff] }
 0x64f   :  { %10822 = vst [vmem:[#allocation71_spill] sm:$0xff] %v9448_v23  ;;  %v9454_v1 = vadd.f32 %v4803_v55, %v4787_v30  ;;  %v5153_v44 = vsel %vm610_vm4, %v5152_v17, %v5151_v31  ;;  %v3821_v59 = vadd.f32 %v3820_v25, %v10823_v0  ;;  %10825 = vst [vmem:[#allocation23_spill] sm:$0xff] %v9460_v63  ;;  %v10826_v50 = vmov 8   ;;  %v10845_v31 = vld [vmem:[#allocation64_spill] sm:$0xff]  ;;  %v10881_v63 = vld [vmem:[#allocation38_spill] sm:$0xff] }
 0x650   :  { %v4563_v15 = vmul.f32 %v4531_v61, %v4531_v61  ;;  %v4579_v35 = vmul.f32 %v4547_v10, %v4547_v10  ;;  %v5155_v43 = vsel %vm612_vm5, %v5154_v40, %v5153_v44  ;;  %v5158_v2 = vrot.slane %v4594_v58, 2 }
 0x651   :  { %10824 = vst [vmem:[#allocation78_spill] sm:$0xff] %v9454_v1  ;;  %v5157_v21 = vsel %vm614_vm6, %v5156_v53, %v5155_v43  ;;  %v3822_v9 = vrot.slane %v3821_v59, 2  ;;  %v10828_v48 = vmov 9   ;;  %v10830_v6 = vmov 7   ;;  %v9478_v38 = vpop.permute.xlu0 %4168 }
 0x652   :  { %v4595_v57 = vadd.f32 %v4579_v35, %v4563_v15  ;;  %v5159_v4 = vsel %vm616_vm7, %v5158_v2, %v5157_v21  ;;  %v9469_v34 = vpop.permute.xlu1 %4945  ;;  %v10833_v14 = vmov 11   ;;  %v3990_v33 = vrot.slane %v10835_v62, 4 }
 0x653   :  { %10829 = vst [vmem:[#allocation83_spill] sm:$0xff] %v9469_v34  ;;  %v3823_v16 = vadd.f32 %v3822_v9, %v3821_v59  ;;  %v10836_v41 = vmov 4   ;;  %v5497_v36 = vsel %vm5496_vm13, %v10838_v22, %v10837_v51  ;;  %v10840_v39 = vmov 5   ;;  %v10864_v51 = vld [vmem:[#allocation27_spill] sm:$0xff]  ;;  %v10876_v34 = vld [vmem:[#allocation37_spill] sm:$0xff] }
 0x654   :  { %v5160_v26 = vrot.slane %v4595_v57, 1  ;;  %v3991_v45 = vadd.f32 %v3990_v33, %v10835_v62  ;;  %v5499_v7 = vsel %vm1085_vm9, %v5497_v36, 0.0  ;;  %v10843_v25 = vmov 6   ;;  %v10851_v57 = vld [vmem:[#allocation67_spill] sm:$0xff]  ;;  %v10863_v33 = vld [vmem:[#allocation26_spill] sm:$0xff] }
 0x655   :  { %v3824_v13 = vrot.slane %v3823_v16, 1  ;;  %5502 = vst [vmem:[%s10450_s10 + $0x8] sm:$0xf] %v5499_v7  ;;  %v10854_v2 = vmov 10   ;;  %v9570_v22 = vmul.f32 %v10864_v51, %v10817_v56  ;;  %v10865_v36 = vld [vmem:[#allocation54_spill] sm:$0xff]  ;;  %v10866_v7 = vld [vmem:[#allocation29_spill] sm:$0xff] }
 0x656   :  { %v5161_v47 = vsel %vm618_vm8, %v5160_v26, %v5159_v4  ;;  %v9474_v32 = vpop.permute.xlu1 %4857  ;;  %v9490_v60 = vpop.permute.xlu0 %4413  ;;  %v3992_v28 = vrot.slane %v3991_v45, 2  ;;  %v10855_v4 = vld [vmem:[#allocation31_spill] sm:$0xff]  ;;  %v9604_v1 = vmul.f32 %v10865_v36, %v10816_v3  ;;  %v4784_v23 = vmul.f32 %v10866_v7, %v10816_v3 }
 0x657   :  { %v5178_v49 = vsel %vm1085_vm9, %v5161_v47, 0.0  ;;  %10832 = vst [vmem:[#allocation84_spill] sm:$0xff] %v9474_v32  ;;  %v3825_v12 = vadd.f32 %v3824_v13, %v3823_v16  ;;  %10839 = vst [vmem:[#allocation8_spill] sm:$0xff] %v9490_v60 }
 0x658   :  { %5179 = vadd.xlane.f32.xlu0 %v5178_v49  ;;  %v3993_v55 = vadd.f32 %v3992_v28, %v3991_v45  ;;  %v9574_v45 = vmul.f32 %v10865_v36, %v10817_v56  ;;  %v10874_v36 = vld [vmem:[#allocation33_spill] sm:$0xff] }
 0x659   :  { %6109 = vset.pattern.permute.xlu1 %v10826_v50  ;;  %v9482_v52 = vmul.f32 0.0625, %v3825_v12 }
 0x65a   :  { %4183 = vperm.xlu1 %6109, %v10827_v46   ;;  %v9480_v19 = vpop.permute.xlu1 %4064  ;;  %v3994_v61 = vrot.slane %v3993_v55, 1 }
 0x65b   :  { %10834 = vst [vmem:[#allocation85_spill] sm:$0xff] %v9482_v52  ;;  %v9501_v30 = vpop.permute.xlu0 %4869 }
 0x65c   :  { %10841 = vst [vmem:[#allocation69_spill] sm:$0xff] %v9501_v30  ;;  %v3995_v40 = vadd.f32 %v3994_v61, %v3993_v55  ;;  %v10869_v61 = vld [vmem:[#allocation24_spill] sm:$0xff] }
 0x65d   :  { %v4796_v27 = vmul.f32 %v10869_v61, %v10817_v56 }
 0x65e   :  { %6111 = vset.pattern.permute.xlu1 %v10828_v48  ;;  %v9494_v8 = vpop.permute.xlu1 %4325  ;;  %v9519_v15 = vmul.f32 0.0625, %v3995_v40  ;;  %v9588_v40 = vmul.f32 %v10869_v61, %v10816_v3 }
 0x65f   :  { %4425 = vperm.xlu1 %6111, %v10827_v46  }
 0x660   :  { %v9507_v17 = vpop.permute.xlu0 %4069  ;;  %10847 = vst [vmem:[#allocation88_spill] sm:$0xff] %v9519_v15 }
 0x662   :  { %v9503_v0 = vpop.permute.xlu1 %4645 }
 0x663   :  { %6114 = vset.pattern.permute.xlu1 %v10830_v6  ;;  %10842 = vst [vmem:[#allocation68_spill] sm:$0xff] %v9503_v0 }
 0x664   :  { %4881 = vperm.xlu1 %6114, %v10831_v24   ;;  %v4782_v24 = vmul.f32 %v10864_v51, %v10816_v3  ;;  %v10873_v51 = vld [vmem:[#allocation35_spill] sm:$0xff] }
 0x665   :  { %v9514_v58 = vpop.permute.xlu0 %4329 }
 0x666   :  { %v9510_v10 = vpop.permute.xlu1 %4725 }
 0x667   :  { %10844 = vst [vmem:[#allocation86_spill] sm:$0xff] %v9510_v10 }
 0x668   :  { %6115 = vset.pattern.permute.xlu1 %v10833_v14 }
 0x669   :  { %4961 = vperm.xlu1 %6115, %v10827_v46  }
 0x66a   :  { %v9517_v53 = vpop.permute.xlu1 %4949  ;;  %v9523_v35 = vpop.permute.xlu0 %4649 }
 0x66b   :  { %10846 = vst [vmem:[#allocation87_spill] sm:$0xff] %v9517_v53  ;;  %10848 = vst [vmem:[#allocation89_spill] sm:$0xff] %v9523_v35 }
 0x66d   :  { %6116 = vset.pattern.permute.xlu1 %v10836_v41  ;;  %v4669_v41 = vmul.f32 %v10863_v33, %v10817_v56 }
 0x66e   :  { %4084 = vperm.xlu1 %6116, %v9482_v52   ;;  %v9525_v44 = vpop.permute.xlu1 %4173 }
 0x66f   :  { %v9529_v59 = vpop.permute.xlu0 %4729 }
 0x670   :  { %10849 = vst [vmem:[#allocation90_spill] sm:$0xff] %v9529_v59  ;;  %v10880_v59 = vld [vmem:[#allocation39_spill] sm:$0xff] }
 0x671   :  { %v4974_v10 = vmul.f32 %v10880_v59, %v9220_v54 }
 0x672   :  { %6118 = vset.pattern.permute.xlu1 %v10840_v39  ;;  %v9531_v43 = vpop.permute.xlu1 %4417  ;;  %v9578_v39 = vmul.f32 %v10866_v7, %v10817_v56  ;;  %v10875_v7 = vld [vmem:[#allocation7_spill] sm:$0xff] }
 0x673   :  { %4341 = vperm.xlu1 %6118, %v9482_v52   ;;  %10850 = vst [vmem:[#allocation91_spill] sm:$0xff] %v9531_v43  ;;  %v4892_v61 = vmul.f32 %v10875_v7, %v9215_v11  ;;  %v5004_v5 = vmul.f32 %v10875_v7, %v9220_v54 }
 0x674   :  { %v9535_v21 = vpop.permute.xlu0 %4953 }
 0x675   :  { %10852 = vst [vmem:[#allocation92_spill] sm:$0xff] %v9535_v21  ;;  %v5005_v21 = vmul.f32 %v10874_v36, %v9220_v54 }
 0x677   :  { %6120 = vset.pattern.permute.xlu1 %v10843_v25 }
 0x678   :  { %4661 = vperm.xlu1 %6120, %v9482_v52  }
 0x679   :  { %v9541_v26 = vpop.permute.xlu0 %4178 }
 0x67c   :  { %6122 = vset.pattern.permute.xlu1 %v10830_v6 }
 0x67d   :  { %4885 = vperm.xlu1 %6122, %v9482_v52  }
 0x67e   :  { %v9548_v47 = vpop.permute.xlu0 %4421 }
 0x67f   :  { %10856 = vst [vmem:[#allocation94_spill] sm:$0xff] %v9548_v47 }
 0x681   :  { %6123 = vset.pattern.permute.xlu1 %v10833_v14 }
 0x682   :  { %4965 = vperm.xlu1 %6123, %v10845_v31   ;;  %v10872_v31 = vld [vmem:[#allocation41_spill] sm:$0xff] }
 0x683   :  { %v4752_v46 = vmul.f32 %v10872_v31, %v10816_v3 }
 0x686   :  { %6125 = vset.pattern.permute.xlu1 %v10826_v50  ;;  %v9537_v50 = vpop.permute.xlu1 %4873 }
 0x687   :  { %4193 = vperm.xlu1 %6125, %v9519_v15   ;;  %10853 = vst [vmem:[#allocation93_spill] sm:$0xff] %v9537_v50  ;;  %v10878_v50 = vld [vmem:[#allocation43_spill] sm:$0xff] }
 0x688   :  { %v4896_v30 = vmul.f32 %v10878_v50, %v9215_v11  ;;  %v5008_v35 = vmul.f32 %v10878_v50, %v9220_v54 }
 0x68a   :  { %v9544_v9 = vpop.permute.xlu1 %4074 }
 0x68b   :  { %6127 = vset.pattern.permute.xlu1 %v10828_v48  ;;  %v9552_v48 = vpop.permute.xlu0 %4733 }
 0x68c   :  { %4433 = vperm.xlu1 %6127, %v9519_v15   ;;  %10858 = vst [vmem:[#allocation96_spill] sm:$0xff] %v9552_v48  ;;  %v4972_v48 = vmul.f32 %v10879_v18, %v9220_v54 }
 0x68e   :  { %v9550_v49 = vpop.permute.xlu1 %4333 }
 0x68f   :  { %10857 = vst [vmem:[#allocation95_spill] sm:$0xff] %v9550_v49  ;;  %v9556_v6 = vpop.permute.xlu0 %4079 }
 0x690   :  { %6128 = vset.pattern.permute.xlu1 %v10843_v25  ;;  %v10868_v25 = vld [vmem:[#allocation55_spill] sm:$0xff] }
 0x691   :  { %4665 = vperm.xlu1 %6128, %v10851_v57   ;;  %v9584_v55 = vmul.f32 %v10868_v25, %v10817_v56 }
 0x692   :  { %v9554_v16 = vpop.permute.xlu1 %4653 }
 0x693   :  { %10859 = vst [vmem:[#allocation97_spill] sm:$0xff] %v9554_v16  ;;  %v9564_v62 = vpop.permute.xlu0 %4337  ;;  %v4976_v16 = vmul.f32 %v10881_v63, %v9220_v54 }
 0x695   :  { %6129 = vset.pattern.permute.xlu1 %v10854_v2  ;;  %v10870_v2 = vld [vmem:[#allocation32_spill] sm:$0xff] }
 0x696   :  { %4745 = vperm.xlu1 %6129, %v9519_v15   ;;  %v9558_v13 = vpop.permute.xlu1 %4877  ;;  %v4749_v29 = vmul.f32 %v10870_v2, %v10816_v3  ;;  %v4797_v32 = vmul.f32 %v10870_v2, %v10817_v56  ;;  %v4893_v2 = vmul.f32 %v10874_v36, %v9215_v11  ;;  %v5021_v36 = vmul.f32 %v10873_v51, %v9215_v11 }
 0x697   :  { %10860 = vst [vmem:[#allocation98_spill] sm:$0xff] %v9558_v13  ;;  %v9628_v13 = vpop.permute.xlu0 %4657 }
 0x698   :  { %10877 = vst [vmem:[#allocation27_spill] sm:$0xff] %v9628_v13  ;;  %v5006_v13 = vmul.f32 %v10876_v34, %v9220_v54  ;;  %v4765_v37 = vsub.f32 %v4669_v41, %v4749_v29  ;;  %v5037_v60 = vadd.f32 %v5021_v36, %v5005_v21  ;;  %v4768_v29 = vsub.f32 %v9578_v39, %v4752_v46 }
 0x699   :  { %v4992_v41 = vsub.f32 %v4896_v30, %v4976_v16  ;;  %v4988_v30 = vsub.f32 %v4892_v61, %v4972_v48  ;;  %v10886_v48 = vld [vmem:[#allocation77_spill] sm:$0xff] }
 0x69a   :  { %6131 = vset.pattern.permute.xlu1 %v10833_v14  ;;  %v10861_v14 = vld [vmem:[#allocation3_spill] sm:$0xff]  ;;  %v9580_v28 = vpop.permute.xlu1 %4957  ;;  %v5009_v39 = vmul.f32 %v10886_v48, %v9220_v54 }
 0x69b   :  { %4937 = vperm.xlu1 %6131, %v10855_v4   ;;  %v9562_v12 = vmul.f32 %v10861_v14, %v10817_v56  ;;  %10862 = vst [vmem:[#allocation3_spill] sm:$0xff] %v9564_v62  ;;  %10867 = vst [vmem:[#allocation26_spill] sm:$0xff] %v9580_v28  ;;  %v4780_v52 = vmul.f32 %v10861_v14, %v10816_v3  ;;  %v4781_v4 = vmul.f32 %v10863_v33, %v10816_v3 }
 0x69c   :  { %v4800_v33 = vmul.f32 %v10872_v31, %v10817_v56  ;;  %v4973_v28 = vmul.f32 %v10873_v51, %v9220_v54  ;;  %v5020_v51 = vmul.f32 %v10879_v18, %v9215_v11  ;;  %v5022_v62 = vmul.f32 %v10880_v59, %v9215_v11 }
 0x69d   :  { %v4813_v47 = vadd.f32 %v4797_v32, %v4781_v4 }
 0x69e   :  { %v4989_v43 = vsub.f32 %v4893_v2, %v4973_v28  ;;  %v4816_v21 = vadd.f32 %v4800_v33, %v4784_v23  ;;  %v9656_v28 = vpop.permute.xlu0 %4737  ;;  %v5038_v7 = vadd.f32 %v5022_v62, %v5006_v13  ;;  %v4764_v23 = vsub.f32 %v9562_v12, %v9588_v40 }
 0x69f   :  { %4969 = vperm.xlu1 %6131, %v9519_v15   ;;  %v10871_v15 = vld [vmem:[#allocation36_spill] sm:$0xff]  ;;  %v5069_v36 = vadd.f32 %v5037_v60, %v4813_v47  ;;  %v5056_v47 = vadd.f32 %v4992_v41, %v4768_v29  ;;  %v4897_v12 = vmul.f32 %v10886_v48, %v9215_v11 }
 0x6a0   :  { %v4750_v57 = vmul.f32 %v10871_v15, %v10816_v3  ;;  %v4798_v14 = vmul.f32 %v10871_v15, %v10817_v56  ;;  %v4894_v15 = vmul.f32 %v10876_v34, %v9215_v11  ;;  %v5024_v34 = vmul.f32 %v10881_v63, %v9215_v11  ;;  %v10882_v63 = vld [vmem:[#allocation58_spill] sm:$0xff] }
 0x6a1   :  { %v5053_v2 = vadd.f32 %v4989_v43, %v4765_v37  ;;  %v4895_v59 = vmul.f32 %v10882_v63, %v9215_v11  ;;  %v5007_v60 = vmul.f32 %v10882_v63, %v9220_v54 }
 0x6a2   :  { %v4766_v50 = vsub.f32 %v9570_v22, %v4750_v57  ;;  %v4990_v32 = vsub.f32 %v4894_v15, %v4974_v10  ;;  %v4814_v4 = vadd.f32 %v4798_v14, %v4782_v24  ;;  %v5040_v18 = vadd.f32 %v5024_v34, %v5008_v35  ;;  %v10883_v57 = vld [vmem:[#allocation59_spill] sm:$0xff]  ;;  %v10884_v35 = vld [vmem:[#allocation61_spill] sm:$0xff]  ;;  %v10888_v34 = vld [vmem:[#allocation70_spill] sm:$0xff] }
 0x6a3   :  { %v4977_v46 = vmul.f32 %v10883_v57, %v9220_v54  ;;  %v4812_v24 = vadd.f32 %v4796_v27, %v4780_v52  ;;  %v5036_v10 = vadd.f32 %v5020_v51, %v5004_v5  ;;  %v9668_v37 = vmul.f32 %v10884_v35, %v9220_v54  ;;  %v10885_v27 = vld [vmem:[#allocation66_spill] sm:$0xff] }
 0x6a4   :  { %v5025_v43 = vmul.f32 %v10883_v57, %v9215_v11  ;;  %v5070_v16 = vadd.f32 %v5038_v7, %v4814_v4  ;;  %v5072_v13 = vadd.f32 %v5040_v18, %v4816_v21  ;;  %v5085_v62 = vmul.f32 %v5053_v2, %v5053_v2  ;;  %v10889_v57 = vld [vmem:[#allocation63_spill] sm:$0xff] }
 0x6a5   :  { %v5101_v22 = vmul.f32 %v5069_v36, %v5069_v36  ;;  %v4975_v52 = vmul.f32 %v10885_v27, %v9220_v54  ;;  %v5023_v5 = vmul.f32 %v10885_v27, %v9215_v11  ;;  %v5026_v40 = vmul.f32 %v10884_v35, %v9215_v11 }
 0x6a6   :  { %v5052_v14 = vadd.f32 %v4988_v30, %v4764_v23  ;;  %v5068_v33 = vadd.f32 %v5036_v10, %v4812_v24  ;;  %v5088_v15 = vmul.f32 %v5056_v47, %v5056_v47  ;;  %v4801_v29 = vmul.f32 %v10888_v34, %v10817_v56 }
 0x6a7   :  { %v5104_v4 = vmul.f32 %v5072_v13, %v5072_v13  ;;  %v5117_v21 = vadd.f32 %v5101_v22, %v5085_v62  ;;  %v4991_v18 = vsub.f32 %v4895_v59, %v4975_v52  ;;  %v5039_v2 = vadd.f32 %v5023_v5, %v5007_v60 }
 0x6a8   :  { %v4993_v36 = vsub.f32 %v4897_v12, %v4977_v46  ;;  %v5041_v63 = vadd.f32 %v5025_v43, %v5009_v39  ;;  %v4674_v23 = vmul.f32 %v10889_v57, %v10817_v56  ;;  %v4898_v24 = vmul.f32 %v9375_v20, %v9215_v11  ;;  %v10890_v46 = vld [vmem:[#allocation79_spill] sm:$0xff] }
 0x6a9   :  { %v5010_v30 = vmul.f32 %v9375_v20, %v9220_v54  ;;  %v4754_v43 = vmul.f32 %v10890_v46, %v10816_v3  ;;  %v5084_v5 = vmul.f32 %v5052_v14, %v5052_v14  ;;  %v5100_v48 = vmul.f32 %v5068_v33, %v5068_v33 }
 0x6aa   :  { %v9718_v39 = vadd.f32 %v5104_v4, %v5088_v15  ;;  %v10896_v4 = vld [vmem:[#allocation2_spill] sm:$0xff] }
 0x6ac   :  { %10892 = vst [vmem:[#allocation29_spill] sm:$0xff] %v9718_v39  ;;  %v10924_v39 = vld [vmem:[#allocation91_spill] sm:$0xff] }
 0x6b7   :  { %v9620_v53 = vpop.trf.xlu1 }
 0x6b8   :  { %v3669_v31 = vmul.f32 %v9620_v53, %v9620_v53 }
 0x6ba   :  { %v3673_v0 = vrot.slane %v3669_v31, 2 }
 0x6bc   :  { %v3677_v49 = vadd.f32 %v3673_v0, %v3669_v31  ;;  %v4785_v0 = vmul.f32 %v10868_v25, %v10816_v3  ;;  %v9682_v25 = vpop.permute.xlu0 %4188  ;;  %v10887_v31 = vld [vmem:[#allocation65_spill] sm:$0xff] }
 0x6bd   :  { %v4751_v51 = vmul.f32 %v10887_v31, %v10816_v3  ;;  %v4799_v41 = vmul.f32 %v10887_v31, %v10817_v56  ;;  %v4770_v31 = vsub.f32 %v4674_v23, %v4754_v43  ;;  %v10904_v23 = vsub.s32 1, %v10896_v4 }
 0x6be   :  { %6139 = vrsqrt.f32 %v3677_v49  ;;  %v5054_v49 = vadd.f32 %v4990_v32, %v4766_v50  ;;  %v4753_v50 = vmul.f32 %v10888_v34, %v10816_v3  ;;  %v5102_v32 = vmul.f32 %v5070_v16, %v5070_v16 }
 0x6bf   :  { %v4815_v35 = vadd.f32 %v4799_v41, %v9604_v1  ;;  %v4817_v59 = vadd.f32 %v4801_v29, %v4785_v0  ;;  %v4802_v16 = vmul.f32 %v10890_v46, %v10817_v56  ;;  %v4786_v1 = vmul.f32 %v10889_v57, %v10816_v3  ;;  %v10894_v29 = vld [vmem:[#allocation4_spill] sm:$0xff] }
 0x6c0   :  { %v5086_v61 = vmul.f32 %v5054_v49, %v5054_v49  ;;  %v4767_v49 = vsub.f32 %v9574_v45, %v4751_v51  ;;  %v4769_v47 = vsub.f32 %v9584_v55, %v4753_v50  ;;  %v9703_v60 = vpop.permute.xlu0 %4429  ;;  %v4994_v55 = vsub.f32 %v4898_v24, %v9668_v37 }
 0x6c1   :  { %v5071_v22 = vadd.f32 %v5039_v2, %v4815_v35  ;;  %v5073_v27 = vadd.f32 %v5041_v63, %v4817_v59  ;;  %v5042_v0 = vadd.f32 %v5026_v40, %v5010_v30  ;;  %v4818_v51 = vadd.f32 %v4802_v16, %v4786_v1  ;;  %v10908_v35 = vld [vmem:[#allocation45_spill] sm:$0xff]  ;;  %v10909_v59 = vld [vmem:[#allocation74_spill] sm:$0xff] }
 0x6c2   :  { %v5055_v62 = vadd.f32 %v4991_v18, %v4767_v49  ;;  %v5057_v45 = vadd.f32 %v4993_v36, %v4769_v47  ;;  %v9715_v12 = vadd.f32 %v5102_v32, %v5086_v61  ;;  %v5058_v14 = vadd.f32 %v4994_v55, %v4770_v31 }
 0x6c3   :  { %v5103_v37 = vmul.f32 %v5071_v22, %v5071_v22  ;;  %v5105_v34 = vmul.f32 %v5073_v27, %v5073_v27  ;;  %v5074_v33 = vadd.f32 %v5042_v0, %v4818_v51  ;;  %v5116_v61 = vadd.f32 %v5100_v48, %v5084_v5  ;;  %v10911_v22 = vld [vmem:[#allocation40_spill] sm:$0xff] }
 0x6c4   :  { %10891 = vst [vmem:[#allocation54_spill] sm:$0xff] %v9715_v12  ;;  %v5087_v3 = vmul.f32 %v5055_v62, %v5055_v62  ;;  %v5089_v40 = vmul.f32 %v5057_v45, %v5057_v45  ;;  %v9723_v50 = vpop.permute.xlu0 %4741  ;;  %v9741_v63 = vmul.f32 %v5058_v14, %v5058_v14  ;;  %v10906_v30 = vsub.s32 3, %v10896_v4  ;;  %v10915_v14 = vld [vmem:[#allocation47_spill] sm:$0xff] }
 0x6c5   :  { %10893 = vst [vmem:[#allocation55_spill] sm:$0xff] %v9723_v50  ;;  %v9743_v57 = vmul.f32 %v5074_v33, %v5074_v33  ;;  %v10916_v33 = vld [vmem:[#allocation81_spill] sm:$0xff] }
 0x6c6   :  { %v9737_v2 = vadd.f32 %v5103_v37, %v5087_v3  ;;  %v9739_v36 = vadd.f32 %v5105_v34, %v5089_v40  ;;  %10902 = vst [vmem:[#allocation33_spill] sm:$0xff] %v9741_v63 }
 0x6c7   :  { %10903 = vst [vmem:[#allocation7_spill] sm:$0xff] %v9743_v57 }
 0x6c8   :  { %v6140_v7 = vpop.eup %6139  ;;  %10900 = vst [vmem:[#allocation41_spill] sm:$0xff] %v9737_v2  ;;  %10901 = vst [vmem:[#allocation35_spill] sm:$0xff] %v9739_v36  ;;  %v4090_v49 = vpop.permute.xlu0 %4089 }
 0x6c9   :  { %v3685_v10 = vrot.slane %v6140_v7, 6  ;;  %v3681_v13 = vmul.f32 %v6140_v7, %v9620_v53 }
 0x6cb   :  { %v3689_v20 = vmul.f32 %v3685_v10, %v9620_v53  ;;  %v5204_v53 = vrot.slane %v5117_v21, 7  ;;  %v9726_v32 = vrot.slane %v3681_v13, %v10894_v29  ;;  %v10897_v21 = vsub.s32 2, %v10896_v4  ;;  %v10917_v29 = vld [vmem:[#allocation95_spill] sm:$0xff] }
 0x6cc   :  { %v9747_v24 = vrot.slane %v3681_v13, %v10904_v23  ;;  %v10918_v4 = vld [vmem:[#allocation3_spill] sm:$0xff] }
 0x6cd   :  { %v5498_v52 = vsel %vm5496_vm13, %v3681_v13, %v3689_v20  ;;  %10895 = vst [vmem:[#allocation24_spill] sm:$0xff] %v9726_v32  ;;  %v9731_v41 = vrot.slane %v3689_v20, %v10897_v21  ;;  %v9735_v18 = vsel %vm606_vm2, %v5204_v53, %v5116_v61  ;;  %v9751_v10 = vrot.slane %v3689_v20, %v10906_v30  ;;  %v4346_v61 = vpop.permute.xlu0 %4345  ;;  %v10921_v30 = vld [vmem:[#allocation42_spill] sm:$0xff] }
 0x6ce   :  { %v5500_v56 = vsel %vm1085_vm9, %v5498_v52, 0.0  ;;  %10899 = vst [vmem:[#allocation36_spill] sm:$0xff] %v9735_v18  ;;  %10905 = vst [vmem:[#allocation37_spill] sm:$0xff] %v9747_v24  ;;  %v9755_v47 = vmul.f32 %v9726_v32, %v10908_v35  ;;  %v9759_v46 = vmul.f32 %v9726_v32, %v10909_v59  ;;  %v9763_v43 = vmul.f32 %v9726_v32, %v9480_v19  ;;  %v10925_v18 = vld [vmem:[#allocation94_spill] sm:$0xff] }
 0x6cf   :  { %5504 = vst [vmem:[%s10450_s10 + $0x18] sm:$0xf] %v5500_v56  ;;  %10898 = vst [vmem:[#allocation32_spill] sm:$0xff] %v9731_v41  ;;  %v9767_v16 = vmul.f32 %v9726_v32, %v9507_v17  ;;  %v9771_v13 = vmul.f32 %v9726_v32, %v9544_v9  ;;  %v9775_v20 = vmul.f32 %v9726_v32, %v9556_v6 }
 0x6d0   :  { %10907 = vst [vmem:[#allocation43_spill] sm:$0xff] %v9751_v10  ;;  %v9778_v62 = vmul.f32 %v9726_v32, %v4090_v49  ;;  %v9782_v45 = vmul.f32 %v9731_v41, %v10911_v22  ;;  %v9786_v27 = vmul.f32 %v9731_v41, %v9422_v42  ;;  %v9790_v1 = vmul.f32 %v9731_v41, %v9478_v38 }
 0x6d1   :  { %v9794_v55 = vmul.f32 %v9731_v41, %v9525_v44  ;;  %v9798_v0 = vmul.f32 %v9731_v41, %v9541_v26  ;;  %v9802_v52 = vmul.f32 %v9731_v41, %v9682_v25  ;;  %v9806_v5 = vmul.f32 %v9731_v41, %v10908_v35  ;;  %v10922_v35 = vld [vmem:[#allocation72_spill] sm:$0xff] }
 0x6d2   :  { %10910 = vst [vmem:[#allocation25_spill] sm:$0xff] %v9778_v62  ;;  %v9810_v48 = vmul.f32 %v9731_v41, %v10909_v59  ;;  %v9814_v56 = vmul.f32 %v9731_v41, %v9480_v19  ;;  %v9820_v31 = vmul.f32 %v9731_v41, %v9507_v17  ;;  %v9824_v51 = vmul.f32 %v9731_v41, %v9544_v9  ;;  %v10937_v62 = vld [vmem:[#allocation68_spill] sm:$0xff] }
 0x6d3   :  { %10912 = vst [vmem:[#allocation39_spill] sm:$0xff] %v9802_v52  ;;  %v9828_v3 = vmul.f32 %v9731_v41, %v9556_v6  ;;  %v9831_v37 = vmul.f32 %v9731_v41, %v4090_v49  ;;  %v9835_v19 = vmul.f32 %v10911_v22, %v9726_v32  ;;  %v9839_v40 = vmul.f32 %v9422_v42, %v9726_v32  ;;  %v10923_v22 = vld [vmem:[#allocation8_spill] sm:$0xff]  ;;  %v10944_v52 = vld [vmem:[#allocation27_spill] sm:$0xff] }
 0x6d4   :  { %v9843_v17 = vmul.f32 %v9478_v38, %v9726_v32  ;;  %v9847_v9 = vmul.f32 %v9525_v44, %v9726_v32  ;;  %v9851_v6 = vmul.f32 %v9541_v26, %v9726_v32  ;;  %v9855_v34 = vmul.f32 %v9682_v25, %v9726_v32 }
 0x6d5   :  { %10913 = vst [vmem:[#allocation38_spill] sm:$0xff] %v9831_v37  ;;  %v9859_v42 = vmul.f32 %v9747_v24, %v10915_v14  ;;  %v9863_v38 = vmul.f32 %v9747_v24, %v10916_v33  ;;  %v9867_v44 = vmul.f32 %v9747_v24, %v9494_v8  ;;  %v9871_v26 = vmul.f32 %v9747_v24, %v9514_v58 }
 0x6d6   :  { %10914 = vst [vmem:[#allocation58_spill] sm:$0xff] %v9855_v34  ;;  %v9875_v25 = vmul.f32 %v9747_v24, %v10917_v29  ;;  %v9879_v21 = vmul.f32 %v9747_v24, %v10918_v4  ;;  %v9882_v23 = vmul.f32 %v9747_v24, %v4346_v61  ;;  %v9886_v49 = vmul.f32 %v9751_v10, %v10921_v30 }
 0x6d7   :  { %v9890_v59 = vmul.f32 %v9751_v10, %v10922_v35  ;;  %v9894_v7 = vmul.f32 %v9751_v10, %v10923_v22  ;;  %v9900_v12 = vmul.f32 %v9751_v10, %v10924_v39  ;;  %v9904_v57 = vmul.f32 %v9751_v10, %v10925_v18 }
 0x6d8   :  { %10919 = vst [vmem:[#allocation59_spill] sm:$0xff] %v9879_v21  ;;  %10920 = vst [vmem:[#allocation61_spill] sm:$0xff] %v9882_v23  ;;  %v9908_v63 = vmul.f32 %v9751_v10, %v9703_v60  ;;  %v9912_v54 = vmul.f32 %v9751_v10, %v10915_v14  ;;  %v9916_v11 = vmul.f32 %v9751_v10, %v10916_v33 }
 0x6d9   :  { %v9816_v53 = vpop.permute.xlu1 %4183  ;;  %v9920_v36 = vmul.f32 %v9751_v10, %v9494_v8  ;;  %v9924_v2 = vmul.f32 %v9751_v10, %v9514_v58  ;;  %v9928_v37 = vmul.f32 %v9751_v10, %v10917_v29  ;;  %v9932_v14 = vmul.f32 %v9751_v10, %v10918_v4 }
 0x6da   :  { %10926 = vst [vmem:[#allocation66_spill] sm:$0xff] %v9908_v63  ;;  %v9935_v23 = vmul.f32 %v9751_v10, %v4346_v61  ;;  %v9939_v33 = vmul.f32 %v10921_v30, %v9747_v24  ;;  %v9943_v8 = vmul.f32 %v10922_v35, %v9747_v24  ;;  %v9947_v58 = vmul.f32 %v10923_v22, %v9747_v24  ;;  %v10933_v30 = vld [vmem:[#allocation48_spill] sm:$0xff]  ;;  %v10939_v63 = vld [vmem:[#allocation89_spill] sm:$0xff] }
 0x6db   :  { %10927 = vst [vmem:[#allocation77_spill] sm:$0xff] %v9928_v37  ;;  %10928 = vst [vmem:[#allocation65_spill] sm:$0xff] %v9932_v14  ;;  %v9951_v29 = vmul.f32 %v10924_v39, %v9747_v24  ;;  %v9955_v61 = vmul.f32 %v10925_v18, %v9747_v24  ;;  %v9959_v4 = vmul.f32 %v9703_v60, %v9747_v24  ;;  %v10942_v60 = vld [vmem:[#allocation97_spill] sm:$0xff] }
 0x6dc   :  { %10929 = vst [vmem:[#allocation70_spill] sm:$0xff] %v9935_v23  ;;  %v9963_v35 = vmul.f32 %v10933_v30, %v9726_v32  ;;  %v10935_v23 = vld [vmem:[#allocation82_spill] sm:$0xff]  ;;  %v9971_v39 = vmul.f32 %v10937_v62, %v9726_v32  ;;  %v9975_v18 = vmul.f32 %v10939_v63, %v9726_v32 }
 0x6dd   :  { %10930 = vst [vmem:[#allocation63_spill] sm:$0xff] %v9951_v29  ;;  %10931 = vst [vmem:[#allocation79_spill] sm:$0xff] %v9955_v61  ;;  %v9967_v22 = vmul.f32 %v10935_v23, %v9726_v32 }
 0x6de   :  { %v9896_v15 = vpop.permute.xlu1 %4425  ;;  %10932 = vst [vmem:[#allocation4_spill] sm:$0xff] %v9959_v4  ;;  %10934 = vst [vmem:[#allocation2_spill] sm:$0xff] %v9963_v35  ;;  %v9981_v4 = vmul.f32 %v10942_v60, %v9726_v32  ;;  %v9985_v35 = vmul.f32 %v10944_v52, %v9726_v32 }
 0x6df   :  { %10936 = vst [vmem:[#allocation45_spill] sm:$0xff] %v9967_v22  ;;  %10938 = vst [vmem:[#allocation74_spill] sm:$0xff] %v9971_v39  ;;  %v10946_v22 = vld [vmem:[#allocation50_spill] sm:$0xff]  ;;  %v10948_v39 = vld [vmem:[#allocation23_spill] sm:$0xff] }
 0x6e0   :  { %10940 = vst [vmem:[#allocation40_spill] sm:$0xff] %v9975_v18  ;;  %10943 = vst [vmem:[#allocation81_spill] sm:$0xff] %v9981_v4  ;;  %v9989_v61 = vmul.f32 %v10946_v22, %v9731_v41  ;;  %v9993_v37 = vmul.f32 %v10948_v39, %v9731_v41  ;;  %v10950_v18 = vld [vmem:[#allocation86_spill] sm:$0xff]  ;;  %v10954_v4 = vld [vmem:[#allocation96_spill] sm:$0xff] }
 0x6e1   :  { %10945 = vst [vmem:[#allocation95_spill] sm:$0xff] %v9985_v35  ;;  %v9997_v14 = vmul.f32 %v10950_v18, %v9731_v41  ;;  %v10005_v29 = vmul.f32 %v10954_v4, %v9731_v41  ;;  %v10009_v35 = vmul.f32 %v9656_v28, %v9731_v41 }
 0x6e2   :  { %10947 = vst [vmem:[#allocation3_spill] sm:$0xff] %v9989_v61  ;;  %10949 = vst [vmem:[#allocation42_spill] sm:$0xff] %v9993_v37  ;;  %v10013_v61 = vmul.f32 %v9723_v50, %v9731_v41  ;;  %v10017_v37 = vmul.f32 %v10933_v30, %v9731_v41  ;;  %v10033_v50 = vmul.f32 %v10942_v60, %v9731_v41 }
 0x6e3   :  { %v9977_v34 = vpop.permute.xlu1 %4881  ;;  %10951 = vst [vmem:[#allocation72_spill] sm:$0xff] %v9997_v14  ;;  %10955 = vst [vmem:[#allocation91_spill] sm:$0xff] %v10005_v29  ;;  %v10021_v14 = vmul.f32 %v10935_v23, %v9731_v41  ;;  %v10029_v29 = vmul.f32 %v10939_v63, %v9731_v41  ;;  %v10037_v30 = vmul.f32 %v10944_v52, %v9731_v41 }
 0x6e4   :  { %10941 = vst [vmem:[#allocation47_spill] sm:$0xff] %v9977_v34  ;;  %v10952_v34 = vld [vmem:[#allocation90_spill] sm:$0xff]  ;;  %10956 = vst [vmem:[#allocation94_spill] sm:$0xff] %v10009_v35  ;;  %v10041_v23 = vmul.f32 %v10946_v22, %v9726_v32  ;;  %v10049_v63 = vmul.f32 %v10950_v18, %v9726_v32  ;;  %v10057_v52 = vmul.f32 %v10954_v4, %v9726_v32  ;;  %v10972_v18 = vld [vmem:[#allocation80_spill] sm:$0xff] }
 0x6e5   :  { %v10001_v21 = vmul.f32 %v10952_v34, %v9731_v41  ;;  %10957 = vst [vmem:[#allocation48_spill] sm:$0xff] %v10013_v61  ;;  %10958 = vst [vmem:[#allocation82_spill] sm:$0xff] %v10021_v14  ;;  %v10053_v60 = vmul.f32 %v10952_v34, %v9726_v32  ;;  %v10063_v22 = vmul.f32 %v9656_v28, %v9726_v32  ;;  %v10974_v34 = vld [vmem:[#allocation69_spill] sm:$0xff] }
 0x6e6   :  { %10960 = vst [vmem:[#allocation89_spill] sm:$0xff] %v10029_v29  ;;  %10961 = vst [vmem:[#allocation97_spill] sm:$0xff] %v10033_v50  ;;  %v10071_v35 = vmul.f32 %v10972_v18, %v9747_v24  ;;  %v10075_v50 = vmul.f32 %v10974_v34, %v9747_v24  ;;  %v10976_v4 = vld [vmem:[#allocation93_spill] sm:$0xff]  ;;  %v4265_v14 = vmul.f32 %v9816_v53, %v9726_v32 }
 0x6e7   :  { %10953 = vst [vmem:[#allocation8_spill] sm:$0xff] %v10001_v21  ;;  %v10025_v21 = vmul.f32 %v10937_v62, %v9731_v41  ;;  %10962 = vst [vmem:[#allocation27_spill] sm:$0xff] %v10037_v30  ;;  %v10045_v62 = vmul.f32 %v10948_v39, %v9726_v32  ;;  %v10970_v39 = vld [vmem:[#allocation51_spill] sm:$0xff] }
 0x6e8   :  { %10963 = vst [vmem:[#allocation50_spill] sm:$0xff] %v10041_v23  ;;  %10965 = vst [vmem:[#allocation86_spill] sm:$0xff] %v10049_v63  ;;  %v10059_v61 = vpop.permute.xlu1 %4961  ;;  %v10067_v30 = vmul.f32 %v10970_v39, %v9747_v24  ;;  %v4281_v32 = vadd.f32 %v4265_v14, %v9828_v3  ;;  %v11006_v14 = vld [vmem:[#allocation81_spill] sm:$0xff] }
 0x6e9   :  { %10959 = vst [vmem:[#allocation68_spill] sm:$0xff] %v10025_v21  ;;  %10964 = vst [vmem:[#allocation23_spill] sm:$0xff] %v10045_v62 }
 0x6ea   :  { %10966 = vst [vmem:[#allocation90_spill] sm:$0xff] %v10053_v60  ;;  %10967 = vst [vmem:[#allocation96_spill] sm:$0xff] %v10057_v52  ;;  %v10079_v52 = vmul.f32 %v10976_v4, %v9747_v24 }
 0x6eb   :  { %10968 = vst [vmem:[#allocation99_spill] sm:$0xff] %v10059_v61  ;;  %10969 = vst [vmem:[#allocation100_spill] sm:$0xff] %v10063_v22  ;;  %v10978_v61 = vld [vmem:[#allocation98_spill] sm:$0xff]  ;;  %v10980_v22 = vld [vmem:[#allocation52_spill] sm:$0xff] }
 0x6ec   :  { %10971 = vst [vmem:[#allocation51_spill] sm:$0xff] %v10067_v30  ;;  %10973 = vst [vmem:[#allocation80_spill] sm:$0xff] %v10071_v35  ;;  %v10083_v28 = vmul.f32 %v10978_v61, %v9747_v24  ;;  %v10087_v60 = vmul.f32 %v10980_v22, %v9751_v10  ;;  %v10982_v30 = vld [vmem:[#allocation83_spill] sm:$0xff] }
 0x6ed   :  { %10975 = vst [vmem:[#allocation69_spill] sm:$0xff] %v10075_v50  ;;  %10977 = vst [vmem:[#allocation93_spill] sm:$0xff] %v10079_v52  ;;  %v10091_v29 = vmul.f32 %v10982_v30, %v9751_v10  ;;  %v10984_v35 = vld [vmem:[#allocation87_spill] sm:$0xff]  ;;  %v10986_v50 = vld [vmem:[#allocation92_spill] sm:$0xff]  ;;  %v10123_v23 = vpop.permute.xlu1 %4084 }
 0x6ee   :  { %10979 = vst [vmem:[#allocation98_spill] sm:$0xff] %v10083_v28  ;;  %10981 = vst [vmem:[#allocation52_spill] sm:$0xff] %v10087_v60  ;;  %v10095_v63 = vmul.f32 %v10984_v35, %v9751_v10  ;;  %v10099_v21 = vmul.f32 %v10986_v50, %v9751_v10  ;;  %v10988_v52 = vld [vmem:[#allocation26_spill] sm:$0xff]  ;;  %v5012_v28 = vmul.f32 %v10970_v39, %v9751_v10 }
 0x6ef   :  { %10983 = vst [vmem:[#allocation83_spill] sm:$0xff] %v10091_v29  ;;  %v10103_v62 = vmul.f32 %v10988_v52, %v9751_v10  ;;  %v5013_v60 = vmul.f32 %v10972_v18, %v9751_v10  ;;  %v5014_v29 = vmul.f32 %v10974_v34, %v9751_v10  ;;  %v5028_v39 = vmul.f32 %v10980_v22, %v9747_v24 }
 0x6f0   :  { %10985 = vst [vmem:[#allocation87_spill] sm:$0xff] %v10095_v63  ;;  %10987 = vst [vmem:[#allocation92_spill] sm:$0xff] %v10099_v21  ;;  %v4217_v63 = vmul.f32 %v9731_v41, %v9816_v53  ;;  %v5015_v21 = vmul.f32 %v10976_v4, %v9751_v10  ;;  %v5029_v18 = vmul.f32 %v10982_v30, %v9747_v24 }
 0x6f1   :  { %10989 = vst [vmem:[#allocation26_spill] sm:$0xff] %v10103_v62  ;;  %v5016_v62 = vmul.f32 %v10978_v61, %v9751_v10  ;;  %10990 = vst [vmem:[#allocation101_spill] sm:$0xff] %v10123_v23  ;;  %v5030_v34 = vmul.f32 %v10984_v35, %v9747_v24  ;;  %v5031_v53 = vmul.f32 %v10986_v50, %v9747_v24 }
 0x6f2   :  { %v5032_v4 = vmul.f32 %v10988_v52, %v9747_v24  ;;  %v4228_v61 = vsub.f32 %v9755_v47, %v9782_v45  ;;  %v4229_v22 = vsub.f32 %v9759_v46, %v9786_v27  ;;  %v4230_v30 = vsub.f32 %v9763_v43, %v9790_v1 }
 0x6f3   :  { %v4231_v41 = vsub.f32 %v9767_v16, %v9794_v55  ;;  %v4232_v35 = vsub.f32 %v9771_v13, %v9798_v0  ;;  %v4233_v50 = vsub.f32 %v9775_v20, %v4217_v63  ;;  %v4276_v52 = vadd.f32 %v9835_v19, %v9806_v5  ;;  %v10163_v55 = vpop.permute.xlu1 %4341  ;;  %v10994_v19 = vld [vmem:[#allocation65_spill] sm:$0xff]  ;;  %v11007_v63 = vld [vmem:[#allocation50_spill] sm:$0xff] }
 0x6f4   :  { %v4277_v47 = vadd.f32 %v9839_v40, %v9810_v48  ;;  %v4278_v46 = vadd.f32 %v9843_v17, %v9814_v56  ;;  %v4279_v43 = vadd.f32 %v9847_v9, %v9820_v31  ;;  %v4280_v16 = vadd.f32 %v9851_v6, %v9824_v51  ;;  %10991 = vst [vmem:[#allocation102_spill] sm:$0xff] %v10163_v55  ;;  %v10992_v31 = vld [vmem:[#allocation63_spill] sm:$0xff]  ;;  %v10998_v6 = vld [vmem:[#allocation2_spill] sm:$0xff] }
 0x6f5   :  { %v4468_v13 = vsub.f32 %v9859_v42, %v9886_v49  ;;  %v4469_v20 = vsub.f32 %v9863_v38, %v9890_v59  ;;  %v4470_v45 = vsub.f32 %v9867_v44, %v9894_v7  ;;  %v4457_v27 = vmul.f32 %v9751_v10, %v9896_v15  ;;  %v10993_v51 = vld [vmem:[#allocation59_spill] sm:$0xff]  ;;  %v11000_v38 = vld [vmem:[#allocation45_spill] sm:$0xff]  ;;  %v11004_v49 = vld [vmem:[#allocation40_spill] sm:$0xff] }
 0x6f6   :  { %v4505_v1 = vmul.f32 %v9896_v15, %v9747_v24  ;;  %v4471_v0 = vsub.f32 %v9871_v26, %v9900_v12  ;;  %v4472_v5 = vsub.f32 %v9875_v25, %v9904_v57  ;;  %v4516_v48 = vadd.f32 %v9939_v33, %v9912_v54  ;;  %v10995_v12 = vld [vmem:[#allocation77_spill] sm:$0xff]  ;;  %v10996_v17 = vld [vmem:[#allocation79_spill] sm:$0xff]  ;;  %v10999_v54 = vld [vmem:[#allocation42_spill] sm:$0xff] }
 0x6f7   :  { %v4517_v7 = vadd.f32 %v9943_v8, %v9916_v11  ;;  %v4518_v56 = vadd.f32 %v9947_v58, %v9920_v36  ;;  %v4519_v15 = vadd.f32 %v10992_v31, %v9924_v2  ;;  %v4473_v3 = vsub.f32 %v10993_v51, %v4457_v27  ;;  %v10997_v57 = vld [vmem:[#allocation3_spill] sm:$0xff]  ;;  %v11001_v11 = vld [vmem:[#allocation72_spill] sm:$0xff]  ;;  %v11002_v26 = vld [vmem:[#allocation74_spill] sm:$0xff] }
 0x6f8   :  { %v4521_v40 = vadd.f32 %v4505_v1, %v10994_v19  ;;  %v4520_v9 = vadd.f32 %v10996_v17, %v10995_v12  ;;  %v4772_v42 = vsub.f32 %v10998_v6, %v10997_v57  ;;  %v4773_v44 = vsub.f32 %v11000_v38, %v10999_v54  ;;  %v11003_v36 = vld [vmem:[#allocation8_spill] sm:$0xff]  ;;  %v11005_v2 = vld [vmem:[#allocation91_spill] sm:$0xff]  ;;  %v11008_v1 = vld [vmem:[#allocation82_spill] sm:$0xff]  ;;  %v10199_v38 = vpop.permute.xlu1 %4661 }
 0x6f9   :  { %v4774_v25 = vsub.f32 %v11002_v26, %v11001_v11  ;;  %v4775_v59 = vsub.f32 %v11004_v49, %v11003_v36  ;;  %v4776_v33 = vsub.f32 %v11006_v14, %v11005_v2  ;;  %v4537_v8 = vadd.f32 %v4473_v3, %v4233_v50  ;;  %v11009_v31 = vld [vmem:[#allocation23_spill] sm:$0xff]  ;;  %v11010_v19 = vld [vmem:[#allocation68_spill] sm:$0xff]  ;;  %v11011_v12 = vld [vmem:[#allocation86_spill] sm:$0xff]  ;;  %11014 = vst [vmem:[#allocation63_spill] sm:$0xff] %v10199_v38 }
 0x6fa   :  { %v4553_v58 = vadd.f32 %v4521_v40, %v4281_v32  ;;  %v4820_v27 = vadd.f32 %v11007_v63, %v10017_v37  ;;  %v4821_v51 = vadd.f32 %v11009_v31, %v11008_v1  ;;  %v4822_v17 = vadd.f32 %v11011_v12, %v11010_v19  ;;  %v11012_v57 = vld [vmem:[#allocation89_spill] sm:$0xff]  ;;  %v11013_v6 = vld [vmem:[#allocation90_spill] sm:$0xff]  ;;  %v11016_v26 = vld [vmem:[#allocation96_spill] sm:$0xff] }
 0x6fb   :  { %v4823_v54 = vadd.f32 %v11013_v6, %v11012_v57  ;;  %v11015_v11 = vld [vmem:[#allocation97_spill] sm:$0xff]  ;;  %v11017_v49 = vld [vmem:[#allocation52_spill] sm:$0xff]  ;;  %v11018_v50 = vld [vmem:[#allocation51_spill] sm:$0xff]  ;;  %v5045_v2 = vadd.f32 %v5029_v18, %v5013_v60  ;;  %v5044_v38 = vadd.f32 %v5028_v39, %v5012_v28  ;;  %v5046_v10 = vadd.f32 %v5030_v34, %v5014_v29 }
 0x6fc   :  { %v4824_v36 = vadd.f32 %v11016_v26, %v11015_v11  ;;  %v4996_v32 = vsub.f32 %v11018_v50, %v11017_v49  ;;  %v11019_v3 = vld [vmem:[#allocation83_spill] sm:$0xff]  ;;  %v11020_v40 = vld [vmem:[#allocation80_spill] sm:$0xff]  ;;  %v11022_v63 = vld [vmem:[#allocation69_spill] sm:$0xff]  ;;  %v5047_v24 = vadd.f32 %v5031_v53, %v5015_v21  ;;  %v4569_v11 = vmul.f32 %v4537_v8, %v4537_v8 }
 0x6fd   :  { %v4997_v37 = vsub.f32 %v11020_v40, %v11019_v3  ;;  %v11021_v14 = vld [vmem:[#allocation87_spill] sm:$0xff]  ;;  %v11023_v31 = vld [vmem:[#allocation92_spill] sm:$0xff]  ;;  %v11024_v19 = vld [vmem:[#allocation93_spill] sm:$0xff]  ;;  %v4585_v26 = vmul.f32 %v4553_v58, %v4553_v58  ;;  %v5048_v23 = vadd.f32 %v5032_v4, %v5016_v62  ;;  %v4532_v49 = vadd.f32 %v4468_v13, %v4228_v61 }
 0x6fe   :  { %v4998_v1 = vsub.f32 %v11022_v63, %v11021_v14  ;;  %v4999_v12 = vsub.f32 %v11024_v19, %v11023_v31  ;;  %v11025_v55 = vld [vmem:[#allocation26_spill] sm:$0xff]  ;;  %v4533_v50 = vadd.f32 %v4469_v20, %v4229_v22  ;;  %v4534_v3 = vadd.f32 %v4470_v45, %v4230_v30  ;;  %v10213_v63 = vpop.permute.xlu1 %4885 }
 0x6ff   :  { %v11026_v57 = vld [vmem:[#allocation98_spill] sm:$0xff]  ;;  %v4535_v40 = vadd.f32 %v4471_v0, %v4231_v41  ;;  %v4536_v60 = vadd.f32 %v4472_v5, %v4232_v35  ;;  %v5061_v18 = vadd.f32 %v4997_v37, %v4773_v44  ;;  %v5077_v14 = vadd.f32 %v5045_v2, %v4821_v51  ;;  %v11028_v44 = vld [vmem:[#allocation24_spill] sm:$0xff]  ;;  %v11031_v51 = vld [vmem:[#allocation47_spill] sm:$0xff] }
 0x700   :  { %v5000_v6 = vsub.f32 %v11026_v57, %v11025_v55  ;;  %v4548_v19 = vadd.f32 %v4516_v48, %v4276_v52  ;;  %v4549_v31 = vadd.f32 %v4517_v7, %v4277_v47  ;;  %v4550_v55 = vadd.f32 %v4518_v56, %v4278_v46  ;;  %v11033_v2 = vld [vmem:[#allocation102_spill] sm:$0xff] }
 0x701   :  { %v4551_v57 = vadd.f32 %v4519_v15, %v4279_v43  ;;  %v10215_v28 = vadd.f32 %v4585_v26, %v4569_v11  ;;  %v4552_v29 = vadd.f32 %v4520_v9, %v4280_v16  ;;  %v5060_v21 = vadd.f32 %v4996_v32, %v4772_v42  ;;  %v11027_v42 = vld [vmem:[#allocation101_spill] sm:$0xff] }
 0x702   :  { %v5062_v39 = vadd.f32 %v4998_v1, %v4774_v25  ;;  %v5063_v34 = vadd.f32 %v4999_v12, %v4775_v59  ;;  %v5064_v62 = vadd.f32 %v5000_v6, %v4776_v33  ;;  %v5076_v53 = vadd.f32 %v5044_v38, %v4820_v27  ;;  %v10217_v47 = vpop.permute.xlu1 %4965  ;;  %v11029_v59 = vld [vmem:[#allocation32_spill] sm:$0xff]  ;;  %v11030_v27 = vld [vmem:[#allocation37_spill] sm:$0xff] }
 0x703   :  { %v5078_v4 = vadd.f32 %v5046_v10, %v4822_v17  ;;  %v5079_v61 = vadd.f32 %v5047_v24, %v4823_v54  ;;  %v5080_v41 = vadd.f32 %v5048_v23, %v4824_v36  ;;  %v5093_v22 = vmul.f32 %v5061_v18, %v5061_v18  ;;  %v11032_v36 = vld [vmem:[#allocation43_spill] sm:$0xff]  ;;  %v11036_v18 = vld [vmem:[#allocation66_spill] sm:$0xff] }
 0x704   :  { %v5109_v30 = vmul.f32 %v5077_v14, %v5077_v14  ;;  %v4564_v35 = vmul.f32 %v4532_v49, %v4532_v49  ;;  %v4565_v13 = vmul.f32 %v4533_v50, %v4533_v50  ;;  %v4566_v20 = vmul.f32 %v4534_v3, %v4534_v3  ;;  %v11034_v50 = vld [vmem:[#allocation39_spill] sm:$0xff] }
 0x705   :  { %v4567_v52 = vmul.f32 %v4535_v40, %v4535_v40  ;;  %v5170_v46 = vrot.slane %v10215_v28, 3  ;;  %v4568_v43 = vmul.f32 %v4536_v60, %v4536_v60  ;;  %v4580_v16 = vmul.f32 %v4548_v19, %v4548_v19  ;;  %v11035_v40 = vld [vmem:[#allocation58_spill] sm:$0xff]  ;;  %v11037_v19 = vld [vmem:[#allocation4_spill] sm:$0xff]  ;;  %v11056_v28 = vld [vmem:[#allocation7_spill] sm:$0xff] }
 0x706   :  { %v4581_v45 = vmul.f32 %v4549_v31, %v4549_v31  ;;  %v4582_v0 = vmul.f32 %v4550_v55, %v4550_v55  ;;  %v4583_v5 = vmul.f32 %v4551_v57, %v4551_v57  ;;  %v5094_v48 = vmul.f32 %v5062_v39, %v5062_v39  ;;  %v4194_v38 = vpop.permute.xlu1 %4193  ;;  %v11038_v39 = vld [vmem:[#allocation99_spill] sm:$0xff] }
 0x707   :  { %v5110_v7 = vmul.f32 %v5078_v4, %v5078_v4  ;;  %v4584_v10 = vmul.f32 %v4552_v29, %v4552_v29  ;;  %v5092_v24 = vmul.f32 %v5060_v21, %v5060_v21  ;;  %v5095_v23 = vmul.f32 %v5063_v34, %v5063_v34 }
 0x708   :  { %v5125_v56 = vadd.f32 %v5109_v30, %v5093_v22  ;;  %v5096_v15 = vmul.f32 %v5064_v62, %v5064_v62  ;;  %v5108_v9 = vmul.f32 %v5076_v53, %v5076_v53  ;;  %v4114_v25 = vmul.f32 %v11028_v44, %v11027_v42 }
 0x709   :  { %v4250_v33 = vmul.f32 %v11029_v59, %v11027_v42  ;;  %v5111_v8 = vmul.f32 %v5079_v61, %v5079_v61  ;;  %v5112_v58 = vmul.f32 %v5080_v41, %v5080_v41  ;;  %v10226_v17 = vmul.f32 %v11031_v51, %v11030_v27 }
 0x70a   :  { %v4597_v54 = vadd.f32 %v4581_v45, %v4565_v13  ;;  %v5017_v32 = vmul.f32 %v11031_v51, %v11032_v36  ;;  %v5126_v37 = vadd.f32 %v5110_v7, %v5094_v48  ;;  %v4370_v1 = vmul.f32 %v11030_v27, %v11033_v2 }
 0x70b   :  { %v4490_v12 = vmul.f32 %v11032_v36, %v11033_v2  ;;  %v4596_v6 = vadd.f32 %v4580_v16, %v4564_v35  ;;  %v4598_v11 = vadd.f32 %v4582_v0, %v4566_v20  ;;  %v4599_v26 = vadd.f32 %v4583_v5, %v4567_v52  ;;  %v4434_v61 = vpop.permute.xlu1 %4433 }
 0x70c   :  { %v5218_v49 = vrot.slane %v5125_v56, 7  ;;  %v4234_v3 = vsub.f32 %v4114_v25, %v11034_v50  ;;  %v4282_v60 = vadd.f32 %v11035_v40, %v4250_v33  ;;  %v4474_v14 = vsub.f32 %v4370_v1, %v11036_v18  ;;  %v11041_v33 = vld [vmem:[#allocation38_spill] sm:$0xff]  ;;  %v11045_v18 = vld [vmem:[#allocation95_spill] sm:$0xff] }
 0x70d   :  { %v4522_v31 = vadd.f32 %v11037_v19, %v4490_v12  ;;  %v5124_v55 = vadd.f32 %v5108_v9, %v5092_v24  ;;  %v5127_v57 = vadd.f32 %v5111_v8, %v5095_v23  ;;  %v5128_v29 = vadd.f32 %v5112_v58, %v5096_v15  ;;  %v11039_v23 = vld [vmem:[#allocation25_spill] sm:$0xff]  ;;  %v11042_v58 = vld [vmem:[#allocation70_spill] sm:$0xff]  ;;  %v11043_v12 = vld [vmem:[#allocation63_spill] sm:$0xff] }
 0x70e   :  { %v5162_v21 = vrot.slane %v4597_v54, 7  ;;  %v4985_v34 = vmul.f32 %v11038_v39, %v11032_v36  ;;  %v5220_v62 = vrot.slane %v5126_v37, 6  ;;  %v4538_v53 = vadd.f32 %v4474_v14, %v4234_v3  ;;  %v11040_v15 = vld [vmem:[#allocation61_spill] sm:$0xff]  ;;  %v11046_v19 = vld [vmem:[#allocation27_spill] sm:$0xff] }
 0x70f   :  { %v4554_v4 = vadd.f32 %v4522_v31, %v4282_v60  ;;  %v5033_v41 = vmul.f32 %v11038_v39, %v11030_v27  ;;  %v5164_v22 = vrot.slane %v4598_v11, 6  ;;  %v5219_v30 = vsel %vm606_vm2, %v5218_v49, %v5124_v55  ;;  %v11044_v60 = vld [vmem:[#allocation94_spill] sm:$0xff]  ;;  %v11047_v31 = vld [vmem:[#allocation100_spill] sm:$0xff]  ;;  %v11048_v39 = vld [vmem:[#allocation55_spill] sm:$0xff] }
 0x710   :  { %v4219_v35 = vmul.f32 %v11029_v59, %v4194_v38  ;;  %v4570_v13 = vmul.f32 %v4538_v53, %v4538_v53  ;;  %v4267_v52 = vmul.f32 %v4194_v38, %v11028_v44  ;;  %v4459_v16 = vmul.f32 %v11032_v36, %v4434_v61 }
 0x711   :  { %v4586_v20 = vmul.f32 %v4554_v4, %v4554_v4  ;;  %v4600_v45 = vadd.f32 %v4584_v10, %v4568_v43  ;;  %v5166_v0 = vrot.slane %v4599_v26, 5  ;;  %v5163_v5 = vsel %vm606_vm2, %v5162_v21, %v4596_v6  ;;  %v4666_v43 = vpop.permute.xlu1 %4665 }
 0x712   :  { %v4507_v48 = vmul.f32 %v4434_v61, %v11030_v27  ;;  %v5001_v7 = vsub.f32 %v10226_v17, %v4985_v34  ;;  %v5221_v24 = vsel %vm608_vm3, %v5220_v62, %v5219_v30  ;;  %v4235_v56 = vsub.f32 %v11039_v23, %v4219_v35  ;;  %v11049_v61 = vld [vmem:[#allocation41_spill] sm:$0xff]  ;;  %v11050_v35 = vld [vmem:[#allocation48_spill] sm:$0xff] }
 0x713   :  { %v4475_v9 = vsub.f32 %v11040_v15, %v4459_v16  ;;  %v5049_v42 = vadd.f32 %v5033_v41, %v5017_v32  ;;  %v5222_v25 = vrot.slane %v5127_v57, 5  ;;  %v4283_v8 = vadd.f32 %v4267_v52, %v11041_v33  ;;  %v11054_v23 = vld [vmem:[#allocation76_spill] sm:$0xff]  ;;  %v11055_v33 = vld [vmem:[#allocation33_spill] sm:$0xff] }
 0x714   :  { %v4523_v51 = vadd.f32 %v4507_v48, %v11042_v58  ;;  %v5224_v10 = vrot.slane %v5128_v29, 4  ;;  %v4602_v54 = vadd.f32 %v4586_v20, %v4570_v13  ;;  %v5165_v38 = vsel %vm608_vm3, %v5164_v22, %v5163_v5  ;;  %v11052_v5 = vld [vmem:[#allocation75_spill] sm:$0xff]  ;;  %v11053_v48 = vld [vmem:[#allocation84_spill] sm:$0xff] }
 0x715   :  { %v4539_v37 = vadd.f32 %v4475_v9, %v4235_v56  ;;  %v4986_v17 = vmul.f32 %v10217_v47, %v11032_v36  ;;  %v5034_v2 = vmul.f32 %v10217_v47, %v11030_v27  ;;  %v5223_v32 = vsel %vm610_vm4, %v5222_v25, %v5221_v24  ;;  %v4746_v21 = vpop.permute.xlu1 %4745 }
 0x716   :  { %v4555_v1 = vadd.f32 %v4523_v51, %v4283_v8  ;;  %v4682_v6 = vmul.f32 %v11043_v12, %v11028_v44  ;;  %v4794_v11 = vmul.f32 %v11043_v12, %v11029_v59  ;;  %v10265_v49 = vsel %vm612_vm5, %v5224_v10, %v5223_v32  ;;  %v11057_v10 = vld [vmem:[#allocation36_spill] sm:$0xff] }
 0x717   :  { %v4571_v26 = vmul.f32 %v4539_v37, %v4539_v37  ;;  %v4906_v50 = vmul.f32 %v10213_v63, %v11030_v27  ;;  %v5018_v3 = vmul.f32 %v10213_v63, %v11032_v36  ;;  %v5167_v40 = vsel %vm610_vm4, %v5166_v0, %v5165_v38 }
 0x718   :  { %v4587_v47 = vmul.f32 %v4555_v1, %v4555_v1  ;;  %v4777_v14 = vsub.f32 %v11045_v18, %v11044_v60  ;;  %v4825_v55 = vadd.f32 %v11047_v31, %v11046_v19  ;;  %v5168_v57 = vrot.slane %v4600_v45, 4  ;;  %v11051_v45 = vld [vmem:[#allocation35_spill] sm:$0xff] }
 0x719   :  { %v5172_v29 = vrot.slane %v4602_v54, 2  ;;  %v4810_v34 = vmul.f32 %v11048_v39, %v11028_v44  ;;  %v5002_v62 = vsub.f32 %v4906_v50, %v4986_v17  ;;  %v5050_v53 = vadd.f32 %v5034_v2, %v5018_v3  ;;  %v11058_v54 = vld [vmem:[#allocation54_spill] sm:$0xff]  ;;  %v4890_v17 = vpop.permute.xlu0 %4889  ;;  %v11061_v19 = vld [vmem:[#allocation71_spill] sm:$0xff] }
 0x71a   :  { %v4603_v4 = vadd.f32 %v4587_v47, %v4571_v26  ;;  %v5208_v63 = vrot.slane %v11049_v61, 5  ;;  %v5065_v41 = vadd.f32 %v5001_v7, %v4777_v14  ;;  %v5081_v22 = vadd.f32 %v5049_v42, %v4825_v55  ;;  %v4938_v42 = vpop.permute.xlu1 %4937  ;;  %v11060_v14 = vld [vmem:[#allocation73_spill] sm:$0xff] }
 0x71b   :  { %v5169_v30 = vsel %vm612_vm5, %v5168_v57, %v5167_v40  ;;  %v4778_v13 = vsub.f32 %v4682_v6, %v11050_v35  ;;  %v4826_v20 = vadd.f32 %v4810_v34, %v4794_v11  ;;  %v5212_v0 = vrot.slane %v11051_v45, 3  ;;  %v11063_v57 = vld [vmem:[#allocation78_spill] sm:$0xff] }
 0x71c   :  { %v5171_v52 = vsel %vm614_vm6, %v5170_v46, %v5169_v30  ;;  %v5174_v16 = vrot.slane %v4603_v4, 1  ;;  %v4899_v24 = vmul.f32 %v11053_v48, %v11052_v5  ;;  %v5011_v56 = vmul.f32 %v11053_v48, %v11054_v23 }
 0x71d   :  { %v5173_v7 = vsel %vm616_vm7, %v5172_v29, %v5171_v52  ;;  %v5066_v15 = vadd.f32 %v5002_v62, %v4778_v13  ;;  %v5082_v9 = vadd.f32 %v5050_v53, %v4826_v20  ;;  %v5122_v8 = vadd.f32 %v11056_v28, %v11055_v33  ;;  %v11064_v20 = vld [vmem:[#allocation29_spill] sm:$0xff]  ;;  %v5180_v33 = vpop.xlane.xlu0 %5179 }
 0x71e   :  { %v5175_v25 = vsel %vm618_vm8, %v5174_v16, %v5173_v7  ;;  %v4979_v46 = vmul.f32 %v4938_v42, %v11054_v23  ;;  %v5027_v58 = vmul.f32 %v4938_v42, %v11052_v5  ;;  %v11059_v38 = vrot.slane %v11058_v54, 6  ;;  %v4970_v18 = vpop.permute.xlu1 %4969 }
 0x71f   :  { %v5181_v51 = vsel %vm1085_vm9, %v5175_v25, 0.0  ;;  %v5097_v2 = vmul.f32 %v5065_v41, %v5065_v41  ;;  %v5113_v1 = vmul.f32 %v5081_v22, %v5081_v22  ;;  %v4763_v32 = vmul.f32 %v4746_v21, %v11029_v59 }
 0x720   :  { %v5207_v37 = vsel %vm608_vm3, %v11059_v38, %v11057_v10  ;;  %v4811_v12 = vmul.f32 %v4746_v21, %v11028_v44  ;;  %5182 = vadd.xlane.f32.xlu1 %v5181_v51  ;;  %v4907_v6 = vmul.f32 %v4890_v17, %v11030_v27  ;;  %v5019_v11 = vmul.f32 %v4890_v17, %v11032_v36 }
 0x721   :  { %v4995_v26 = vsub.f32 %v4899_v24, %v4979_v46  ;;  %v5043_v50 = vadd.f32 %v5027_v58, %v5011_v56  ;;  %v5098_v3 = vmul.f32 %v5066_v15, %v5066_v15  ;;  %v5114_v47 = vmul.f32 %v5082_v9, %v5082_v9 }
 0x722   :  { %v4683_v40 = vmul.f32 %v4666_v43, %v11028_v44  ;;  %v4795_v60 = vmul.f32 %v4666_v43, %v11029_v59  ;;  %v11062_v31 = vsub.f32 %v11060_v14, %v11061_v19  ;;  %v4987_v21 = vmul.f32 %v4970_v18, %v11032_v36 }
 0x723   :  { %v5075_v29 = vadd.f32 %v5043_v50, %v11063_v57  ;;  %v5035_v39 = vmul.f32 %v4970_v18, %v11030_v27  ;;  %v5129_v34 = vadd.f32 %v5113_v1, %v5097_v2  ;;  %v5209_v4 = vsel %vm610_vm4, %v5208_v63, %v5207_v37 }
 0x724   :  { %v5059_v55 = vadd.f32 %v4995_v26, %v11062_v31  ;;  %v4779_v62 = vsub.f32 %v4683_v40, %v4763_v32  ;;  %v4827_v53 = vadd.f32 %v4811_v12, %v4795_v60  ;;  %v5003_v41 = vsub.f32 %v4907_v6, %v4987_v21 }
 0x725   :  { %v5107_v44 = vmul.f32 %v5075_v29, %v5075_v29  ;;  %v5051_v59 = vadd.f32 %v5035_v39, %v5019_v11  ;;  %v5130_v43 = vadd.f32 %v5114_v47, %v5098_v3  ;;  %v5214_v22 = vrot.slane %v5122_v8, 2 }
 0x726   :  { %v5091_v61 = vmul.f32 %v5059_v55, %v5059_v55  ;;  %v5067_v30 = vadd.f32 %v5003_v41, %v4779_v62  ;;  %v11065_v52 = vrot.slane %v11064_v20, 4  ;;  %v5226_v16 = vrot.slane %v5129_v34, 3 }
 0x727   :  { %v5083_v35 = vadd.f32 %v5051_v59, %v4827_v53  ;;  %v5228_v63 = vrot.slane %v5130_v43, 2  ;;  %v5184_v28 = vmul.f32 2.0, %v5180_v33 }
 0x728   :  { %v5123_v13 = vadd.f32 %v5107_v44, %v5091_v61  ;;  %v5211_v36 = vsel %vm612_vm5, %v11065_v52, %v5209_v4  ;;  %v5099_v45 = vmul.f32 %v5067_v30, %v5067_v30  ;;  %v5227_v15 = vsel %vm614_vm6, %v5226_v16, %v10265_v49  ;;  %v11066_v52 = vld [vmem:[#allocation9_spill] sm:$0xff]  ;;  %v11067_v16 = vld [vmem:[#allocation10_spill] sm:$0xff] }
 0x729   :  { %v5213_v27 = vsel %vm614_vm6, %v5212_v0, %v5211_v36  ;;  %v5115_v5 = vmul.f32 %v5083_v35, %v5083_v35  ;;  %v5229_v42 = vsel %vm616_vm7, %v5228_v63, %v5227_v15  ;;  %6141 = vrsqrt.f32 %v5184_v28 }
 0x72a   :  { %v5216_v48 = vrot.slane %v5123_v13, 1  ;;  %v5215_v24 = vsel %vm616_vm7, %v5214_v22, %v5213_v27 }
 0x72b   :  { %v5131_v56 = vadd.f32 %v5115_v5, %v5099_v45 }
 0x72c   :  { %v5217_v23 = vsel %vm618_vm8, %v5216_v48, %v5215_v24  ;;  %v11068_v48 = vld [vmem:[#allocation5_spill] sm:$0xff] }
 0x72d   :  { %v5234_v7 = vsel %vm1085_vm9, %v5217_v23, 0.0  ;;  %v5230_v9 = vrot.slane %v5131_v56, 1  ;;  %v11069_v23 = vld [vmem:[#allocation19_spill] sm:$0xff] }
 0x72e   :  { %5235 = vadd.xlane.f32.xlu0 %v5234_v7  ;;  %v11070_v7 = vld [vmem:[#allocation12_spill] sm:$0xff] }
 0x72f   :  { %v5231_v0 = vsel %vm618_vm8, %v5230_v9, %v5229_v42 }
 0x730   :  { %v5237_v25 = vsel %vm1085_vm9, %v5231_v0, 0.0  ;;  %v11071_v0 = vld [vmem:[#allocation14_spill] sm:$0xff] }
 0x732   :  { %5238 = vadd.xlane.f32.xlu0 %v5237_v25 }
 0x733   :  { %v6142_v54 = vpop.eup %6141 }
 0x7ad   :  { %v5183_v51 = vpop.xlane.xlu1 %5182 }
 0x7ae   :  { %v5185_v38 = vmul.f32 2.0, %v5183_v51 }
 0x7bb   :  { %v5236_v8 = vpop.xlane.xlu0 %5235 }
 0x7bc   :  { %v5240_v46 = vmul.f32 2.0, %v5236_v8  ;;  %v11072_v8 = vld [vmem:[#allocation6_spill] sm:$0xff] }
 0x7be   :  { %6143 = vrsqrt.f32 %v5240_v46 }
 0x7bf   :  { %v5239_v58 = vpop.xlane.xlu0 %5238 }
 0x7c0   :  { %v5241_v10 = vmul.f32 2.0, %v5239_v58  ;;  %v11073_v58 = vld [vmem:[#allocation11_spill] sm:$0xff] }
 0x7c2   :  { %6145 = vrsqrt.f32 %v5241_v10 }
 0x7c3   :  { %6147 = vrsqrt.f32 %v5185_v38  ;;  %v11074_v38 = vld [vmem:[#allocation17_spill] sm:$0xff] }
 0x7c8   :  { %v6144_v49 = vpop.eup %6143 }
 0x7c9   :  { %v5245_v37 = vsel %vm5244_vm14, %v6142_v54, %v6144_v49 }
 0x7ca   :  { %5263 = vrot.lane.b32.xlu0 %v5245_v37, %s6158_s21  ;;  %v5249_v17 = vrot.slane %v5245_v37, 1  ;;  %v5250_v2 = vrot.slane %v5245_v37, 2  ;;  %v5251_v1 = vrot.slane %v5245_v37, 3  ;;  %v5252_v11 = vrot.slane %v5245_v37, 4 }
 0x7cb   :  { %v5253_v3 = vrot.slane %v5245_v37, 5  ;;  %v5254_v40 = vrot.slane %v5245_v37, 6  ;;  %v5255_v14 = vrot.slane %v5245_v37, 7 }
 0x7cc   :  { %5265 = vrot.lane.b32.xlu1 %v5249_v17, %s6158_s21  ;;  %v6146_v32 = vpop.eup %6145 }
 0x7cd   :  { %v6148_v12 = vpop.eup %6147 }
 0x7ce   :  { %5327 = vrot.lane.b32.xlu0 %v5245_v37, %s6159_s22  ;;  %v5246_v6 = vsel %vm5244_vm14, %v6148_v12, %v6146_v32  ;;  %v11076_v12 = vld [vmem:[#allocation46_spill] sm:$0xff] }
 0x7cf   :  { %v5256_v26 = vrot.slane %v5246_v6, 1  ;;  %v5257_v50 = vrot.slane %v5246_v6, 2  ;;  %v5258_v47 = vrot.slane %v5246_v6, 3  ;;  %v5259_v60 = vrot.slane %v5246_v6, 4 }
 0x7d0   :  { %5329 = vrot.lane.b32.xlu1 %v5249_v17, %s6159_s22  ;;  %v5260_v18 = vrot.slane %v5246_v6, 5  ;;  %v5261_v19 = vrot.slane %v5246_v6, 6  ;;  %v5262_v31 = vrot.slane %v5246_v6, 7 }
 0x7d2   :  { %5267 = vrot.lane.b32.xlu0 %v5250_v2, %s6158_s21 }
 0x7d4   :  { %5269 = vrot.lane.b32.xlu1 %v5251_v1, %s6158_s21 }
 0x7d6   :  { %5331 = vrot.lane.b32.xlu0 %v5250_v2, %s6159_s22  ;;  %v11075_v2 = vld [vmem:[#allocation13_spill] sm:$0xff] }
 0x7d8   :  { %5333 = vrot.lane.b32.xlu1 %v5251_v1, %s6159_s22 }
 0x7da   :  { %5271 = vrot.lane.b32.xlu0 %v5252_v11, %s6158_s21 }
 0x7dc   :  { %5345 = vrot.lane.b32.xlu1 %v5256_v26, %s6159_s22 }
 0x7de   :  { %5335 = vrot.lane.b32.xlu0 %v5252_v11, %s6159_s22  ;;  %v11077_v11 = vld [vmem:[#allocation22_spill] sm:$0xff] }
 0x7e0   :  { %5283 = vrot.lane.b32.xlu1 %v5257_v50, %s6158_s21 }
 0x7e2   :  { %5273 = vrot.lane.b32.xlu0 %v5253_v3, %s6158_s21 }
 0x7e4   :  { %5347 = vrot.lane.b32.xlu1 %v5257_v50, %s6159_s22 }
 0x7e6   :  { %5337 = vrot.lane.b32.xlu0 %v5253_v3, %s6159_s22 }
 0x7e8   :  { %5285 = vrot.lane.b32.xlu1 %v5258_v47, %s6158_s21 }
 0x7ea   :  { %5275 = vrot.lane.b32.xlu0 %v5254_v40, %s6158_s21 }
 0x7ec   :  { %5349 = vrot.lane.b32.xlu1 %v5258_v47, %s6159_s22 }
 0x7ee   :  { %5339 = vrot.lane.b32.xlu0 %v5254_v40, %s6159_s22 }
 0x7f0   :  { %5287 = vrot.lane.b32.xlu1 %v5259_v60, %s6158_s21 }
 0x7f2   :  { %5279 = vrot.lane.b32.xlu0 %v5246_v6, %s6158_s21 }
 0x7f4   :  { %5351 = vrot.lane.b32.xlu1 %v5259_v60, %s6159_s22  ;;  %v11078_v60 = vld [vmem:[#allocation30_spill] sm:$0xff] }
 0x7f6   :  { %5343 = vrot.lane.b32.xlu0 %v5246_v6, %s6159_s22 }
 0x7f8   :  { %5289 = vrot.lane.b32.xlu1 %v5260_v18, %s6158_s21 }
 0x7fa   :  { %5281 = vrot.lane.b32.xlu0 %v5256_v26, %s6158_s21 }
 0x7fc   :  { %5353 = vrot.lane.b32.xlu1 %v5260_v18, %s6159_s22 }
 0x7fe   :  { %5277 = vrot.lane.b32.xlu0 %v5255_v14, %s6158_s21 }
 0x800   :  { %5291 = vrot.lane.b32.xlu1 %v5261_v19, %s6158_s21 }
 0x802   :  { %5341 = vrot.lane.b32.xlu0 %v5255_v14, %s6159_s22 }
 0x804   :  { %5355 = vrot.lane.b32.xlu1 %v5261_v19, %s6159_s22 }
 0x808   :  { %5293 = vrot.lane.b32.xlu1 %v5262_v31, %s6158_s21 }
 0x80c   :  { %5357 = vrot.lane.b32.xlu1 %v5262_v31, %s6159_s22  ;;  %v11079_v31 = vld [vmem:[#allocation15_spill] sm:$0xff] }
 0x83c   :  { %v5264_v55 = vpop.permute.xlu0 %5263 }
 0x83d   :  { %v5311_v25 = vmul.f32 %v5264_v55, %v11071_v0 }
 0x83e   :  { %v5266_v57 = vpop.permute.xlu1 %5265 }
 0x83f   :  { %v5312_v36 = vmul.f32 %v5266_v57, %v11066_v52 }
 0x840   :  { %v5328_v29 = vpop.permute.xlu0 %5327 }
 0x841   :  { %v5407_v24 = vrot.slane %v5312_v36, 7  ;;  %v5375_v1 = vmul.f32 %v5328_v29, %v11075_v2 }
 0x842   :  { %v5330_v21 = vpop.permute.xlu1 %5329 }
 0x843   :  { %v5376_v63 = vmul.f32 %v5330_v21, %v11068_v48  ;;  %v5408_v10 = vsel %vm606_vm2, %v5407_v24, %v5311_v25  ;;  %v11080_v21 = vld [vmem:[#allocation21_spill] sm:$0xff] }
 0x844   :  { %v5268_v39 = vpop.permute.xlu0 %5267 }
 0x845   :  { %v5313_v45 = vmul.f32 %v5268_v39, %v11067_v16  ;;  %v5457_v28 = vrot.slane %v5376_v63, 7  ;;  %v11084_v16 = vld [vmem:[#allocation18_spill] sm:$0xff] }
 0x846   :  { %v5270_v34 = vpop.permute.xlu1 %5269 }
 0x847   :  { %v5314_v56 = vmul.f32 %v5270_v34, %v11069_v23  ;;  %v5409_v42 = vrot.slane %v5313_v45, 6  ;;  %v5458_v3 = vsel %vm606_vm2, %v5457_v28, %v5375_v1  ;;  %v11081_v34 = vld [vmem:[#allocation49_spill] sm:$0xff]  ;;  %v11085_v23 = vld [vmem:[#allocation28_spill] sm:$0xff] }
 0x848   :  { %v5332_v62 = vpop.permute.xlu0 %5331 }
 0x849   :  { %v5377_v15 = vmul.f32 %v5332_v62, %v11070_v7  ;;  %v5411_v54 = vrot.slane %v5314_v56, 5  ;;  %v5410_v32 = vsel %vm608_vm3, %v5409_v42, %v5408_v10 }
 0x84a   :  { %v5334_v53 = vpop.permute.xlu1 %5333 }
 0x84b   :  { %v5378_v46 = vmul.f32 %v5334_v53, %v11072_v8  ;;  %v5459_v49 = vrot.slane %v5377_v15, 6  ;;  %v5412_v14 = vsel %vm610_vm4, %v5411_v54, %v5410_v32  ;;  %v11082_v53 = vld [vmem:[#allocation20_spill] sm:$0xff] }
 0x84c   :  { %v5272_v4 = vpop.permute.xlu0 %5271 }
 0x84d   :  { %v5315_v51 = vmul.f32 %v5272_v4, %v11073_v58  ;;  %v5461_v47 = vrot.slane %v5378_v46, 5  ;;  %v5460_v19 = vsel %vm608_vm3, %v5459_v49, %v5458_v3  ;;  %v11088_v46 = vld [vmem:[#allocation44_spill] sm:$0xff] }
 0x84e   :  { %v5346_v61 = vpop.permute.xlu1 %5345  ;;  %v11089_v49 = vld [vmem:[#allocation60_spill] sm:$0xff] }
 0x84f   :  { %v5413_v40 = vrot.slane %v5315_v51, 4  ;;  %v5462_v63 = vsel %vm610_vm4, %v5461_v47, %v5460_v19 }
 0x850   :  { %v5336_v44 = vpop.permute.xlu0 %5335 }
 0x851   :  { %v5379_v55 = vmul.f32 %v5336_v44, %v11079_v31  ;;  %v5414_v44 = vsel %vm612_vm5, %v5413_v40, %v5412_v14  ;;  %v11093_v14 = vld [vmem:[#allocation62_spill] sm:$0xff] }
 0x852   :  { %v5284_v41 = vpop.permute.xlu1 %5283 }
 0x853   :  { %v5321_v6 = vmul.f32 %v5284_v41, %v11076_v12  ;;  %v5463_v56 = vrot.slane %v5379_v55, 4  ;;  %v11091_v12 = vld [vmem:[#allocation85_spill] sm:$0xff]  ;;  %v11094_v55 = vld [vmem:[#allocation56_spill] sm:$0xff] }
 0x854   :  { %v5274_v59 = vpop.permute.xlu0 %5273 }
 0x855   :  { %v5316_v37 = vmul.f32 %v5274_v59, %v11074_v38  ;;  %v11083_v59 = vld [vmem:[#allocation34_spill] sm:$0xff]  ;;  %v5423_v52 = vrot.slane %v5321_v6, 6  ;;  %v5464_v32 = vsel %vm612_vm5, %v5463_v56, %v5462_v63 }
 0x856   :  { %v10359_v43 = vpop.permute.xlu1 %5347 }
 0x857   :  { %v5415_v57 = vrot.slane %v5316_v37, 3  ;;  %v5385_v58 = vmul.f32 %v10359_v43, %v11088_v46  ;;  %v11090_v37 = vld [vmem:[#allocation31_spill] sm:$0xff] }
 0x858   :  { %v5338_v22 = vpop.permute.xlu0 %5337 }
 0x859   :  { %v5380_v39 = vmul.f32 %v5338_v22, %v11080_v21  ;;  %v5473_v47 = vrot.slane %v5385_v58, 6 }
 0x85a   :  { %v5286_v30 = vpop.permute.xlu1 %5285 }
 0x85b   :  { %v5322_v62 = vmul.f32 %v5286_v30, %v11081_v34  ;;  %v5416_v30 = vsel %vm614_vm6, %v5415_v57, %v5414_v44  ;;  %v5465_v42 = vrot.slane %v5380_v39, 3 }
 0x85c   :  { %v5276_v35 = vpop.permute.xlu0 %5275 }
 0x85d   :  { %v5317_v26 = vmul.f32 %v5276_v35, %v11077_v11  ;;  %v5384_v35 = vmul.f32 %v5346_v61, %v11083_v59  ;;  %v5425_v0 = vrot.slane %v5322_v62, 5  ;;  %v5466_v43 = vsel %vm614_vm6, %v5465_v42, %v5464_v32 }
 0x85e   :  { %v10361_v13 = vpop.permute.xlu1 %5349 }
 0x85f   :  { %v5417_v36 = vrot.slane %v5317_v26, 2  ;;  %v5471_v8 = vrot.slane %v5384_v35, 7  ;;  %v11092_v26 = vld [vmem:[#allocation53_spill] sm:$0xff] }
 0x860   :  { %v5340_v20 = vpop.permute.xlu0 %5339 }
 0x861   :  { %v5381_v45 = vmul.f32 %v5340_v20, %v11084_v16  ;;  %v11087_v20 = vld [vmem:[#allocation16_spill] sm:$0xff]  ;;  %v5418_v51 = vsel %vm616_vm7, %v5417_v36, %v5416_v30 }
 0x862   :  { %v5288_v27 = vpop.permute.xlu1 %5287 }
 0x863   :  { %v5467_v10 = vrot.slane %v5381_v45, 2 }
 0x864   :  { %v5280_v5 = vpop.permute.xlu0 %5279 }
 0x865   :  { %v5319_v4 = vmul.f32 %v5280_v5, %v11082_v53  ;;  %v11086_v5 = vld [vmem:[#allocation57_spill] sm:$0xff]  ;;  %v5468_v40 = vsel %vm616_vm7, %v5467_v10, %v5466_v43 }
 0x866   :  { %v10368_v9 = vpop.permute.xlu1 %5351  ;;  %v5323_v7 = vmul.f32 %v5288_v27, %v11086_v5 }
 0x867   :  { %v5387_v57 = vmul.f32 %v10368_v9, %v11094_v55 }
 0x868   :  { %v5344_v33 = vpop.permute.xlu0 %5343 }
 0x869   :  { %v5383_v25 = vmul.f32 %v5344_v33, %v11087_v20  ;;  %v5427_v33 = vrot.slane %v5323_v7, 4  ;;  %v5477_v36 = vrot.slane %v5387_v57, 4 }
 0x86a   :  { %v5290_v17 = vpop.permute.xlu1 %5289 }
 0x86b   :  { %v5324_v38 = vmul.f32 %v5290_v17, %v11089_v49  ;;  %v5386_v17 = vmul.f32 %v10361_v13, %v11092_v26  ;;  %v11095_v13 = vld [vmem:[#allocation64_spill] sm:$0xff] }
 0x86c   :  { %v5282_v50 = vpop.permute.xlu0 %5281 }
 0x86d   :  { %v5320_v18 = vmul.f32 %v5282_v50, %v11078_v60  ;;  %v5472_v50 = vsel %vm606_vm2, %v5471_v8, %v5383_v25  ;;  %v5475_v53 = vrot.slane %v5386_v17, 5 }
 0x86e   :  { %v5354_v29 = vpop.permute.xlu1 %5353  ;;  %v5474_v21 = vsel %vm608_vm3, %v5473_v47, %v5472_v50 }
 0x86f   :  { %v5421_v41 = vrot.slane %v5320_v18, 7  ;;  %v5429_v18 = vrot.slane %v5324_v38, 3  ;;  %v5388_v19 = vmul.f32 %v5354_v29, %v11093_v14  ;;  %v5476_v29 = vsel %vm610_vm4, %v5475_v53, %v5474_v21 }
 0x870   :  { %v5278_v48 = vpop.permute.xlu0 %5277 }
 0x871   :  { %v5422_v24 = vsel %vm606_vm2, %v5421_v41, %v5319_v4  ;;  %v5318_v22 = vmul.f32 %v5278_v48, %v11085_v23  ;;  %v11096_v41 = vld [vmem:[#allocation67_spill] sm:$0xff]  ;;  %v5479_v35 = vrot.slane %v5388_v19, 3  ;;  %v11097_v48 = vld [vmem:[#allocation88_spill] sm:$0xff] }
 0x872   :  { %v5424_v61 = vsel %vm608_vm3, %v5423_v52, %v5422_v24  ;;  %v5292_v15 = vpop.permute.xlu1 %5291  ;;  %v5478_v24 = vsel %vm612_vm5, %v5477_v36, %v5476_v29 }
 0x873   :  { %v5419_v28 = vrot.slane %v5318_v22, 1  ;;  %v5426_v27 = vsel %vm610_vm4, %v5425_v0, %v5424_v61  ;;  %v5325_v6 = vmul.f32 %v5292_v15, %v11091_v12  ;;  %v5480_v23 = vsel %vm614_vm6, %v5479_v35, %v5478_v24 }
 0x874   :  { %v5342_v54 = vpop.permute.xlu0 %5341  ;;  %v5428_v60 = vsel %vm612_vm5, %v5427_v33, %v5426_v27 }
 0x875   :  { %v5382_v2 = vmul.f32 %v5342_v54, %v11090_v37  ;;  %v5420_v1 = vsel %vm618_vm8, %v5419_v28, %v5418_v51  ;;  %v5431_v39 = vrot.slane %v5325_v6, 2  ;;  %v5430_v4 = vsel %vm614_vm6, %v5429_v18, %v5428_v60 }
 0x876   :  { %v5356_v11 = vpop.permute.xlu1 %5355  ;;  %5435 = vrot.lane.b32.xlu0 %v5420_v1, %s6160_s6 }
 0x877   :  { %v5469_v3 = vrot.slane %v5382_v2, 1  ;;  %v5389_v34 = vmul.f32 %v5356_v11, %v11095_v13  ;;  %v5432_v9 = vsel %vm616_vm7, %v5431_v39, %v5430_v4 }
 0x879   :  { %v5470_v31 = vsel %vm618_vm8, %v5469_v3, %v5468_v40  ;;  %v5481_v16 = vrot.slane %v5389_v34, 2 }
 0x87a   :  { %v5294_v62 = vpop.permute.xlu1 %5293  ;;  %5485 = vrot.lane.b32.xlu0 %v5470_v31, %s6160_s6 }
 0x87b   :  { %v5326_v59 = vmul.f32 %v5294_v62, %v11096_v41  ;;  %v5482_v56 = vsel %vm616_vm7, %v5481_v16, %v5480_v23 }
 0x87d   :  { %v5433_v52 = vrot.slane %v5326_v59, 1 }
 0x87e   :  { %v5358_v45 = vpop.permute.xlu1 %5357 }
 0x87f   :  { %v5390_v63 = vmul.f32 %v5358_v45, %v11097_v48  ;;  %v5434_v44 = vsel %vm618_vm8, %v5433_v52, %v5432_v9 }
 0x880   :  { %5437 = vrot.lane.b32.xlu1 %v5434_v44, %s6160_s6 }
 0x881   :  { %v5483_v22 = vrot.slane %v5390_v63, 1 }
 0x883   :  { %v5484_v30 = vsel %vm618_vm8, %v5483_v22, %v5482_v56 }
 0x884   :  { %5487 = vrot.lane.b32.xlu1 %v5484_v30, %s6160_s6 }
 0x8e8   :  { %v5436_v5 = vpop.permute.xlu0 %5435 }
 0x8ec   :  { %v5486_v7 = vpop.permute.xlu0 %5485 }
 0x8ed   :  { %v5491_v61 = vsel %vm70_vm1, %v5436_v5, %v5486_v7 }
 0x8ee   :  { %v5494_v15 = vsel %vm5493_vm15, %v5491_v61, 0.0 }
 0x8ef   :  { %5501 = vst [vmem:[%s10450_s10] sm:$0xff] %v5494_v15 }
 0x8f2   :  { %v5438_v42 = vpop.permute.xlu1 %5437 }
 0x8f6   :  { %v5488_v0 = vpop.permute.xlu1 %5487 }
 0x8f7   :  { %v5492_v20 = vsel %vm70_vm1, %v5438_v42, %v5488_v0 }
 0x8f8   :  { %v5495_v25 = vsel %vm5493_vm15, %v5492_v20, 0.0 }
 0x8f9   :  { %5503 = vst [vmem:[%s10450_s10 + $0x10] sm:$0xff] %v5495_v25 }

</bundles_post_ra>
